<compile_context>
chip_gen: v5e
topology: v5e:2x2
jax: 0.10.0
libtpu: 0.0.40
codegen_flags: <defaults>
</compile_context>

<pallas_src>
import functools

import numpy as np
import jax
import jax.numpy as jnp
from jax import lax
from jax.experimental import pallas as pl
from jax.experimental.pallas import tpu as pltpu


# ------------------------------ fused kernel --------------------------------

def _down_block_kernel(x_ref, g0_ref, g1_ref, gmask_ref, wd_ref, w1_ref,
                       w2_ref, vec_ref, o_ref, *, eps, inv_scale, inv_cnt):
    """Whole EfficientDownBlock forward for one batch element.

    Shapes (C = out_channels, Ci = in_channels, S = H*W, So = Ho*Wo):
      x_ref     (1, Ci, S)   input image (channels in sublanes, pixels in lanes)
      g0_ref    (9, S, So)   stride-2 tap-gather matrices (downsampler im2col)
      g1_ref    (9, So, So)  stride-1 tap-gather matrices (resnet convs)
      gmask_ref (C, C)       1.0 where two channels share a GroupNorm group
      wd_ref    (9, C, Ci)   downsampler weights, one (C, Ci) matrix per tap
      w1_ref    (9, C, C)    resnet conv1 weights per tap
      w2_ref    (9, C, C)    resnet conv2 weights per tap
      vec_ref   (7, C, 1)    [down_b, gn1_g, gn1_b, conv1_b, gn2_g, gn2_b, conv2_b]
      o_ref     (1, C, So)   output
    """
    f32 = jnp.float32
    cout = wd_ref.shape[1]

    x = x_ref[0].astype(f32)                       # (Ci, S)
    gmask = gmask_ref[...].astype(f32)             # (C, C)
    bias_d = vec_ref[0].astype(f32)                # (C, 1)
    gam1, bet1, bias1 = (vec_ref[i].astype(f32) for i in (1, 2, 3))
    gam2, bet2, bias2 = (vec_ref[i].astype(f32) for i in (4, 5, 6))

    def conv3x3(a, g_ref, w_ref, bias):
        """3x3 conv: sum over taps of W_t @ (a @ G_t); zero-padding baked in G."""
        s_out = g_ref.shape[2]
        acc = jnp.zeros((cout, s_out), f32)
        for t in range(9):
            shifted = jnp.dot(a, g_ref[t].astype(f32),
                              preferred_element_type=f32)           # (Cin, So)
            acc = acc + jnp.dot(w_ref[t].astype(f32), shifted,
                                preferred_element_type=f32)         # (C,  So)
        return acc + bias

    def group_stat(v):
        # Per-position group sums on the MXU, then a lane reduction (XLU).
        g = jnp.dot(gmask, v, preferred_element_type=f32)            # (C, So)
        return jnp.sum(g, axis=1, keepdims=True) * inv_cnt           # (C, 1)

    def gn_swish(v, gam, bet):
        mean = group_stat(v)
        d = v - mean
        var = group_stat(d * d)        # two-pass variance (numerically stable)
        y = d * lax.rsqrt(var + eps) * gam + bet
        return y * jax.nn.sigmoid(y)   # Swish / SiLU

    # Downsampler conv (stride 2, pad 1).
    h = conv3x3(x, g0_ref, wd_ref, bias_d)                           # (C, So)

    # EfficientResNetBlock (in == out, so identity shortcut).
    # TODO(synk): temb projection path omitted (temb_channels=None, temb=None).
    a = gn_swish(h, gam1, bet1)
    r = conv3x3(a, g1_ref, w1_ref, bias1)
    a = gn_swish(r, gam2, bet2)
    r = conv3x3(a, g1_ref, w2_ref, bias2)

    # Residual add + output scale fused into the epilogue.
    o_ref[0] = ((h + r) * inv_scale).astype(o_ref.dtype)


# --------------------------- wrapper / constants -----------------------------

def _tap_gather(h_in, w_in, h_out, w_out, stride):
    """(9, h_in*w_in, h_out*w_out) 0/1 matrices: G[t, i, j] = 1 iff input pixel
    i feeds output pixel j through 3x3 tap t (pad=1; out-of-bounds -> zeros)."""
    t = np.arange(9)
    ky = (t // 3)[:, None, None]
    kx = (t % 3)[:, None, None]
    oy = np.arange(h_out)[None, :, None]
    ox = np.arange(w_out)[None, None, :]
    iy = stride * oy + ky - 1                                     # (9, Ho, 1)
    ix = stride * ox + kx - 1                                     # (9, 1, Wo)
    valid = (iy >= 0) & (iy < h_in) & (ix >= 0) & (ix < w_in)     # (9, Ho, Wo)
    src = np.where(valid, iy * w_in + ix, -1).reshape(9, 1, h_out * w_out)
    rows = np.arange(h_in * w_in).reshape(1, h_in * w_in, 1)
    return (rows == src).astype(np.float32)


def efficient_down_block(x_nchw, params, *, groups=8, eps=1e-6,
                         output_scale_factor=1.0):
    """Returns (hidden_states, states) like the PyTorch module (NCHW outputs)."""
    N, Cin, H, W = x_nchw.shape
    Cout = params["down_w"].shape[0]
    stride = 2
    Ho = (H + 2 - 3) // stride + 1
    Wo = (W + 2 - 3) // stride + 1
    S, So = H * W, Ho * Wo

    # Shape-only constants (baked into the executable under jit).
    g0 = jnp.asarray(_tap_gather(H, W, Ho, Wo, stride))           # (9, S, So)
    g1 = jnp.asarray(_tap_gather(Ho, Wo, Ho, Wo, 1))              # (9, So, So)
    gid = np.arange(Cout) // (Cout // groups)
    gmask = jnp.asarray((gid[:, None] == gid[None, :]).astype(np.float32))

    # Weights as per-tap (Cout, Cin) matrices, tap index = ky*3 + kx.
    wd = jnp.transpose(params["down_w"], (2, 3, 0, 1)).reshape(9, Cout, Cin)
    w1 = jnp.transpose(params["conv1_w"], (2, 3, 0, 1)).reshape(9, Cout, Cout)
    w2 = jnp.transpose(params["conv2_w"], (2, 3, 0, 1)).reshape(9, Cout, Cout)
    vecs = jnp.stack([params["down_b"], params["gn1_g"], params["gn1_b"],
                      params["conv1_b"], params["gn2_g"], params["gn2_b"],
                      params["conv2_b"]], axis=0).reshape(7, Cout, 1)

    x_flat = x_nchw.reshape(N, Cin, S)

    kernel = functools.partial(
        _down_block_kernel,
        eps=float(eps),
        inv_scale=1.0 / float(output_scale_factor),
        inv_cnt=1.0 / float((Cout // groups) * So))

    out = pl.pallas_call(
        kernel,
        out_shape=jax.ShapeDtypeStruct((N, Cout, So), x_nchw.dtype),
        grid=(N,),
        in_specs=[
            pl.BlockSpec((1, Cin, S), lambda n: (n, 0, 0)),
            pl.BlockSpec((9, S, So), lambda n: (0, 0, 0)),
            pl.BlockSpec((9, So, So), lambda n: (0, 0, 0)),
            pl.BlockSpec((Cout, Cout), lambda n: (0, 0)),
            pl.BlockSpec((9, Cout, Cin), lambda n: (0, 0, 0)),
            pl.BlockSpec((9, Cout, Cout), lambda n: (0, 0, 0)),
            pl.BlockSpec((9, Cout, Cout), lambda n: (0, 0, 0)),
            pl.BlockSpec((7, Cout, 1), lambda n: (0, 0, 0)),
        ],
        out_specs=pl.BlockSpec((1, Cout, So), lambda n: (n, 0, 0)),
        compiler_params=pltpu.CompilerParams(
            dimension_semantics=("parallel",)),
    )(x_flat, g0, g1, gmask, wd, w1, w2, vecs)

    h = out.reshape(N, Cout, Ho, Wo)
    # TODO(synk): AttentionBlock path omitted (add_attention=False by default).
    states = (h,)
    return h, states


# ------------------------------ pure-JAX reference ---------------------------

def _ref_forward(x_nchw, params, groups, eps, scale):
    def conv(x, w, b, stride):
        y = lax.conv_general_dilated(
            x, w, (stride, stride), ((1, 1), (1, 1)),
            dimension_numbers=("NCHW", "OIHW", "NCHW"))
        return y + b[None, :, None, None]

    def gn_swish(x, g, bta):
        N, C, H, W = x.shape
        xg = x.reshape(N, groups, C // groups, H, W)
        m = xg.mean(axis=(2, 3, 4), keepdims=True)
        v = xg.var(axis=(2, 3, 4), keepdims=True)
        y = ((xg - m) / jnp.sqrt(v + eps)).reshape(N, C, H, W)
        y = y * g[None, :, None, None] + bta[None, :, None, None]
        return y * jax.nn.sigmoid(y)

    h = conv(x_nchw, params["down_w"], params["down_b"], 2)
    r = gn_swish(h, params["gn1_g"], params["gn1_b"])
    r = conv(r, params["conv1_w"], params["conv1_b"], 1)
    r = gn_swish(r, params["gn2_g"], params["gn2_b"])
    r = conv(r, params["conv2_w"], params["conv2_b"], 1)
    return (h + r) / scale


# --------------------------------- main ---------------------------------------

if __name__ == "__main__":
    N, Cin, Cout, H, W = 2, 8, 16, 16, 16
    groups, eps, scale = 8, 1e-6, 1.0

    key = jax.random.PRNGKey(0)
    ks = jax.random.split(key, 10)
    params = {
        "down_w": 0.1 * jax.random.normal(ks[0], (Cout, Cin, 3, 3), jnp.float32),
        "down_b": 0.05 * jax.random.normal(ks[1], (Cout,), jnp.float32),
        "gn1_g": 1.0 + 0.1 * jax.random.normal(ks[2], (Cout,), jnp.float32),
        "gn1_b": 0.05 * jax.random.normal(ks[3], (Cout,), jnp.float32),
        "conv1_w": 0.1 * jax.random.normal(ks[4], (Cout, Cout, 3, 3), jnp.float32),
        "conv1_b": 0.05 * jax.random.normal(ks[5], (Cout,), jnp.float32),
        "gn2_g": 1.0 + 0.1 * jax.random.normal(ks[6], (Cout,), jnp.float32),
        "gn2_b": 0.05 * jax.random.normal(ks[7], (Cout,), jnp.float32),
        "conv2_w": 0.1 * jax.random.normal(ks[8], (Cout, Cout, 3, 3), jnp.float32),
        "conv2_b": 0.05 * jax.random.normal(ks[9], (Cout,), jnp.float32),
    }

    x = jax.random.normal(jax.random.PRNGKey(3), (N, Cin, H, W), jnp.float32)

    fwd = jax.jit(functools.partial(efficient_down_block, groups=groups, eps=eps,
                                    output_scale_factor=scale))
    hidden, states = fwd(x, params)
    hidden = jax.block_until_ready(hidden)

    assert hidden.shape == (N, Cout, H // 2, W // 2), hidden.shape
    assert len(states) == 1 and states[0].shape == hidden.shape

    ref = _ref_forward(x, params, groups, eps, scale)
    err = float(jnp.max(jnp.abs(hidden - ref)))
    assert jnp.allclose(hidden, ref, atol=2e-3, rtol=2e-3), err

    print("KERNEL_OK")
</pallas_src>

<mosaic_0001>
module attributes {stable_mosaic.version = 11 : i64} {
  func.func @_down_block_kernel(%arg0: i32, %arg1: memref<1x8x256xf32, #tpu.memory_space<vmem>>, %arg2: memref<9x256x64xf32, #tpu.memory_space<vmem>>, %arg3: memref<9x64x64xf32, #tpu.memory_space<vmem>>, %arg4: memref<16x16xf32, #tpu.memory_space<vmem>>, %arg5: memref<9x16x8xf32, #tpu.memory_space<vmem>>, %arg6: memref<9x16x16xf32, #tpu.memory_space<vmem>>, %arg7: memref<9x16x16xf32, #tpu.memory_space<vmem>>, %arg8: memref<7x16x1xf32, #tpu.memory_space<vmem>>, %arg9: memref<1x16x64xf32, #tpu.memory_space<vmem>>) attributes {dimension_semantics = [#tpu.dimension_semantics<parallel>], iteration_bounds = array<i64: 2>, scalar_prefetch = 0 : i64, scratch_operands = 0 : i64, tpu.core_type = #tpu.core_type<tc>, window_params = [{transform_indices = @transform_0, window_bounds = array<i64: 1, 8, 256>}, {pipeline_mode = #tpu.pipeline_mode<synchronous>, transform_indices = @transform_1, window_bounds = array<i64: 9, 256, 64>}, {pipeline_mode = #tpu.pipeline_mode<synchronous>, transform_indices = @transform_2, window_bounds = array<i64: 9, 64, 64>}, {pipeline_mode = #tpu.pipeline_mode<synchronous>, transform_indices = @transform_3, window_bounds = array<i64: 16, 16>}, {pipeline_mode = #tpu.pipeline_mode<synchronous>, transform_indices = @transform_4, window_bounds = array<i64: 9, 16, 8>}, {pipeline_mode = #tpu.pipeline_mode<synchronous>, transform_indices = @transform_5, window_bounds = array<i64: 9, 16, 16>}, {pipeline_mode = #tpu.pipeline_mode<synchronous>, transform_indices = @transform_6, window_bounds = array<i64: 9, 16, 16>}, {pipeline_mode = #tpu.pipeline_mode<synchronous>, transform_indices = @transform_7, window_bounds = array<i64: 7, 16, 1>}, {transform_indices = @transform_8, window_bounds = array<i64: 1, 16, 64>}]} {
    %c0 = arith.constant 0 : index
    %c0_0 = arith.constant 0 : index
    %c0_1 = arith.constant 0 : index
    %0 = vector.load %arg1[%c0, %c0_0, %c0_1] : memref<1x8x256xf32, #tpu.memory_space<vmem>>, vector<1x8x256xf32>
    %1 = vector.shape_cast %0 : vector<1x8x256xf32> to vector<8x256xf32>
    %c0_2 = arith.constant 0 : index
    %c0_3 = arith.constant 0 : index
    %2 = vector.load %arg4[%c0_2, %c0_3] : memref<16x16xf32, #tpu.memory_space<vmem>>, vector<16x16xf32>
    %c0_4 = arith.constant 0 : index
    %c0_5 = arith.constant 0 : index
    %c0_6 = arith.constant 0 : index
    %3 = vector.load %arg8[%c0_4, %c0_5, %c0_6] : memref<7x16x1xf32, #tpu.memory_space<vmem>>, vector<1x16x1xf32>
    %4 = vector.shape_cast %3 : vector<1x16x1xf32> to vector<16x1xf32>
    %c1 = arith.constant 1 : index
    %c0_7 = arith.constant 0 : index
    %c0_8 = arith.constant 0 : index
    %5 = vector.load %arg8[%c1, %c0_7, %c0_8] : memref<7x16x1xf32, #tpu.memory_space<vmem>>, vector<1x16x1xf32>
    %6 = vector.shape_cast %5 : vector<1x16x1xf32> to vector<16x1xf32>
    %c2 = arith.constant 2 : index
    %c0_9 = arith.constant 0 : index
    %c0_10 = arith.constant 0 : index
    %7 = vector.load %arg8[%c2, %c0_9, %c0_10] : memref<7x16x1xf32, #tpu.memory_space<vmem>>, vector<1x16x1xf32>
    %8 = vector.shape_cast %7 : vector<1x16x1xf32> to vector<16x1xf32>
    %c3 = arith.constant 3 : index
    %c0_11 = arith.constant 0 : index
    %c0_12 = arith.constant 0 : index
    %9 = vector.load %arg8[%c3, %c0_11, %c0_12] : memref<7x16x1xf32, #tpu.memory_space<vmem>>, vector<1x16x1xf32>
    %10 = vector.shape_cast %9 : vector<1x16x1xf32> to vector<16x1xf32>
    %c4 = arith.constant 4 : index
    %c0_13 = arith.constant 0 : index
    %c0_14 = arith.constant 0 : index
    %11 = vector.load %arg8[%c4, %c0_13, %c0_14] : memref<7x16x1xf32, #tpu.memory_space<vmem>>, vector<1x16x1xf32>
    %12 = vector.shape_cast %11 : vector<1x16x1xf32> to vector<16x1xf32>
    %c5 = arith.constant 5 : index
    %c0_15 = arith.constant 0 : index
    %c0_16 = arith.constant 0 : index
    %13 = vector.load %arg8[%c5, %c0_15, %c0_16] : memref<7x16x1xf32, #tpu.memory_space<vmem>>, vector<1x16x1xf32>
    %14 = vector.shape_cast %13 : vector<1x16x1xf32> to vector<16x1xf32>
    %c6 = arith.constant 6 : index
    %c0_17 = arith.constant 0 : index
    %c0_18 = arith.constant 0 : index
    %15 = vector.load %arg8[%c6, %c0_17, %c0_18] : memref<7x16x1xf32, #tpu.memory_space<vmem>>, vector<1x16x1xf32>
    %16 = vector.shape_cast %15 : vector<1x16x1xf32> to vector<16x1xf32>
    %cst = arith.constant 0.000000e+00 : f32
    %17 = vector.broadcast %cst : f32 to vector<16x64xf32>
    %c0_19 = arith.constant 0 : index
    %c0_20 = arith.constant 0 : index
    %c0_21 = arith.constant 0 : index
    %18 = vector.load %arg2[%c0_19, %c0_20, %c0_21] : memref<9x256x64xf32, #tpu.memory_space<vmem>>, vector<1x256x64xf32>
    %19 = vector.shape_cast %18 : vector<1x256x64xf32> to vector<256x64xf32>
    %cst_22 = arith.constant dense<0.000000e+00> : vector<8x64xf32>
    %20 = tpu.matmul %1, %19, %cst_22 {dimension_numbers = #tpu.dot_dimension_numbers<[1], [0], [0], [1], [0, 0, 1, 1], [], []>} : vector<8x256xf32>, vector<256x64xf32>, vector<8x64xf32> -> vector<8x64xf32>
    %c0_23 = arith.constant 0 : index
    %c0_24 = arith.constant 0 : index
    %c0_25 = arith.constant 0 : index
    %21 = vector.load %arg5[%c0_23, %c0_24, %c0_25] : memref<9x16x8xf32, #tpu.memory_space<vmem>>, vector<1x16x8xf32>
    %22 = vector.shape_cast %21 : vector<1x16x8xf32> to vector<16x8xf32>
    %cst_26 = arith.constant dense<0.000000e+00> : vector<16x64xf32>
    %23 = tpu.matmul %22, %20, %cst_26 {dimension_numbers = #tpu.dot_dimension_numbers<[1], [0], [0], [1], [0, 0, 1, 1], [], []>} : vector<16x8xf32>, vector<8x64xf32>, vector<16x64xf32> -> vector<16x64xf32>
    %24 = arith.addf %17, %23 : vector<16x64xf32>
    %c1_27 = arith.constant 1 : index
    %c0_28 = arith.constant 0 : index
    %c0_29 = arith.constant 0 : index
    %25 = vector.load %arg2[%c1_27, %c0_28, %c0_29] : memref<9x256x64xf32, #tpu.memory_space<vmem>>, vector<1x256x64xf32>
    %26 = vector.shape_cast %25 : vector<1x256x64xf32> to vector<256x64xf32>
    %cst_30 = arith.constant dense<0.000000e+00> : vector<8x64xf32>
    %27 = tpu.matmul %1, %26, %cst_30 {dimension_numbers = #tpu.dot_dimension_numbers<[1], [0], [0], [1], [0, 0, 1, 1], [], []>} : vector<8x256xf32>, vector<256x64xf32>, vector<8x64xf32> -> vector<8x64xf32>
    %c1_31 = arith.constant 1 : index
    %c0_32 = arith.constant 0 : index
    %c0_33 = arith.constant 0 : index
    %28 = vector.load %arg5[%c1_31, %c0_32, %c0_33] : memref<9x16x8xf32, #tpu.memory_space<vmem>>, vector<1x16x8xf32>
    %29 = vector.shape_cast %28 : vector<1x16x8xf32> to vector<16x8xf32>
    %cst_34 = arith.constant dense<0.000000e+00> : vector<16x64xf32>
    %30 = tpu.matmul %29, %27, %cst_34 {dimension_numbers = #tpu.dot_dimension_numbers<[1], [0], [0], [1], [0, 0, 1, 1], [], []>} : vector<16x8xf32>, vector<8x64xf32>, vector<16x64xf32> -> vector<16x64xf32>
    %31 = arith.addf %24, %30 : vector<16x64xf32>
    %c2_35 = arith.constant 2 : index
    %c0_36 = arith.constant 0 : index
    %c0_37 = arith.constant 0 : index
    %32 = vector.load %arg2[%c2_35, %c0_36, %c0_37] : memref<9x256x64xf32, #tpu.memory_space<vmem>>, vector<1x256x64xf32>
    %33 = vector.shape_cast %32 : vector<1x256x64xf32> to vector<256x64xf32>
    %cst_38 = arith.constant dense<0.000000e+00> : vector<8x64xf32>
    %34 = tpu.matmul %1, %33, %cst_38 {dimension_numbers = #tpu.dot_dimension_numbers<[1], [0], [0], [1], [0, 0, 1, 1], [], []>} : vector<8x256xf32>, vector<256x64xf32>, vector<8x64xf32> -> vector<8x64xf32>
    %c2_39 = arith.constant 2 : index
    %c0_40 = arith.constant 0 : index
    %c0_41 = arith.constant 0 : index
    %35 = vector.load %arg5[%c2_39, %c0_40, %c0_41] : memref<9x16x8xf32, #tpu.memory_space<vmem>>, vector<1x16x8xf32>
    %36 = vector.shape_cast %35 : vector<1x16x8xf32> to vector<16x8xf32>
    %cst_42 = arith.constant dense<0.000000e+00> : vector<16x64xf32>
    %37 = tpu.matmul %36, %34, %cst_42 {dimension_numbers = #tpu.dot_dimension_numbers<[1], [0], [0], [1], [0, 0, 1, 1], [], []>} : vector<16x8xf32>, vector<8x64xf32>, vector<16x64xf32> -> vector<16x64xf32>
    %38 = arith.addf %31, %37 : vector<16x64xf32>
    %c3_43 = arith.constant 3 : index
    %c0_44 = arith.constant 0 : index
    %c0_45 = arith.constant 0 : index
    %39 = vector.load %arg2[%c3_43, %c0_44, %c0_45] : memref<9x256x64xf32, #tpu.memory_space<vmem>>, vector<1x256x64xf32>
    %40 = vector.shape_cast %39 : vector<1x256x64xf32> to vector<256x64xf32>
    %cst_46 = arith.constant dense<0.000000e+00> : vector<8x64xf32>
    %41 = tpu.matmul %1, %40, %cst_46 {dimension_numbers = #tpu.dot_dimension_numbers<[1], [0], [0], [1], [0, 0, 1, 1], [], []>} : vector<8x256xf32>, vector<256x64xf32>, vector<8x64xf32> -> vector<8x64xf32>
    %c3_47 = arith.constant 3 : index
    %c0_48 = arith.constant 0 : index
    %c0_49 = arith.constant 0 : index
    %42 = vector.load %arg5[%c3_47, %c0_48, %c0_49] : memref<9x16x8xf32, #tpu.memory_space<vmem>>, vector<1x16x8xf32>
    %43 = vector.shape_cast %42 : vector<1x16x8xf32> to vector<16x8xf32>
    %cst_50 = arith.constant dense<0.000000e+00> : vector<16x64xf32>
    %44 = tpu.matmul %43, %41, %cst_50 {dimension_numbers = #tpu.dot_dimension_numbers<[1], [0], [0], [1], [0, 0, 1, 1], [], []>} : vector<16x8xf32>, vector<8x64xf32>, vector<16x64xf32> -> vector<16x64xf32>
    %45 = arith.addf %38, %44 : vector<16x64xf32>
    %c4_51 = arith.constant 4 : index
    %c0_52 = arith.constant 0 : index
    %c0_53 = arith.constant 0 : index
    %46 = vector.load %arg2[%c4_51, %c0_52, %c0_53] : memref<9x256x64xf32, #tpu.memory_space<vmem>>, vector<1x256x64xf32>
    %47 = vector.shape_cast %46 : vector<1x256x64xf32> to vector<256x64xf32>
    %cst_54 = arith.constant dense<0.000000e+00> : vector<8x64xf32>
    %48 = tpu.matmul %1, %47, %cst_54 {dimension_numbers = #tpu.dot_dimension_numbers<[1], [0], [0], [1], [0, 0, 1, 1], [], []>} : vector<8x256xf32>, vector<256x64xf32>, vector<8x64xf32> -> vector<8x64xf32>
    %c4_55 = arith.constant 4 : index
    %c0_56 = arith.constant 0 : index
    %c0_57 = arith.constant 0 : index
    %49 = vector.load %arg5[%c4_55, %c0_56, %c0_57] : memref<9x16x8xf32, #tpu.memory_space<vmem>>, vector<1x16x8xf32>
    %50 = vector.shape_cast %49 : vector<1x16x8xf32> to vector<16x8xf32>
    %cst_58 = arith.constant dense<0.000000e+00> : vector<16x64xf32>
    %51 = tpu.matmul %50, %48, %cst_58 {dimension_numbers = #tpu.dot_dimension_numbers<[1], [0], [0], [1], [0, 0, 1, 1], [], []>} : vector<16x8xf32>, vector<8x64xf32>, vector<16x64xf32> -> vector<16x64xf32>
    %52 = arith.addf %45, %51 : vector<16x64xf32>
    %c5_59 = arith.constant 5 : index
    %c0_60 = arith.constant 0 : index
    %c0_61 = arith.constant 0 : index
    %53 = vector.load %arg2[%c5_59, %c0_60, %c0_61] : memref<9x256x64xf32, #tpu.memory_space<vmem>>, vector<1x256x64xf32>
    %54 = vector.shape_cast %53 : vector<1x256x64xf32> to vector<256x64xf32>
    %cst_62 = arith.constant dense<0.000000e+00> : vector<8x64xf32>
    %55 = tpu.matmul %1, %54, %cst_62 {dimension_numbers = #tpu.dot_dimension_numbers<[1], [0], [0], [1], [0, 0, 1, 1], [], []>} : vector<8x256xf32>, vector<256x64xf32>, vector<8x64xf32> -> vector<8x64xf32>
    %c5_63 = arith.constant 5 : index
    %c0_64 = arith.constant 0 : index
    %c0_65 = arith.constant 0 : index
    %56 = vector.load %arg5[%c5_63, %c0_64, %c0_65] : memref<9x16x8xf32, #tpu.memory_space<vmem>>, vector<1x16x8xf32>
    %57 = vector.shape_cast %56 : vector<1x16x8xf32> to vector<16x8xf32>
    %cst_66 = arith.constant dense<0.000000e+00> : vector<16x64xf32>
    %58 = tpu.matmul %57, %55, %cst_66 {dimension_numbers = #tpu.dot_dimension_numbers<[1], [0], [0], [1], [0, 0, 1, 1], [], []>} : vector<16x8xf32>, vector<8x64xf32>, vector<16x64xf32> -> vector<16x64xf32>
    %59 = arith.addf %52, %58 : vector<16x64xf32>
    %c6_67 = arith.constant 6 : index
    %c0_68 = arith.constant 0 : index
    %c0_69 = arith.constant 0 : index
    %60 = vector.load %arg2[%c6_67, %c0_68, %c0_69] : memref<9x256x64xf32, #tpu.memory_space<vmem>>, vector<1x256x64xf32>
    %61 = vector.shape_cast %60 : vector<1x256x64xf32> to vector<256x64xf32>
    %cst_70 = arith.constant dense<0.000000e+00> : vector<8x64xf32>
    %62 = tpu.matmul %1, %61, %cst_70 {dimension_numbers = #tpu.dot_dimension_numbers<[1], [0], [0], [1], [0, 0, 1, 1], [], []>} : vector<8x256xf32>, vector<256x64xf32>, vector<8x64xf32> -> vector<8x64xf32>
    %c6_71 = arith.constant 6 : index
    %c0_72 = arith.constant 0 : index
    %c0_73 = arith.constant 0 : index
    %63 = vector.load %arg5[%c6_71, %c0_72, %c0_73] : memref<9x16x8xf32, #tpu.memory_space<vmem>>, vector<1x16x8xf32>
    %64 = vector.shape_cast %63 : vector<1x16x8xf32> to vector<16x8xf32>
    %cst_74 = arith.constant dense<0.000000e+00> : vector<16x64xf32>
    %65 = tpu.matmul %64, %62, %cst_74 {dimension_numbers = #tpu.dot_dimension_numbers<[1], [0], [0], [1], [0, 0, 1, 1], [], []>} : vector<16x8xf32>, vector<8x64xf32>, vector<16x64xf32> -> vector<16x64xf32>
    %66 = arith.addf %59, %65 : vector<16x64xf32>
    %c7 = arith.constant 7 : index
    %c0_75 = arith.constant 0 : index
    %c0_76 = arith.constant 0 : index
    %67 = vector.load %arg2[%c7, %c0_75, %c0_76] : memref<9x256x64xf32, #tpu.memory_space<vmem>>, vector<1x256x64xf32>
    %68 = vector.shape_cast %67 : vector<1x256x64xf32> to vector<256x64xf32>
    %cst_77 = arith.constant dense<0.000000e+00> : vector<8x64xf32>
    %69 = tpu.matmul %1, %68, %cst_77 {dimension_numbers = #tpu.dot_dimension_numbers<[1], [0], [0], [1], [0, 0, 1, 1], [], []>} : vector<8x256xf32>, vector<256x64xf32>, vector<8x64xf32> -> vector<8x64xf32>
    %c7_78 = arith.constant 7 : index
    %c0_79 = arith.constant 0 : index
    %c0_80 = arith.constant 0 : index
    %70 = vector.load %arg5[%c7_78, %c0_79, %c0_80] : memref<9x16x8xf32, #tpu.memory_space<vmem>>, vector<1x16x8xf32>
    %71 = vector.shape_cast %70 : vector<1x16x8xf32> to vector<16x8xf32>
    %cst_81 = arith.constant dense<0.000000e+00> : vector<16x64xf32>
    %72 = tpu.matmul %71, %69, %cst_81 {dimension_numbers = #tpu.dot_dimension_numbers<[1], [0], [0], [1], [0, 0, 1, 1], [], []>} : vector<16x8xf32>, vector<8x64xf32>, vector<16x64xf32> -> vector<16x64xf32>
    %73 = arith.addf %66, %72 : vector<16x64xf32>
    %c8 = arith.constant 8 : index
    %c0_82 = arith.constant 0 : index
    %c0_83 = arith.constant 0 : index
    %74 = vector.load %arg2[%c8, %c0_82, %c0_83] : memref<9x256x64xf32, #tpu.memory_space<vmem>>, vector<1x256x64xf32>
    %75 = vector.shape_cast %74 : vector<1x256x64xf32> to vector<256x64xf32>
    %cst_84 = arith.constant dense<0.000000e+00> : vector<8x64xf32>
    %76 = tpu.matmul %1, %75, %cst_84 {dimension_numbers = #tpu.dot_dimension_numbers<[1], [0], [0], [1], [0, 0, 1, 1], [], []>} : vector<8x256xf32>, vector<256x64xf32>, vector<8x64xf32> -> vector<8x64xf32>
    %c8_85 = arith.constant 8 : index
    %c0_86 = arith.constant 0 : index
    %c0_87 = arith.constant 0 : index
    %77 = vector.load %arg5[%c8_85, %c0_86, %c0_87] : memref<9x16x8xf32, #tpu.memory_space<vmem>>, vector<1x16x8xf32>
    %78 = vector.shape_cast %77 : vector<1x16x8xf32> to vector<16x8xf32>
    %cst_88 = arith.constant dense<0.000000e+00> : vector<16x64xf32>
    %79 = tpu.matmul %78, %76, %cst_88 {dimension_numbers = #tpu.dot_dimension_numbers<[1], [0], [0], [1], [0, 0, 1, 1], [], []>} : vector<16x8xf32>, vector<8x64xf32>, vector<16x64xf32> -> vector<16x64xf32>
    %80 = arith.addf %73, %79 : vector<16x64xf32>
    %81 = vector.broadcast %4 : vector<16x1xf32> to vector<16x64xf32>
    %82 = arith.addf %80, %81 : vector<16x64xf32>
    %cst_89 = arith.constant dense<0.000000e+00> : vector<16x64xf32>
    %83 = tpu.matmul %2, %82, %cst_89 {dimension_numbers = #tpu.dot_dimension_numbers<[1], [0], [0], [1], [0, 0, 1, 1], [], []>} : vector<16x16xf32>, vector<16x64xf32>, vector<16x64xf32> -> vector<16x64xf32>
    %cst_90 = arith.constant dense<0.000000e+00> : vector<16xf32>
    %84 = vector.multi_reduction <add>, %83, %cst_90 [1] : vector<16x64xf32> to vector<16xf32>
    %85 = vector.shape_cast %84 : vector<16xf32> to vector<16x1xf32>
    %cst_91 = arith.constant 7.812500e-03 : f32
    %86 = vector.broadcast %cst_91 : f32 to vector<16x1xf32>
    %87 = arith.mulf %85, %86 : vector<16x1xf32>
    %88 = vector.broadcast %87 : vector<16x1xf32> to vector<16x64xf32>
    %89 = arith.subf %82, %88 : vector<16x64xf32>
    %90 = arith.mulf %89, %89 : vector<16x64xf32>
    %cst_92 = arith.constant dense<0.000000e+00> : vector<16x64xf32>
    %91 = tpu.matmul %2, %90, %cst_92 {dimension_numbers = #tpu.dot_dimension_numbers<[1], [0], [0], [1], [0, 0, 1, 1], [], []>} : vector<16x16xf32>, vector<16x64xf32>, vector<16x64xf32> -> vector<16x64xf32>
    %cst_93 = arith.constant dense<0.000000e+00> : vector<16xf32>
    %92 = vector.multi_reduction <add>, %91, %cst_93 [1] : vector<16x64xf32> to vector<16xf32>
    %93 = vector.shape_cast %92 : vector<16xf32> to vector<16x1xf32>
    %cst_94 = arith.constant 7.812500e-03 : f32
    %94 = vector.broadcast %cst_94 : f32 to vector<16x1xf32>
    %95 = arith.mulf %93, %94 : vector<16x1xf32>
    %cst_95 = arith.constant 9.99999997E-7 : f32
    %96 = vector.broadcast %cst_95 : f32 to vector<16x1xf32>
    %97 = arith.addf %95, %96 : vector<16x1xf32>
    %98 = math.rsqrt %97 : vector<16x1xf32>
    %99 = vector.broadcast %98 : vector<16x1xf32> to vector<16x64xf32>
    %100 = arith.mulf %89, %99 : vector<16x64xf32>
    %101 = vector.broadcast %6 : vector<16x1xf32> to vector<16x64xf32>
    %102 = arith.mulf %100, %101 : vector<16x64xf32>
    %103 = vector.broadcast %8 : vector<16x1xf32> to vector<16x64xf32>
    %104 = arith.addf %102, %103 : vector<16x64xf32>
    %105 = arith.negf %104 : vector<16x64xf32>
    %106 = math.exp %105 : vector<16x64xf32>
    %cst_96 = arith.constant 1.000000e+00 : f32
    %107 = vector.broadcast %cst_96 : f32 to vector<16x64xf32>
    %108 = arith.addf %107, %106 : vector<16x64xf32>
    %109 = arith.divf %107, %108 : vector<16x64xf32>
    %110 = arith.mulf %104, %109 : vector<16x64xf32>
    %cst_97 = arith.constant 0.000000e+00 : f32
    %111 = vector.broadcast %cst_97 : f32 to vector<16x64xf32>
    %c0_98 = arith.constant 0 : index
    %c0_99 = arith.constant 0 : index
    %c0_100 = arith.constant 0 : index
    %112 = vector.load %arg3[%c0_98, %c0_99, %c0_100] : memref<9x64x64xf32, #tpu.memory_space<vmem>>, vector<1x64x64xf32>
    %113 = vector.shape_cast %112 : vector<1x64x64xf32> to vector<64x64xf32>
    %cst_101 = arith.constant dense<0.000000e+00> : vector<16x64xf32>
    %114 = tpu.matmul %110, %113, %cst_101 {dimension_numbers = #tpu.dot_dimension_numbers<[1], [0], [0], [1], [0, 0, 1, 1], [], []>} : vector<16x64xf32>, vector<64x64xf32>, vector<16x64xf32> -> vector<16x64xf32>
    %c0_102 = arith.constant 0 : index
    %c0_103 = arith.constant 0 : index
    %c0_104 = arith.constant 0 : index
    %115 = vector.load %arg6[%c0_102, %c0_103, %c0_104] : memref<9x16x16xf32, #tpu.memory_space<vmem>>, vector<1x16x16xf32>
    %116 = vector.shape_cast %115 : vector<1x16x16xf32> to vector<16x16xf32>
    %cst_105 = arith.constant dense<0.000000e+00> : vector<16x64xf32>
    %117 = tpu.matmul %116, %114, %cst_105 {dimension_numbers = #tpu.dot_dimension_numbers<[1], [0], [0], [1], [0, 0, 1, 1], [], []>} : vector<16x16xf32>, vector<16x64xf32>, vector<16x64xf32> -> vector<16x64xf32>
    %118 = arith.addf %111, %117 : vector<16x64xf32>
    %c1_106 = arith.constant 1 : index
    %c0_107 = arith.constant 0 : index
    %c0_108 = arith.constant 0 : index
    %119 = vector.load %arg3[%c1_106, %c0_107, %c0_108] : memref<9x64x64xf32, #tpu.memory_space<vmem>>, vector<1x64x64xf32>
    %120 = vector.shape_cast %119 : vector<1x64x64xf32> to vector<64x64xf32>
    %cst_109 = arith.constant dense<0.000000e+00> : vector<16x64xf32>
    %121 = tpu.matmul %110, %120, %cst_109 {dimension_numbers = #tpu.dot_dimension_numbers<[1], [0], [0], [1], [0, 0, 1, 1], [], []>} : vector<16x64xf32>, vector<64x64xf32>, vector<16x64xf32> -> vector<16x64xf32>
    %c1_110 = arith.constant 1 : index
    %c0_111 = arith.constant 0 : index
    %c0_112 = arith.constant 0 : index
    %122 = vector.load %arg6[%c1_110, %c0_111, %c0_112] : memref<9x16x16xf32, #tpu.memory_space<vmem>>, vector<1x16x16xf32>
    %123 = vector.shape_cast %122 : vector<1x16x16xf32> to vector<16x16xf32>
    %cst_113 = arith.constant dense<0.000000e+00> : vector<16x64xf32>
    %124 = tpu.matmul %123, %121, %cst_113 {dimension_numbers = #tpu.dot_dimension_numbers<[1], [0], [0], [1], [0, 0, 1, 1], [], []>} : vector<16x16xf32>, vector<16x64xf32>, vector<16x64xf32> -> vector<16x64xf32>
    %125 = arith.addf %118, %124 : vector<16x64xf32>
    %c2_114 = arith.constant 2 : index
    %c0_115 = arith.constant 0 : index
    %c0_116 = arith.constant 0 : index
    %126 = vector.load %arg3[%c2_114, %c0_115, %c0_116] : memref<9x64x64xf32, #tpu.memory_space<vmem>>, vector<1x64x64xf32>
    %127 = vector.shape_cast %126 : vector<1x64x64xf32> to vector<64x64xf32>
    %cst_117 = arith.constant dense<0.000000e+00> : vector<16x64xf32>
    %128 = tpu.matmul %110, %127, %cst_117 {dimension_numbers = #tpu.dot_dimension_numbers<[1], [0], [0], [1], [0, 0, 1, 1], [], []>} : vector<16x64xf32>, vector<64x64xf32>, vector<16x64xf32> -> vector<16x64xf32>
    %c2_118 = arith.constant 2 : index
    %c0_119 = arith.constant 0 : index
    %c0_120 = arith.constant 0 : index
    %129 = vector.load %arg6[%c2_118, %c0_119, %c0_120] : memref<9x16x16xf32, #tpu.memory_space<vmem>>, vector<1x16x16xf32>
    %130 = vector.shape_cast %129 : vector<1x16x16xf32> to vector<16x16xf32>
    %cst_121 = arith.constant dense<0.000000e+00> : vector<16x64xf32>
    %131 = tpu.matmul %130, %128, %cst_121 {dimension_numbers = #tpu.dot_dimension_numbers<[1], [0], [0], [1], [0, 0, 1, 1], [], []>} : vector<16x16xf32>, vector<16x64xf32>, vector<16x64xf32> -> vector<16x64xf32>
    %132 = arith.addf %125, %131 : vector<16x64xf32>
    %c3_122 = arith.constant 3 : index
    %c0_123 = arith.constant 0 : index
    %c0_124 = arith.constant 0 : index
    %133 = vector.load %arg3[%c3_122, %c0_123, %c0_124] : memref<9x64x64xf32, #tpu.memory_space<vmem>>, vector<1x64x64xf32>
    %134 = vector.shape_cast %133 : vector<1x64x64xf32> to vector<64x64xf32>
    %cst_125 = arith.constant dense<0.000000e+00> : vector<16x64xf32>
    %135 = tpu.matmul %110, %134, %cst_125 {dimension_numbers = #tpu.dot_dimension_numbers<[1], [0], [0], [1], [0, 0, 1, 1], [], []>} : vector<16x64xf32>, vector<64x64xf32>, vector<16x64xf32> -> vector<16x64xf32>
    %c3_126 = arith.constant 3 : index
    %c0_127 = arith.constant 0 : index
    %c0_128 = arith.constant 0 : index
    %136 = vector.load %arg6[%c3_126, %c0_127, %c0_128] : memref<9x16x16xf32, #tpu.memory_space<vmem>>, vector<1x16x16xf32>
    %137 = vector.shape_cast %136 : vector<1x16x16xf32> to vector<16x16xf32>
    %cst_129 = arith.constant dense<0.000000e+00> : vector<16x64xf32>
    %138 = tpu.matmul %137, %135, %cst_129 {dimension_numbers = #tpu.dot_dimension_numbers<[1], [0], [0], [1], [0, 0, 1, 1], [], []>} : vector<16x16xf32>, vector<16x64xf32>, vector<16x64xf32> -> vector<16x64xf32>
    %139 = arith.addf %132, %138 : vector<16x64xf32>
    %c4_130 = arith.constant 4 : index
    %c0_131 = arith.constant 0 : index
    %c0_132 = arith.constant 0 : index
    %140 = vector.load %arg3[%c4_130, %c0_131, %c0_132] : memref<9x64x64xf32, #tpu.memory_space<vmem>>, vector<1x64x64xf32>
    %141 = vector.shape_cast %140 : vector<1x64x64xf32> to vector<64x64xf32>
    %cst_133 = arith.constant dense<0.000000e+00> : vector<16x64xf32>
    %142 = tpu.matmul %110, %141, %cst_133 {dimension_numbers = #tpu.dot_dimension_numbers<[1], [0], [0], [1], [0, 0, 1, 1], [], []>} : vector<16x64xf32>, vector<64x64xf32>, vector<16x64xf32> -> vector<16x64xf32>
    %c4_134 = arith.constant 4 : index
    %c0_135 = arith.constant 0 : index
    %c0_136 = arith.constant 0 : index
    %143 = vector.load %arg6[%c4_134, %c0_135, %c0_136] : memref<9x16x16xf32, #tpu.memory_space<vmem>>, vector<1x16x16xf32>
    %144 = vector.shape_cast %143 : vector<1x16x16xf32> to vector<16x16xf32>
    %cst_137 = arith.constant dense<0.000000e+00> : vector<16x64xf32>
    %145 = tpu.matmul %144, %142, %cst_137 {dimension_numbers = #tpu.dot_dimension_numbers<[1], [0], [0], [1], [0, 0, 1, 1], [], []>} : vector<16x16xf32>, vector<16x64xf32>, vector<16x64xf32> -> vector<16x64xf32>
    %146 = arith.addf %139, %145 : vector<16x64xf32>
    %c5_138 = arith.constant 5 : index
    %c0_139 = arith.constant 0 : index
    %c0_140 = arith.constant 0 : index
    %147 = vector.load %arg3[%c5_138, %c0_139, %c0_140] : memref<9x64x64xf32, #tpu.memory_space<vmem>>, vector<1x64x64xf32>
    %148 = vector.shape_cast %147 : vector<1x64x64xf32> to vector<64x64xf32>
    %cst_141 = arith.constant dense<0.000000e+00> : vector<16x64xf32>
    %149 = tpu.matmul %110, %148, %cst_141 {dimension_numbers = #tpu.dot_dimension_numbers<[1], [0], [0], [1], [0, 0, 1, 1], [], []>} : vector<16x64xf32>, vector<64x64xf32>, vector<16x64xf32> -> vector<16x64xf32>
    %c5_142 = arith.constant 5 : index
    %c0_143 = arith.constant 0 : index
    %c0_144 = arith.constant 0 : index
    %150 = vector.load %arg6[%c5_142, %c0_143, %c0_144] : memref<9x16x16xf32, #tpu.memory_space<vmem>>, vector<1x16x16xf32>
    %151 = vector.shape_cast %150 : vector<1x16x16xf32> to vector<16x16xf32>
    %cst_145 = arith.constant dense<0.000000e+00> : vector<16x64xf32>
    %152 = tpu.matmul %151, %149, %cst_145 {dimension_numbers = #tpu.dot_dimension_numbers<[1], [0], [0], [1], [0, 0, 1, 1], [], []>} : vector<16x16xf32>, vector<16x64xf32>, vector<16x64xf32> -> vector<16x64xf32>
    %153 = arith.addf %146, %152 : vector<16x64xf32>
    %c6_146 = arith.constant 6 : index
    %c0_147 = arith.constant 0 : index
    %c0_148 = arith.constant 0 : index
    %154 = vector.load %arg3[%c6_146, %c0_147, %c0_148] : memref<9x64x64xf32, #tpu.memory_space<vmem>>, vector<1x64x64xf32>
    %155 = vector.shape_cast %154 : vector<1x64x64xf32> to vector<64x64xf32>
    %cst_149 = arith.constant dense<0.000000e+00> : vector<16x64xf32>
    %156 = tpu.matmul %110, %155, %cst_149 {dimension_numbers = #tpu.dot_dimension_numbers<[1], [0], [0], [1], [0, 0, 1, 1], [], []>} : vector<16x64xf32>, vector<64x64xf32>, vector<16x64xf32> -> vector<16x64xf32>
    %c6_150 = arith.constant 6 : index
    %c0_151 = arith.constant 0 : index
    %c0_152 = arith.constant 0 : index
    %157 = vector.load %arg6[%c6_150, %c0_151, %c0_152] : memref<9x16x16xf32, #tpu.memory_space<vmem>>, vector<1x16x16xf32>
    %158 = vector.shape_cast %157 : vector<1x16x16xf32> to vector<16x16xf32>
    %cst_153 = arith.constant dense<0.000000e+00> : vector<16x64xf32>
    %159 = tpu.matmul %158, %156, %cst_153 {dimension_numbers = #tpu.dot_dimension_numbers<[1], [0], [0], [1], [0, 0, 1, 1], [], []>} : vector<16x16xf32>, vector<16x64xf32>, vector<16x64xf32> -> vector<16x64xf32>
    %160 = arith.addf %153, %159 : vector<16x64xf32>
    %c7_154 = arith.constant 7 : index
    %c0_155 = arith.constant 0 : index
    %c0_156 = arith.constant 0 : index
    %161 = vector.load %arg3[%c7_154, %c0_155, %c0_156] : memref<9x64x64xf32, #tpu.memory_space<vmem>>, vector<1x64x64xf32>
    %162 = vector.shape_cast %161 : vector<1x64x64xf32> to vector<64x64xf32>
    %cst_157 = arith.constant dense<0.000000e+00> : vector<16x64xf32>
    %163 = tpu.matmul %110, %162, %cst_157 {dimension_numbers = #tpu.dot_dimension_numbers<[1], [0], [0], [1], [0, 0, 1, 1], [], []>} : vector<16x64xf32>, vector<64x64xf32>, vector<16x64xf32> -> vector<16x64xf32>
    %c7_158 = arith.constant 7 : index
    %c0_159 = arith.constant 0 : index
    %c0_160 = arith.constant 0 : index
    %164 = vector.load %arg6[%c7_158, %c0_159, %c0_160] : memref<9x16x16xf32, #tpu.memory_space<vmem>>, vector<1x16x16xf32>
    %165 = vector.shape_cast %164 : vector<1x16x16xf32> to vector<16x16xf32>
    %cst_161 = arith.constant dense<0.000000e+00> : vector<16x64xf32>
    %166 = tpu.matmul %165, %163, %cst_161 {dimension_numbers = #tpu.dot_dimension_numbers<[1], [0], [0], [1], [0, 0, 1, 1], [], []>} : vector<16x16xf32>, vector<16x64xf32>, vector<16x64xf32> -> vector<16x64xf32>
    %167 = arith.addf %160, %166 : vector<16x64xf32>
    %c8_162 = arith.constant 8 : index
    %c0_163 = arith.constant 0 : index
    %c0_164 = arith.constant 0 : index
    %168 = vector.load %arg3[%c8_162, %c0_163, %c0_164] : memref<9x64x64xf32, #tpu.memory_space<vmem>>, vector<1x64x64xf32>
    %169 = vector.shape_cast %168 : vector<1x64x64xf32> to vector<64x64xf32>
    %cst_165 = arith.constant dense<0.000000e+00> : vector<16x64xf32>
    %170 = tpu.matmul %110, %169, %cst_165 {dimension_numbers = #tpu.dot_dimension_numbers<[1], [0], [0], [1], [0, 0, 1, 1], [], []>} : vector<16x64xf32>, vector<64x64xf32>, vector<16x64xf32> -> vector<16x64xf32>
    %c8_166 = arith.constant 8 : index
    %c0_167 = arith.constant 0 : index
    %c0_168 = arith.constant 0 : index
    %171 = vector.load %arg6[%c8_166, %c0_167, %c0_168] : memref<9x16x16xf32, #tpu.memory_space<vmem>>, vector<1x16x16xf32>
    %172 = vector.shape_cast %171 : vector<1x16x16xf32> to vector<16x16xf32>
    %cst_169 = arith.constant dense<0.000000e+00> : vector<16x64xf32>
    %173 = tpu.matmul %172, %170, %cst_169 {dimension_numbers = #tpu.dot_dimension_numbers<[1], [0], [0], [1], [0, 0, 1, 1], [], []>} : vector<16x16xf32>, vector<16x64xf32>, vector<16x64xf32> -> vector<16x64xf32>
    %174 = arith.addf %167, %173 : vector<16x64xf32>
    %175 = vector.broadcast %10 : vector<16x1xf32> to vector<16x64xf32>
    %176 = arith.addf %174, %175 : vector<16x64xf32>
    %cst_170 = arith.constant dense<0.000000e+00> : vector<16x64xf32>
    %177 = tpu.matmul %2, %176, %cst_170 {dimension_numbers = #tpu.dot_dimension_numbers<[1], [0], [0], [1], [0, 0, 1, 1], [], []>} : vector<16x16xf32>, vector<16x64xf32>, vector<16x64xf32> -> vector<16x64xf32>
    %cst_171 = arith.constant dense<0.000000e+00> : vector<16xf32>
    %178 = vector.multi_reduction <add>, %177, %cst_171 [1] : vector<16x64xf32> to vector<16xf32>
    %179 = vector.shape_cast %178 : vector<16xf32> to vector<16x1xf32>
    %cst_172 = arith.constant 7.812500e-03 : f32
    %180 = vector.broadcast %cst_172 : f32 to vector<16x1xf32>
    %181 = arith.mulf %179, %180 : vector<16x1xf32>
    %182 = vector.broadcast %181 : vector<16x1xf32> to vector<16x64xf32>
    %183 = arith.subf %176, %182 : vector<16x64xf32>
    %184 = arith.mulf %183, %183 : vector<16x64xf32>
    %cst_173 = arith.constant dense<0.000000e+00> : vector<16x64xf32>
    %185 = tpu.matmul %2, %184, %cst_173 {dimension_numbers = #tpu.dot_dimension_numbers<[1], [0], [0], [1], [0, 0, 1, 1], [], []>} : vector<16x16xf32>, vector<16x64xf32>, vector<16x64xf32> -> vector<16x64xf32>
    %cst_174 = arith.constant dense<0.000000e+00> : vector<16xf32>
    %186 = vector.multi_reduction <add>, %185, %cst_174 [1] : vector<16x64xf32> to vector<16xf32>
    %187 = vector.shape_cast %186 : vector<16xf32> to vector<16x1xf32>
    %cst_175 = arith.constant 7.812500e-03 : f32
    %188 = vector.broadcast %cst_175 : f32 to vector<16x1xf32>
    %189 = arith.mulf %187, %188 : vector<16x1xf32>
    %cst_176 = arith.constant 9.99999997E-7 : f32
    %190 = vector.broadcast %cst_176 : f32 to vector<16x1xf32>
    %191 = arith.addf %189, %190 : vector<16x1xf32>
    %192 = math.rsqrt %191 : vector<16x1xf32>
    %193 = vector.broadcast %192 : vector<16x1xf32> to vector<16x64xf32>
    %194 = arith.mulf %183, %193 : vector<16x64xf32>
    %195 = vector.broadcast %12 : vector<16x1xf32> to vector<16x64xf32>
    %196 = arith.mulf %194, %195 : vector<16x64xf32>
    %197 = vector.broadcast %14 : vector<16x1xf32> to vector<16x64xf32>
    %198 = arith.addf %196, %197 : vector<16x64xf32>
    %199 = arith.negf %198 : vector<16x64xf32>
    %200 = math.exp %199 : vector<16x64xf32>
    %cst_177 = arith.constant 1.000000e+00 : f32
    %201 = vector.broadcast %cst_177 : f32 to vector<16x64xf32>
    %202 = arith.addf %201, %200 : vector<16x64xf32>
    %203 = arith.divf %201, %202 : vector<16x64xf32>
    %204 = arith.mulf %198, %203 : vector<16x64xf32>
    %cst_178 = arith.constant 0.000000e+00 : f32
    %205 = vector.broadcast %cst_178 : f32 to vector<16x64xf32>
    %c0_179 = arith.constant 0 : index
    %c0_180 = arith.constant 0 : index
    %c0_181 = arith.constant 0 : index
    %206 = vector.load %arg3[%c0_179, %c0_180, %c0_181] : memref<9x64x64xf32, #tpu.memory_space<vmem>>, vector<1x64x64xf32>
    %207 = vector.shape_cast %206 : vector<1x64x64xf32> to vector<64x64xf32>
    %cst_182 = arith.constant dense<0.000000e+00> : vector<16x64xf32>
    %208 = tpu.matmul %204, %207, %cst_182 {dimension_numbers = #tpu.dot_dimension_numbers<[1], [0], [0], [1], [0, 0, 1, 1], [], []>} : vector<16x64xf32>, vector<64x64xf32>, vector<16x64xf32> -> vector<16x64xf32>
    %c0_183 = arith.constant 0 : index
    %c0_184 = arith.constant 0 : index
    %c0_185 = arith.constant 0 : index
    %209 = vector.load %arg7[%c0_183, %c0_184, %c0_185] : memref<9x16x16xf32, #tpu.memory_space<vmem>>, vector<1x16x16xf32>
    %210 = vector.shape_cast %209 : vector<1x16x16xf32> to vector<16x16xf32>
    %cst_186 = arith.constant dense<0.000000e+00> : vector<16x64xf32>
    %211 = tpu.matmul %210, %208, %cst_186 {dimension_numbers = #tpu.dot_dimension_numbers<[1], [0], [0], [1], [0, 0, 1, 1], [], []>} : vector<16x16xf32>, vector<16x64xf32>, vector<16x64xf32> -> vector<16x64xf32>
    %212 = arith.addf %205, %211 : vector<16x64xf32>
    %c1_187 = arith.constant 1 : index
    %c0_188 = arith.constant 0 : index
    %c0_189 = arith.constant 0 : index
    %213 = vector.load %arg3[%c1_187, %c0_188, %c0_189] : memref<9x64x64xf32, #tpu.memory_space<vmem>>, vector<1x64x64xf32>
    %214 = vector.shape_cast %213 : vector<1x64x64xf32> to vector<64x64xf32>
    %cst_190 = arith.constant dense<0.000000e+00> : vector<16x64xf32>
    %215 = tpu.matmul %204, %214, %cst_190 {dimension_numbers = #tpu.dot_dimension_numbers<[1], [0], [0], [1], [0, 0, 1, 1], [], []>} : vector<16x64xf32>, vector<64x64xf32>, vector<16x64xf32> -> vector<16x64xf32>
    %c1_191 = arith.constant 1 : index
    %c0_192 = arith.constant 0 : index
    %c0_193 = arith.constant 0 : index
    %216 = vector.load %arg7[%c1_191, %c0_192, %c0_193] : memref<9x16x16xf32, #tpu.memory_space<vmem>>, vector<1x16x16xf32>
    %217 = vector.shape_cast %216 : vector<1x16x16xf32> to vector<16x16xf32>
    %cst_194 = arith.constant dense<0.000000e+00> : vector<16x64xf32>
    %218 = tpu.matmul %217, %215, %cst_194 {dimension_numbers = #tpu.dot_dimension_numbers<[1], [0], [0], [1], [0, 0, 1, 1], [], []>} : vector<16x16xf32>, vector<16x64xf32>, vector<16x64xf32> -> vector<16x64xf32>
    %219 = arith.addf %212, %218 : vector<16x64xf32>
    %c2_195 = arith.constant 2 : index
    %c0_196 = arith.constant 0 : index
    %c0_197 = arith.constant 0 : index
    %220 = vector.load %arg3[%c2_195, %c0_196, %c0_197] : memref<9x64x64xf32, #tpu.memory_space<vmem>>, vector<1x64x64xf32>
    %221 = vector.shape_cast %220 : vector<1x64x64xf32> to vector<64x64xf32>
    %cst_198 = arith.constant dense<0.000000e+00> : vector<16x64xf32>
    %222 = tpu.matmul %204, %221, %cst_198 {dimension_numbers = #tpu.dot_dimension_numbers<[1], [0], [0], [1], [0, 0, 1, 1], [], []>} : vector<16x64xf32>, vector<64x64xf32>, vector<16x64xf32> -> vector<16x64xf32>
    %c2_199 = arith.constant 2 : index
    %c0_200 = arith.constant 0 : index
    %c0_201 = arith.constant 0 : index
    %223 = vector.load %arg7[%c2_199, %c0_200, %c0_201] : memref<9x16x16xf32, #tpu.memory_space<vmem>>, vector<1x16x16xf32>
    %224 = vector.shape_cast %223 : vector<1x16x16xf32> to vector<16x16xf32>
    %cst_202 = arith.constant dense<0.000000e+00> : vector<16x64xf32>
    %225 = tpu.matmul %224, %222, %cst_202 {dimension_numbers = #tpu.dot_dimension_numbers<[1], [0], [0], [1], [0, 0, 1, 1], [], []>} : vector<16x16xf32>, vector<16x64xf32>, vector<16x64xf32> -> vector<16x64xf32>
    %226 = arith.addf %219, %225 : vector<16x64xf32>
    %c3_203 = arith.constant 3 : index
    %c0_204 = arith.constant 0 : index
    %c0_205 = arith.constant 0 : index
    %227 = vector.load %arg3[%c3_203, %c0_204, %c0_205] : memref<9x64x64xf32, #tpu.memory_space<vmem>>, vector<1x64x64xf32>
    %228 = vector.shape_cast %227 : vector<1x64x64xf32> to vector<64x64xf32>
    %cst_206 = arith.constant dense<0.000000e+00> : vector<16x64xf32>
    %229 = tpu.matmul %204, %228, %cst_206 {dimension_numbers = #tpu.dot_dimension_numbers<[1], [0], [0], [1], [0, 0, 1, 1], [], []>} : vector<16x64xf32>, vector<64x64xf32>, vector<16x64xf32> -> vector<16x64xf32>
    %c3_207 = arith.constant 3 : index
    %c0_208 = arith.constant 0 : index
    %c0_209 = arith.constant 0 : index
    %230 = vector.load %arg7[%c3_207, %c0_208, %c0_209] : memref<9x16x16xf32, #tpu.memory_space<vmem>>, vector<1x16x16xf32>
    %231 = vector.shape_cast %230 : vector<1x16x16xf32> to vector<16x16xf32>
    %cst_210 = arith.constant dense<0.000000e+00> : vector<16x64xf32>
    %232 = tpu.matmul %231, %229, %cst_210 {dimension_numbers = #tpu.dot_dimension_numbers<[1], [0], [0], [1], [0, 0, 1, 1], [], []>} : vector<16x16xf32>, vector<16x64xf32>, vector<16x64xf32> -> vector<16x64xf32>
    %233 = arith.addf %226, %232 : vector<16x64xf32>
    %c4_211 = arith.constant 4 : index
    %c0_212 = arith.constant 0 : index
    %c0_213 = arith.constant 0 : index
    %234 = vector.load %arg3[%c4_211, %c0_212, %c0_213] : memref<9x64x64xf32, #tpu.memory_space<vmem>>, vector<1x64x64xf32>
    %235 = vector.shape_cast %234 : vector<1x64x64xf32> to vector<64x64xf32>
    %cst_214 = arith.constant dense<0.000000e+00> : vector<16x64xf32>
    %236 = tpu.matmul %204, %235, %cst_214 {dimension_numbers = #tpu.dot_dimension_numbers<[1], [0], [0], [1], [0, 0, 1, 1], [], []>} : vector<16x64xf32>, vector<64x64xf32>, vector<16x64xf32> -> vector<16x64xf32>
    %c4_215 = arith.constant 4 : index
    %c0_216 = arith.constant 0 : index
    %c0_217 = arith.constant 0 : index
    %237 = vector.load %arg7[%c4_215, %c0_216, %c0_217] : memref<9x16x16xf32, #tpu.memory_space<vmem>>, vector<1x16x16xf32>
    %238 = vector.shape_cast %237 : vector<1x16x16xf32> to vector<16x16xf32>
    %cst_218 = arith.constant dense<0.000000e+00> : vector<16x64xf32>
    %239 = tpu.matmul %238, %236, %cst_218 {dimension_numbers = #tpu.dot_dimension_numbers<[1], [0], [0], [1], [0, 0, 1, 1], [], []>} : vector<16x16xf32>, vector<16x64xf32>, vector<16x64xf32> -> vector<16x64xf32>
    %240 = arith.addf %233, %239 : vector<16x64xf32>
    %c5_219 = arith.constant 5 : index
    %c0_220 = arith.constant 0 : index
    %c0_221 = arith.constant 0 : index
    %241 = vector.load %arg3[%c5_219, %c0_220, %c0_221] : memref<9x64x64xf32, #tpu.memory_space<vmem>>, vector<1x64x64xf32>
    %242 = vector.shape_cast %241 : vector<1x64x64xf32> to vector<64x64xf32>
    %cst_222 = arith.constant dense<0.000000e+00> : vector<16x64xf32>
    %243 = tpu.matmul %204, %242, %cst_222 {dimension_numbers = #tpu.dot_dimension_numbers<[1], [0], [0], [1], [0, 0, 1, 1], [], []>} : vector<16x64xf32>, vector<64x64xf32>, vector<16x64xf32> -> vector<16x64xf32>
    %c5_223 = arith.constant 5 : index
    %c0_224 = arith.constant 0 : index
    %c0_225 = arith.constant 0 : index
    %244 = vector.load %arg7[%c5_223, %c0_224, %c0_225] : memref<9x16x16xf32, #tpu.memory_space<vmem>>, vector<1x16x16xf32>
    %245 = vector.shape_cast %244 : vector<1x16x16xf32> to vector<16x16xf32>
    %cst_226 = arith.constant dense<0.000000e+00> : vector<16x64xf32>
    %246 = tpu.matmul %245, %243, %cst_226 {dimension_numbers = #tpu.dot_dimension_numbers<[1], [0], [0], [1], [0, 0, 1, 1], [], []>} : vector<16x16xf32>, vector<16x64xf32>, vector<16x64xf32> -> vector<16x64xf32>
    %247 = arith.addf %240, %246 : vector<16x64xf32>
    %c6_227 = arith.constant 6 : index
    %c0_228 = arith.constant 0 : index
    %c0_229 = arith.constant 0 : index
    %248 = vector.load %arg3[%c6_227, %c0_228, %c0_229] : memref<9x64x64xf32, #tpu.memory_space<vmem>>, vector<1x64x64xf32>
    %249 = vector.shape_cast %248 : vector<1x64x64xf32> to vector<64x64xf32>
    %cst_230 = arith.constant dense<0.000000e+00> : vector<16x64xf32>
    %250 = tpu.matmul %204, %249, %cst_230 {dimension_numbers = #tpu.dot_dimension_numbers<[1], [0], [0], [1], [0, 0, 1, 1], [], []>} : vector<16x64xf32>, vector<64x64xf32>, vector<16x64xf32> -> vector<16x64xf32>
    %c6_231 = arith.constant 6 : index
    %c0_232 = arith.constant 0 : index
    %c0_233 = arith.constant 0 : index
    %251 = vector.load %arg7[%c6_231, %c0_232, %c0_233] : memref<9x16x16xf32, #tpu.memory_space<vmem>>, vector<1x16x16xf32>
    %252 = vector.shape_cast %251 : vector<1x16x16xf32> to vector<16x16xf32>
    %cst_234 = arith.constant dense<0.000000e+00> : vector<16x64xf32>
    %253 = tpu.matmul %252, %250, %cst_234 {dimension_numbers = #tpu.dot_dimension_numbers<[1], [0], [0], [1], [0, 0, 1, 1], [], []>} : vector<16x16xf32>, vector<16x64xf32>, vector<16x64xf32> -> vector<16x64xf32>
    %254 = arith.addf %247, %253 : vector<16x64xf32>
    %c7_235 = arith.constant 7 : index
    %c0_236 = arith.constant 0 : index
    %c0_237 = arith.constant 0 : index
    %255 = vector.load %arg3[%c7_235, %c0_236, %c0_237] : memref<9x64x64xf32, #tpu.memory_space<vmem>>, vector<1x64x64xf32>
    %256 = vector.shape_cast %255 : vector<1x64x64xf32> to vector<64x64xf32>
    %cst_238 = arith.constant dense<0.000000e+00> : vector<16x64xf32>
    %257 = tpu.matmul %204, %256, %cst_238 {dimension_numbers = #tpu.dot_dimension_numbers<[1], [0], [0], [1], [0, 0, 1, 1], [], []>} : vector<16x64xf32>, vector<64x64xf32>, vector<16x64xf32> -> vector<16x64xf32>
    %c7_239 = arith.constant 7 : index
    %c0_240 = arith.constant 0 : index
    %c0_241 = arith.constant 0 : index
    %258 = vector.load %arg7[%c7_239, %c0_240, %c0_241] : memref<9x16x16xf32, #tpu.memory_space<vmem>>, vector<1x16x16xf32>
    %259 = vector.shape_cast %258 : vector<1x16x16xf32> to vector<16x16xf32>
    %cst_242 = arith.constant dense<0.000000e+00> : vector<16x64xf32>
    %260 = tpu.matmul %259, %257, %cst_242 {dimension_numbers = #tpu.dot_dimension_numbers<[1], [0], [0], [1], [0, 0, 1, 1], [], []>} : vector<16x16xf32>, vector<16x64xf32>, vector<16x64xf32> -> vector<16x64xf32>
    %261 = arith.addf %254, %260 : vector<16x64xf32>
    %c8_243 = arith.constant 8 : index
    %c0_244 = arith.constant 0 : index
    %c0_245 = arith.constant 0 : index
    %262 = vector.load %arg3[%c8_243, %c0_244, %c0_245] : memref<9x64x64xf32, #tpu.memory_space<vmem>>, vector<1x64x64xf32>
    %263 = vector.shape_cast %262 : vector<1x64x64xf32> to vector<64x64xf32>
    %cst_246 = arith.constant dense<0.000000e+00> : vector<16x64xf32>
    %264 = tpu.matmul %204, %263, %cst_246 {dimension_numbers = #tpu.dot_dimension_numbers<[1], [0], [0], [1], [0, 0, 1, 1], [], []>} : vector<16x64xf32>, vector<64x64xf32>, vector<16x64xf32> -> vector<16x64xf32>
    %c8_247 = arith.constant 8 : index
    %c0_248 = arith.constant 0 : index
    %c0_249 = arith.constant 0 : index
    %265 = vector.load %arg7[%c8_247, %c0_248, %c0_249] : memref<9x16x16xf32, #tpu.memory_space<vmem>>, vector<1x16x16xf32>
    %266 = vector.shape_cast %265 : vector<1x16x16xf32> to vector<16x16xf32>
    %cst_250 = arith.constant dense<0.000000e+00> : vector<16x64xf32>
    %267 = tpu.matmul %266, %264, %cst_250 {dimension_numbers = #tpu.dot_dimension_numbers<[1], [0], [0], [1], [0, 0, 1, 1], [], []>} : vector<16x16xf32>, vector<16x64xf32>, vector<16x64xf32> -> vector<16x64xf32>
    %268 = arith.addf %261, %267 : vector<16x64xf32>
    %269 = vector.broadcast %16 : vector<16x1xf32> to vector<16x64xf32>
    %270 = arith.addf %268, %269 : vector<16x64xf32>
    %271 = arith.addf %82, %270 : vector<16x64xf32>
    %cst_251 = arith.constant 1.000000e+00 : f32
    %272 = vector.broadcast %cst_251 : f32 to vector<16x64xf32>
    %273 = arith.mulf %271, %272 : vector<16x64xf32>
    %c0_252 = arith.constant 0 : index
    %c0_253 = arith.constant 0 : index
    %c0_254 = arith.constant 0 : index
    %274 = vector.load %arg9[%c0_252, %c0_253, %c0_254] : memref<1x16x64xf32, #tpu.memory_space<vmem>>, vector<1x16x64xf32>
    %275 = vector.shape_cast %274 : vector<1x16x64xf32> to vector<16x64xf32>
    %276 = vector.shape_cast %273 : vector<16x64xf32> to vector<1x16x64xf32>
    tpu.vector_store %arg9[%c0_252, %c0_253, %c0_254], %276 {strides = array<i32>} : memref<1x16x64xf32, #tpu.memory_space<vmem>>, vector<1x16x64xf32>,
    return
  }
  func.func @transform_0(%arg0: i32) -> (i32, i32, i32) {
    %c0_i32 = arith.constant 0 : i32
    %c0_i32_0 = arith.constant 0 : i32
    %c0_i32_1 = arith.constant 0 : i32
    return %arg0, %c0_i32, %c0_i32_0 : i32, i32, i32
  }
  func.func @transform_1(%arg0: i32) -> (i32, i32, i32) {
    %c0_i32 = arith.constant 0 : i32
    %c0_i32_0 = arith.constant 0 : i32
    %c0_i32_1 = arith.constant 0 : i32
    %c0_i32_2 = arith.constant 0 : i32
    return %c0_i32, %c0_i32_0, %c0_i32_1 : i32, i32, i32
  }
  func.func @transform_2(%arg0: i32) -> (i32, i32, i32) {
    %c0_i32 = arith.constant 0 : i32
    %c0_i32_0 = arith.constant 0 : i32
    %c0_i32_1 = arith.constant 0 : i32
    %c0_i32_2 = arith.constant 0 : i32
    return %c0_i32, %c0_i32_0, %c0_i32_1 : i32, i32, i32
  }
  func.func @transform_3(%arg0: i32) -> (i32, i32) {
    %c0_i32 = arith.constant 0 : i32
    %c0_i32_0 = arith.constant 0 : i32
    %c0_i32_1 = arith.constant 0 : i32
    return %c0_i32, %c0_i32_0 : i32, i32
  }
  func.func @transform_4(%arg0: i32) -> (i32, i32, i32) {
    %c0_i32 = arith.constant 0 : i32
    %c0_i32_0 = arith.constant 0 : i32
    %c0_i32_1 = arith.constant 0 : i32
    %c0_i32_2 = arith.constant 0 : i32
    return %c0_i32, %c0_i32_0, %c0_i32_1 : i32, i32, i32
  }
  func.func @transform_5(%arg0: i32) -> (i32, i32, i32) {
    %c0_i32 = arith.constant 0 : i32
    %c0_i32_0 = arith.constant 0 : i32
    %c0_i32_1 = arith.constant 0 : i32
    %c0_i32_2 = arith.constant 0 : i32
    return %c0_i32, %c0_i32_0, %c0_i32_1 : i32, i32, i32
  }
  func.func @transform_6(%arg0: i32) -> (i32, i32, i32) {
    %c0_i32 = arith.constant 0 : i32
    %c0_i32_0 = arith.constant 0 : i32
    %c0_i32_1 = arith.constant 0 : i32
    %c0_i32_2 = arith.constant 0 : i32
    return %c0_i32, %c0_i32_0, %c0_i32_1 : i32, i32, i32
  }
  func.func @transform_7(%arg0: i32) -> (i32, i32, i32) {
    %c0_i32 = arith.constant 0 : i32
    %c0_i32_0 = arith.constant 0 : i32
    %c0_i32_1 = arith.constant 0 : i32
    %c0_i32_2 = arith.constant 0 : i32
    return %c0_i32, %c0_i32_0, %c0_i32_1 : i32, i32, i32
  }
  func.func @transform_8(%arg0: i32) -> (i32, i32, i32) {
    %c0_i32 = arith.constant 0 : i32
    %c0_i32_0 = arith.constant 0 : i32
    %c0_i32_1 = arith.constant 0 : i32
    return %arg0, %c0_i32, %c0_i32_0 : i32, i32, i32
  }
}

</mosaic_0001>

<bundles_post_ra>
// kernel: efficient_down_block.1
= control target key start
LH: loop header
LB: loop body
LE: loop exit
PB: predicated region body
PF: predicated region fallthrough
CT: control target
= control target key end

     0   :  { %13 = vsyncpa [#allocation3], 0  ;;  %s4130_s0 = inlined_call_operand.vmem [shape: f32[2,8,256], index: 0, kind: input, shape index: {}]   ;;  %s4131_s1 = inlined_call_operand.hbm [shape: f32[9,256,64], index: 1, kind: input, shape index: {}]   ;;  %s4132_s2 = inlined_call_operand.hbm [shape: f32[9,64,64], index: 2, kind: input, shape index: {}]   ;;  %s4133_s3 = inlined_call_operand.hbm [shape: f32[16,16], index: 3, kind: input, shape index: {}]   ;;  %s4134_s4 = inlined_call_operand.vmem [shape: f32[9,16,8], index: 4, kind: input, shape index: {}]   ;;  %s4135_s5 = inlined_call_operand.hbm [shape: f32[9,16,16], index: 5, kind: input, shape index: {}]   ;;  %s4136_s6 = inlined_call_operand.hbm [shape: f32[9,16,16], index: 6, kind: input, shape index: {}]   ;;  %s4137_s7 = inlined_call_operand.vmem [shape: f32[7,16,1], index: 7, kind: input, shape index: {}]   ;;  %s4138_s8 = inlined_call_operand.vmem [shape: f32[2,16,64], index: 8, kind: output, shape index: {}]  }
   0x1   :  { %14 = vsyncpa [#allocation5], 0 }
   0x2   :  { %15 = vsyncpa [#allocation8], 0  ;;  %s3409_s27 = smov 0  }
   0x3 LB: > { %s3415_s28 = sadd.s32 4294967295, %s3354_s27   ;;  %p2942_p0 = scmp.ge.s32.totalorder %s3354_s27, 1  ;;  %s3354_s27 = sphi %s3409_s27, %s21_s27  }
   0x4   : > { %p225_p1 = scmp.lt.s32.totalorder %s3354_s27, 3  ;;  %p3131_p2 = scmp.eq.s32.totalorder %s3415_s28, 0 }
   0x5   : > { %s250_s9 = sshll.u32 %s4132_s2, 4  ;;  %s281_s13 = sshll.u32 %s4135_s5, 4  ;;  %s251_s9 = int_to_ptr.hbm [resolvable:$true] %s250_s9  ;;  %s282_s13 = int_to_ptr.hbm [resolvable:$true] %s281_s13 }
   0x6   : > { %p3423_p3 = pnand %p2942_p0, %p225_p1  ;;  %s3356_s14 = smov [#allocation4]  }
   0x7   : > { %s252_s15 = sshll.u32 %s3356_s14, 4  ;;  %s3357_s17 = smov [#allocation7]   ;;  %s253_s15 = int_to_ptr.vmem [resolvable:$true] %s252_s15 }
   0x8   : > { %p3115_p4 = pneg %p3423_p3  ;;  %s283_s18 = sshll.u32 %s3357_s17, 4  ;;  %s284_s18 = int_to_ptr.vmem [resolvable:$true] %s283_s18 }
   0x9   : > { %s236_s21 = sshll.u32 %s4131_s1, 4  ;;  %s3358_s22 = smov 128   ;;  %s237_s21 = int_to_ptr.hbm [resolvable:$true] %s236_s21 }
   0xa   : > { %p3434_p5 = pnand %p3131_p2, %p3115_p4  ;;  %s3359_s23 = smov 8  }
   0xb   : > { %s3360_s24 = smov [#allocation2]   ;;  %s264_s30 = sshll.u32 %s4133_s3, 4  ;;  %s265_s30 = int_to_ptr.hbm [resolvable:$true] %s264_s30 }
   0xc   : > { %3121 = dma.hbm_to_vmem [thread:$0]  (!%p3434_p5), %s251_s9, 9216, %s253_s15, [#allocation5], %s3358_s22, %s3358_s22, %s3359_s23  }
   0xd   : > { %3127 = dma.hbm_to_vmem [thread:$0]  (!%p3434_p5), %s282_s13, 2304, %s284_s18, [#allocation8], %s3358_s22, %s3358_s22, %s3359_s23  }
   0xe   : > { %s238_s25 = sshll.u32 %s3360_s24, 4  ;;  %s295_s14 = sshll.u32 %s4136_s6, 4  ;;  %s239_s25 = int_to_ptr.vmem [resolvable:$true] %s238_s25  ;;  %s296_s14 = int_to_ptr.hbm [resolvable:$true] %s295_s14 }
   0xf   : > { %3118 = dma.hbm_to_vmem [thread:$0]  (!%p3434_p5), %s237_s21, 36864, %s239_s25, [#allocation3], %s3358_s22, %s3358_s22, %s3359_s23  }
  0x10   : > { %s3361_s17 = smov [#allocation6]   ;;  %s3362_s13 = smov [#allocation9]  }
  0x11   : > { %s266_s9 = sshll.u32 %s3361_s17, 4  ;;  %s297_s15 = sshll.u32 %s3362_s13, 4  ;;  %s267_s9 = int_to_ptr.vmem [resolvable:$true] %s266_s9  ;;  %s298_s15 = int_to_ptr.vmem [resolvable:$true] %s297_s15 }
  0x12   : > { %3124 = dma.hbm_to_vmem [thread:$0]  (!%p3434_p5), %s265_s30, 256, %s267_s9, [#allocation5], %s3358_s22, %s3358_s22, %s3359_s23  }
  0x13   : > { %3130 = dma.hbm_to_vmem [thread:$0]  (!%p3434_p5), %s296_s14, 2304, %s298_s15, [#allocation8], %s3358_s22, %s3358_s22, %s3359_s23  }
  0x14   : > { %324 = sbr.rel (%p3423_p3) target bundleno = 3302 (0xce6), region = 52 }
  0x19   : > { %3341 = dma.done.wait (%p3131_p2), [#allocation3], 36864  }
  0x1a   : > { %3343 = vsyncadd (%p3131_p2), [#allocation3], 4294930432 }
  0x1b   : > { %3345 = dma.done.wait (%p3131_p2), [#allocation5], 9472  }
  0x1c   : > { %3347 = vsyncadd (%p3131_p2), [#allocation5], 4294957824 }
  0x1d   : > { %3349 = dma.done.wait (%p3131_p2), [#allocation8], 4608  }
  0x1e   : > { %3351 = vsyncadd (%p3131_p2), [#allocation8], 4294962688  ;;  %v503_v0 = vld [vmem:[#allocation2 + $0x178] sm:$0xff]  ;;  %v502_v2 = vld [vmem:[#allocation2 + $0x170] sm:$0xff]  ;;  %p379_p6 = scmp.lt.s32.totalorder %s3415_s28, 1  ;;  %vm563_vm0 = vcmask 64512  }
  0x1f   : > { %v519_v1 = vld [vmem:[#allocation2 + $0x1f8] sm:$0xff]  ;;  %520 = vmatpush.msra.mxu2 %v503_v0  ;;  %v518_v3 = vld [vmem:[#allocation2 + $0x1f0] sm:$0xff]  ;;  %v501_v4 = vld [vmem:[#allocation2 + $0x168] sm:$0xff]  ;;  %vm1383_vm1 = vcmask 130048   ;;  %vm1413_vm2 = vcmask 523264  }
  0x20   : > { %540 = vmatpush.msra.mxu3 %v519_v1  ;;  %v517_v5 = vld [vmem:[#allocation2 + $0x1e8] sm:$0xff]  ;;  %v500_v6 = vld [vmem:[#allocation2 + $0x160] sm:$0xff]  ;;  %v499_v8 = vld [vmem:[#allocation2 + $0x158] sm:$0xff]  ;;  %s4211_s28 = smov (!%p379_p6, %s3415_s28), 1 }
  0x21   : > { %521 = vmatpush.msra.mxu2 %v502_v2  ;;  %v516_v7 = vld [vmem:[#allocation2 + $0x1e0] sm:$0xff]  ;;  %v515_v9 = vld [vmem:[#allocation2 + $0x1d8] sm:$0xff]  ;;  %v498_v10 = vld [vmem:[#allocation2 + $0x150] sm:$0xff]  ;;  %s3091_s10 = sshll.u32 %s4211_s28, 4 }
  0x22   : > { %541 = vmatpush.msra.mxu3 %v518_v3  ;;  %v514_v11 = vld [vmem:[#allocation2 + $0x1d0] sm:$0xff]  ;;  %v428_v12 = vld [vmem:[#allocation2 + $0x78] sm:$0xff]  ;;  %v497_v14 = vld [vmem:[#allocation2 + $0x148] sm:$0xff]  ;;  %s3483_s19 = scalar_lea.vmem %s4130_s0, %s3091_s10  ;;  %s388_s12 = scalar_lea.vmem %s4138_s8, %s3091_s10 }
  0x23   : > { %522 = vmatpush.msra.mxu2 %v501_v4  ;;  %v444_v13 = vld [vmem:[#allocation2 + $0xf8] sm:$0xff]  ;;  %v513_v15 = vld [vmem:[#allocation2 + $0x1c8] sm:$0xff]  ;;  %445 = vmatpush.msra.mxu0 %v428_v12  ;;  %v427_v16 = vld [vmem:[#allocation2 + $0x70] sm:$0xff] }
  0x24   : > { %542 = vmatpush.msra.mxu3 %v517_v5  ;;  %465 = vmatpush.msra.mxu1 %v444_v13  ;;  %v496_v17 = vld [vmem:[#allocation2 + $0x140] sm:$0xff]  ;;  %v443_v18 = vld [vmem:[#allocation2 + $0xf0] sm:$0xff]  ;;  %v426_v20 = vld [vmem:[#allocation2 + $0x68] sm:$0xff] }
  0x25   : > { %523 = vmatpush.msra.mxu2 %v500_v6  ;;  %v512_v19 = vld [vmem:[#allocation2 + $0x1c0] sm:$0xff]  ;;  %446 = vmatpush.msra.mxu0 %v427_v16  ;;  %v442_v21 = vld [vmem:[#allocation2 + $0xe8] sm:$0xff]  ;;  %v495_v24 = vld [vmem:[#allocation2 + $0x138] sm:$0xff] }
  0x26   : > { %543 = vmatpush.msra.mxu3 %v516_v7  ;;  %466 = vmatpush.msra.mxu1 %v443_v18  ;;  %v425_v22 = vld [vmem:[#allocation2 + $0x60] sm:$0xff]  ;;  %v511_v25 = vld [vmem:[#allocation2 + $0x1b8] sm:$0xff]  ;;  %v494_v28 = vld [vmem:[#allocation2 + $0x130] sm:$0xff] }
  0x27   : > { %524 = vmatpush.msra.mxu2 %v499_v8  ;;  %v441_v23 = vld [vmem:[#allocation2 + $0xe0] sm:$0xff]  ;;  %447 = vmatpush.msra.mxu0 %v426_v20  ;;  %v424_v26 = vld [vmem:[#allocation2 + $0x58] sm:$0xff]  ;;  %v510_v29 = vld [vmem:[#allocation2 + $0x1b0] sm:$0xff] }
  0x28   : > { %544 = vmatpush.msra.mxu3 %v515_v9  ;;  %467 = vmatpush.msra.mxu1 %v442_v21  ;;  %v440_v27 = vld [vmem:[#allocation2 + $0xd8] sm:$0xff]  ;;  %v423_v30 = vld [vmem:[#allocation2 + $0x50] sm:$0xff]  ;;  %v493_v32 = vld [vmem:[#allocation2 + $0x128] sm:$0xff] }
  0x29   : > { %525 = vmatpush.msra.mxu2 %v498_v10  ;;  %448 = vmatpush.msra.mxu0 %v425_v22  ;;  %v439_v31 = vld [vmem:[#allocation2 + $0xd0] sm:$0xff]  ;;  %v509_v33 = vld [vmem:[#allocation2 + $0x1a8] sm:$0xff]  ;;  %v492_v36 = vld [vmem:[#allocation2 + $0x120] sm:$0xff] }
  0x2a   : > { %545 = vmatpush.msra.mxu3 %v514_v11  ;;  %468 = vmatpush.msra.mxu1 %v441_v23  ;;  %v422_v34 = vld [vmem:[#allocation2 + $0x48] sm:$0xff]  ;;  %v508_v37 = vld [vmem:[#allocation2 + $0x1a0] sm:$0xff]  ;;  %v491_v40 = vld [vmem:[#allocation2 + $0x118] sm:$0xff] }
  0x2b   : > { %526 = vmatpush.msra.mxu2 %v497_v14  ;;  %449 = vmatpush.msra.mxu0 %v424_v26  ;;  %v438_v35 = vld [vmem:[#allocation2 + $0xc8] sm:$0xff]  ;;  %v421_v38 = vld [vmem:[#allocation2 + $0x40] sm:$0xff]  ;;  %v507_v41 = vld [vmem:[#allocation2 + $0x198] sm:$0xff] }
  0x2c   : > { %546 = vmatpush.msra.mxu3 %v513_v15  ;;  %469 = vmatpush.msra.mxu1 %v440_v27  ;;  %v437_v39 = vld [vmem:[#allocation2 + $0xc0] sm:$0xff]  ;;  %v420_v42 = vld [vmem:[#allocation2 + $0x38] sm:$0xff]  ;;  %v490_v44 = vld [vmem:[#allocation2 + $0x110] sm:$0xff] }
  0x2d   : > { %527 = vmatpush.msra.mxu2 %v496_v17  ;;  %450 = vmatpush.msra.mxu0 %v423_v30  ;;  %v436_v43 = vld [vmem:[#allocation2 + $0xb8] sm:$0xff]  ;;  %v506_v45 = vld [vmem:[#allocation2 + $0x190] sm:$0xff]  ;;  %v489_v48 = vld [vmem:[#allocation2 + $0x108] sm:$0xff] }
  0x2e   : > { %547 = vmatpush.msra.mxu3 %v512_v19  ;;  %470 = vmatpush.msra.mxu1 %v439_v31  ;;  %v419_v46 = vld [vmem:[#allocation2 + $0x30] sm:$0xff]  ;;  %v505_v49 = vld [vmem:[#allocation2 + $0x188] sm:$0xff]  ;;  %v488_v52 = vld [vmem:[#allocation2 + $0x100] sm:$0xff] }
  0x2f   : > { %528 = vmatpush.msra.mxu2 %v495_v24  ;;  %451 = vmatpush.msra.mxu0 %v422_v34  ;;  %v435_v47 = vld [vmem:[#allocation2 + $0xb0] sm:$0xff]  ;;  %v418_v50 = vld [vmem:[#allocation2 + $0x28] sm:$0xff]  ;;  %v504_v53 = vld [vmem:[#allocation2 + $0x180] sm:$0xff] }
  0x30   : > { %548 = vmatpush.msra.mxu3 %v511_v25  ;;  %471 = vmatpush.msra.mxu1 %v438_v35  ;;  %v434_v51 = vld [vmem:[#allocation2 + $0xa8] sm:$0xff]  ;;  %v3486_v54 = vld [vmem:[%s3483_s19] sm:$0xff]  ;;  %v416_v58 = vld [vmem:[#allocation2 + $0x18] sm:$0xff] }
  0x31   : > { %529 = vmatpush.msra.mxu2 %v494_v28  ;;  %452 = vmatpush.msra.mxu0 %v421_v38  ;;  %v3489_v55 = vld [vmem:[%s3483_s19 + $0x8] sm:$0xff]  ;;  %v417_v56 = vld [vmem:[#allocation2 + $0x20] sm:$0xff]  ;;  %v432_v59 = vld [vmem:[#allocation2 + $0x98] sm:$0xff] }
  0x32   : > { %549 = vmatpush.msra.mxu3 %v510_v29  ;;  %472 = vmatpush.msra.mxu1 %v437_v39  ;;  %v433_v57 = vld [vmem:[#allocation2 + $0xa0] sm:$0xff]  ;;  %v415_v60 = vld [vmem:[#allocation2 + $0x10] sm:$0xff]  ;;  %v414_v62 = vld [vmem:[#allocation2 + $0x8] sm:$0xff] }
  0x33   : > { %530 = vmatpush.msra.mxu2 %v493_v32  ;;  %453 = vmatpush.msra.mxu0 %v420_v42  ;;  %v431_v61 = vld [vmem:[#allocation2 + $0x90] sm:$0xff]  ;;  %v430_v63 = vld [vmem:[#allocation2 + $0x88] sm:$0xff]  ;;  %v413_v0 = vld [vmem:[#allocation2] sm:$0xff] }
  0x34   : > { %550 = vmatpush.msra.mxu3 %v509_v33  ;;  %473 = vmatpush.msra.mxu1 %v436_v43  ;;  %v429_v1 = vld [vmem:[#allocation2 + $0x80] sm:$0xff]  ;;  %v638_v2 = vld [vmem:[#allocation2 + $0x278] sm:$0xff]  ;;  %v637_v3 = vld [vmem:[#allocation2 + $0x270] sm:$0xff] }
  0x35   : > { %531 = vmatpush.msra.mxu2 %v492_v36  ;;  %454 = vmatpush.msra.mxu0 %v419_v46  ;;  %v636_v4 = vld [vmem:[#allocation2 + $0x268] sm:$0xff]  ;;  %v635_v5 = vld [vmem:[#allocation2 + $0x260] sm:$0xff]  ;;  %v634_v6 = vld [vmem:[#allocation2 + $0x258] sm:$0xff] }
  0x36   : > { %551 = vmatpush.msra.mxu3 %v508_v37  ;;  %474 = vmatpush.msra.mxu1 %v435_v47  ;;  %v633_v7 = vld [vmem:[#allocation2 + $0x250] sm:$0xff]  ;;  %v632_v8 = vld [vmem:[#allocation2 + $0x248] sm:$0xff]  ;;  %v631_v9 = vld [vmem:[#allocation2 + $0x240] sm:$0xff] }
  0x37   : > { %532 = vmatpush.msra.mxu2 %v491_v40  ;;  %455 = vmatpush.msra.mxu0 %v418_v50  ;;  %v630_v10 = vld [vmem:[#allocation2 + $0x238] sm:$0xff]  ;;  %v629_v11 = vld [vmem:[#allocation2 + $0x230] sm:$0xff]  ;;  %v628_v12 = vld [vmem:[#allocation2 + $0x228] sm:$0xff] }
  0x38   : > { %552 = vmatpush.msra.mxu3 %v507_v41  ;;  %475 = vmatpush.msra.mxu1 %v434_v51  ;;  %v627_v13 = vld [vmem:[#allocation2 + $0x220] sm:$0xff]  ;;  %v626_v14 = vld [vmem:[#allocation2 + $0x218] sm:$0xff]  ;;  %v625_v15 = vld [vmem:[#allocation2 + $0x210] sm:$0xff] }
  0x39   : > { %533 = vmatpush.msra.mxu2 %v490_v44  ;;  %456 = vmatpush.msra.mxu0 %v417_v56  ;;  %v624_v16 = vld [vmem:[#allocation2 + $0x208] sm:$0xff]  ;;  %v623_v19 = vld [vmem:[#allocation2 + $0x200] sm:$0xff]  ;;  %v654_v21 = vld [vmem:[#allocation2 + $0x2f8] sm:$0xff] }
  0x3a   : > { %553 = vmatpush.msra.mxu3 %v506_v45  ;;  %476 = vmatpush.msra.mxu1 %v433_v57  ;;  %v2971_v22 = vld [vmem:[%s4134_s4 + $0x10] sm:$0xff]  ;;  %v652_v26 = vld [vmem:[#allocation2 + $0x2e8] sm:$0xff]  ;;  %v485_v28 = vld [vmem:[%s4134_s4] sm:$0xff] }
  0x3b   : > { %534 = vmatpush.msra.mxu2 %v489_v48  ;;  %457 = vmatpush.msra.mxu0 %v416_v58  ;;  %v653_v23 = vld [vmem:[#allocation2 + $0x2f0] sm:$0xff]  ;;  %v745_v29 = vld [vmem:[#allocation2 + $0x378] sm:$0xff]  ;;  %v651_v30 = vld [vmem:[#allocation2 + $0x2e0] sm:$0xff] }
  0x3c   : > { %554 = vmatpush.msra.mxu3 %v505_v49  ;;  %477 = vmatpush.msra.mxu1 %v432_v59  ;;  %v744_v31 = vld [vmem:[#allocation2 + $0x370] sm:$0xff]  ;;  %v650_v32 = vld [vmem:[#allocation2 + $0x2d8] sm:$0xff]  ;;  %v743_v34 = vld [vmem:[#allocation2 + $0x368] sm:$0xff] }
  0x3d   : > { %535 = vmatpush.msra.mxu2 %v488_v52  ;;  %458 = vmatpush.msra.mxu0 %v415_v60  ;;  %v2972_v33 = vld [vmem:[%s4134_s4 + $0x18] sm:$0xff]  ;;  %v649_v35 = vld [vmem:[#allocation2 + $0x2d0] sm:$0xff]  ;;  %v742_v36 = vld [vmem:[#allocation2 + $0x360] sm:$0xff] }
  0x3e   : > { %555 = vmatpush.msra.mxu3 %v504_v53  ;;  %536 = vmatmul.f32.vlgmr.msra.gmra.mxu2 %v3486_v54  ;;  %v648_v37 = vld [vmem:[#allocation2 + $0x2c8] sm:$0xff]  ;;  %v741_v39 = vld [vmem:[#allocation2 + $0x358] sm:$0xff]  ;;  %v647_v40 = vld [vmem:[#allocation2 + $0x2c0] sm:$0xff] }
  0x3f   : > { %556 = vmatmul.f32.vlgmr.msra.gmra.mxu3 %v3489_v55  ;;  %478 = vmatpush.msra.mxu1 %v431_v61  ;;  %v486_v38 = vld [vmem:[%s4134_s4 + $0x8] sm:$0xff]  ;;  %v646_v41 = vld [vmem:[#allocation2 + $0x2b8] sm:$0xff]  ;;  %v645_v42 = vld [vmem:[#allocation2 + $0x2b0] sm:$0xff] }
  0x40   : > { %459 = vmatpush.msra.mxu0 %v414_v62  ;;  %655 = vmatpush.msrb.mxu2 %v638_v2  ;;  %v644_v43 = vld [vmem:[#allocation2 + $0x2a8] sm:$0xff]  ;;  %v643_v44 = vld [vmem:[#allocation2 + $0x2a0] sm:$0xff]  ;;  %v642_v45 = vld [vmem:[#allocation2 + $0x298] sm:$0xff] }
  0x41   : > { %479 = vmatpush.msra.mxu1 %v430_v63  ;;  %v641_v46 = vld [vmem:[#allocation2 + $0x290] sm:$0xff]  ;;  %v640_v47 = vld [vmem:[#allocation2 + $0x288] sm:$0xff]  ;;  %v639_v48 = vld [vmem:[#allocation2 + $0x280] sm:$0xff] }
  0x42   : > { %460 = vmatpush.msra.mxu0 %v413_v0  ;;  %656 = vmatpush.msrb.mxu2 %v637_v3  ;;  %v740_v49 = vld [vmem:[#allocation2 + $0x350] sm:$0xff]  ;;  %v739_v50 = vld [vmem:[#allocation2 + $0x348] sm:$0xff]  ;;  %v738_v51 = vld [vmem:[#allocation2 + $0x340] sm:$0xff] }
  0x43   : > { %480 = vmatpush.msra.mxu1 %v429_v1  ;;  %461 = vmatmul.f32.vlgmr.msra.gmra.mxu0 %v3486_v54  ;;  %v737_v52 = vld [vmem:[#allocation2 + $0x338] sm:$0xff]  ;;  %v736_v53 = vld [vmem:[#allocation2 + $0x330] sm:$0xff]  ;;  %v735_v56 = vld [vmem:[#allocation2 + $0x328] sm:$0xff] }
  0x44   : > { %481 = vmatmul.f32.vlgmr.msra.gmra.mxu1 %v3489_v55  ;;  %657 = vmatpush.msrb.mxu2 %v636_v4  ;;  %v852_v57 = vld [vmem:[#allocation2 + $0x478] sm:$0xff]  ;;  %v734_v58 = vld [vmem:[#allocation2 + $0x320] sm:$0xff]  ;;  %v732_v60 = vld [vmem:[#allocation2 + $0x310] sm:$0xff] }
  0x45   : > { %v733_v59 = vld [vmem:[#allocation2 + $0x318] sm:$0xff]  ;;  %v851_v61 = vld [vmem:[#allocation2 + $0x470] sm:$0xff]  ;;  %v731_v62 = vld [vmem:[#allocation2 + $0x308] sm:$0xff] }
  0x46   : > { %658 = vmatpush.msrb.mxu2 %v635_v5  ;;  %v850_v63 = vld [vmem:[#allocation2 + $0x468] sm:$0xff]  ;;  %v730_v0 = vld [vmem:[#allocation2 + $0x300] sm:$0xff]  ;;  %v868_v2 = vld [vmem:[#allocation2 + $0x4f8] sm:$0xff] }
  0x47   : > { %v849_v1 = vld [vmem:[#allocation2 + $0x460] sm:$0xff]  ;;  %v848_v3 = vld [vmem:[#allocation2 + $0x458] sm:$0xff]  ;;  %v867_v4 = vld [vmem:[#allocation2 + $0x4f0] sm:$0xff] }
  0x48   : > { %659 = vmatpush.msrb.mxu2 %v634_v6  ;;  %v847_v5 = vld [vmem:[#allocation2 + $0x450] sm:$0xff]  ;;  %v866_v6 = vld [vmem:[#allocation2 + $0x4e8] sm:$0xff] }
  0x4a   : > { %660 = vmatpush.msrb.mxu2 %v633_v7  ;;  %v846_v7 = vld [vmem:[#allocation2 + $0x448] sm:$0xff] }
  0x4c   : > { %661 = vmatpush.msrb.mxu2 %v632_v8  ;;  %v865_v8 = vld [vmem:[#allocation2 + $0x4e0] sm:$0xff] }
  0x4e   : > { %662 = vmatpush.msrb.mxu2 %v631_v9 }
  0x50   : > { %663 = vmatpush.msrb.mxu2 %v630_v10  ;;  %v845_v10 = vld [vmem:[#allocation2 + $0x440] sm:$0xff] }
  0x52   : > { %664 = vmatpush.msrb.mxu2 %v629_v11  ;;  %v864_v11 = vld [vmem:[#allocation2 + $0x4d8] sm:$0xff] }
  0x54   : > { %665 = vmatpush.msrb.mxu2 %v628_v12  ;;  %v844_v12 = vld [vmem:[#allocation2 + $0x438] sm:$0xff] }
  0x56   : > { %666 = vmatpush.msrb.mxu2 %v627_v13  ;;  %v863_v13 = vld [vmem:[#allocation2 + $0x4d0] sm:$0xff] }
  0x58   : > { %667 = vmatpush.msrb.mxu2 %v626_v14  ;;  %v843_v14 = vld [vmem:[#allocation2 + $0x430] sm:$0xff] }
  0x5a   : > { %668 = vmatpush.msrb.mxu2 %v625_v15  ;;  %v862_v15 = vld [vmem:[#allocation2 + $0x4c8] sm:$0xff] }
  0x5c   : > { %669 = vmatpush.msrb.mxu2 %v624_v16  ;;  %v842_v16 = vld [vmem:[#allocation2 + $0x428] sm:$0xff] }
  0x5e   : > { %670 = vmatpush.msrb.mxu2 %v623_v19  ;;  %v860_v19 = vld [vmem:[#allocation2 + $0x4b8] sm:$0xff] }
  0x5f   : > { %671 = vmatmul.f32.vlgmr.msrb.gmra.mxu2 %v3486_v54 }
  0xc0   : > { %v462_v24 = vpop.f32.mrf.mxu0 }
  0xc1   : > { %v537_v17 = vpop.f32.mrf.mxu2  ;;  %v482_v25 = vpop.f32.mrf.mxu1 }
  0xc2   : > { %v557_v18 = vpop.f32.mrf.mxu3  ;;  %v483_v27 = vadd.f32 %v482_v25, %v462_v24  ;;  %v858_v24 = vld [vmem:[#allocation2 + $0x4a8] sm:$0xff] }
  0xc3   : > { %v558_v20 = vadd.f32 %v557_v18, %v537_v17  ;;  %v861_v17 = vld [vmem:[#allocation2 + $0x4c0] sm:$0xff]  ;;  %v838_v25 = vld [vmem:[#allocation2 + $0x408] sm:$0xff] }
  0xc4   : > { %614 = vmatpush.msrb.mxu1 %v483_v27  ;;  %v841_v18 = vld [vmem:[#allocation2 + $0x420] sm:$0xff] }
  0xc5   : > { %585 = vmatpush.msrb.mxu3 %v558_v20  ;;  %2975 = vmatmul.msk.f32.vlgmr.msrb.gmra.mxu1 %vm563_vm0, %v485_v28  ;;  %v837_v27 = vld [vmem:[#allocation2 + $0x400] sm:$0xff]  ;;  %v856_v28 = vld [vmem:[#allocation2 + $0x498] sm:$0xff] }
  0xc6   : > { %2973 = vmatmul.msk.f32.vlgmr.msrb.gmra.mxu3 %vm563_vm0, %v2971_v22  ;;  %762 = vmatpush.msra.mxu1 %v745_v29  ;;  %v859_v22 = vld [vmem:[#allocation2 + $0x4b0] sm:$0xff] }
  0xc7   : > { %675 = vmatpush.msra.mxu3 %v654_v21  ;;  %v840_v21 = vld [vmem:[#allocation2 + $0x418] sm:$0xff] }
  0xc8   : > { %763 = vmatpush.msra.mxu1 %v744_v31 }
  0xc9   : > { %676 = vmatpush.msra.mxu3 %v653_v23  ;;  %v839_v23 = vld [vmem:[#allocation2 + $0x410] sm:$0xff] }
  0xca   : > { %764 = vmatpush.msra.mxu1 %v743_v34  ;;  %v854_v34 = vld [vmem:[#allocation2 + $0x488] sm:$0xff] }
  0xcb   : > { %677 = vmatpush.msra.mxu3 %v652_v26  ;;  %v857_v26 = vld [vmem:[#allocation2 + $0x4a0] sm:$0xff] }
  0xcc   : > { %765 = vmatpush.msra.mxu1 %v742_v36  ;;  %v853_v36 = vld [vmem:[#allocation2 + $0x480] sm:$0xff] }
  0xcd   : > { %678 = vmatpush.msra.mxu3 %v651_v30  ;;  %2976 = vmatmul.msk.f32.gmra.mxu1 %vm563_vm0, %v486_v38  ;;  %v855_v30 = vld [vmem:[#allocation2 + $0x490] sm:$0xff]  ;;  %v759_v38 = vld [vmem:[#allocation2 + $0x3e8] sm:$0xff] }
  0xce   : > { %2974 = vmatmul.msk.f32.gmra.mxu3 %vm563_vm0, %v2972_v33  ;;  %766 = vmatpush.msra.mxu1 %v741_v39  ;;  %v2977_v33 = vld [vmem:[%s4134_s4 + $0x20] sm:$0xff] }
  0xcf   : > { %679 = vmatpush.msra.mxu3 %v650_v32  ;;  %v758_v39 = vld [vmem:[#allocation2 + $0x3e0] sm:$0xff] }
  0xd0   : > { %767 = vmatpush.msra.mxu1 %v740_v49  ;;  %v749_v49 = vld [vmem:[#allocation2 + $0x398] sm:$0xff] }
  0xd1   : > { %680 = vmatpush.msra.mxu3 %v649_v35  ;;  %v761_v35 = vld [vmem:[#allocation2 + $0x3f8] sm:$0xff] }
  0xd2   : > { %768 = vmatpush.msra.mxu1 %v739_v50  ;;  %v748_v50 = vld [vmem:[#allocation2 + $0x390] sm:$0xff] }
  0xd3   : > { %681 = vmatpush.msra.mxu3 %v648_v37  ;;  %v760_v37 = vld [vmem:[#allocation2 + $0x3f0] sm:$0xff] }
  0xd4   : > { %769 = vmatpush.msra.mxu1 %v738_v51  ;;  %v747_v51 = vld [vmem:[#allocation2 + $0x388] sm:$0xff] }
  0xd5   : > { %682 = vmatpush.msra.mxu3 %v647_v40  ;;  %v2978_v40 = vld [vmem:[%s4134_s4 + $0x28] sm:$0xff] }
  0xd6   : > { %770 = vmatpush.msra.mxu1 %v737_v52  ;;  %v746_v52 = vld [vmem:[#allocation2 + $0x380] sm:$0xff] }
  0xd7   : > { %683 = vmatpush.msra.mxu3 %v646_v41  ;;  %v757_v41 = vld [vmem:[#allocation2 + $0x3d8] sm:$0xff] }
  0xd8   : > { %771 = vmatpush.msra.mxu1 %v736_v53 }
  0xd9   : > { %684 = vmatpush.msra.mxu3 %v645_v42  ;;  %v756_v42 = vld [vmem:[#allocation2 + $0x3d0] sm:$0xff] }
  0xda   : > { %772 = vmatpush.msra.mxu1 %v735_v56  ;;  %v959_v56 = vld [vmem:[#allocation2 + $0x578] sm:$0xff] }
  0xdb   : > { %685 = vmatpush.msra.mxu3 %v644_v43  ;;  %v755_v43 = vld [vmem:[#allocation2 + $0x3c8] sm:$0xff] }
  0xdc   : > { %773 = vmatpush.msra.mxu1 %v734_v58  ;;  %v958_v58 = vld [vmem:[#allocation2 + $0x570] sm:$0xff] }
  0xdd   : > { %686 = vmatpush.msra.mxu3 %v643_v44  ;;  %v754_v44 = vld [vmem:[#allocation2 + $0x3c0] sm:$0xff] }
  0xde   : > { %774 = vmatpush.msra.mxu1 %v733_v59 }
  0xdf   : > { %687 = vmatpush.msra.mxu3 %v642_v45  ;;  %v753_v45 = vld [vmem:[#allocation2 + $0x3b8] sm:$0xff] }
  0xe0   : > { %775 = vmatpush.msra.mxu1 %v732_v60  ;;  %v957_v60 = vld [vmem:[#allocation2 + $0x568] sm:$0xff] }
  0xe1   : > { %688 = vmatpush.msra.mxu3 %v641_v46  ;;  %v752_v46 = vld [vmem:[#allocation2 + $0x3b0] sm:$0xff] }
  0xe2   : > { %776 = vmatpush.msra.mxu1 %v731_v62  ;;  %v672_v29 = vpop.f32.mrf.mxu2  ;;  %v955_v62 = vld [vmem:[#allocation2 + $0x558] sm:$0xff] }
  0xe3   : > { %689 = vmatpush.msra.mxu3 %v640_v47  ;;  %v751_v47 = vld [vmem:[#allocation2 + $0x3a8] sm:$0xff] }
  0xe4   : > { %777 = vmatpush.msra.mxu1 %v730_v0  ;;  %v954_v0 = vld [vmem:[#allocation2 + $0x550] sm:$0xff] }
  0xe5   : > { %690 = vmatpush.msra.mxu3 %v639_v48  ;;  %778 = vmatmul.f32.vlgmr.msra.gmra.mxu1 %v3486_v54  ;;  %v750_v48 = vld [vmem:[#allocation2 + $0x3a0] sm:$0xff] }
  0xe6   : > { %691 = vmatmul.f32.vlgmr.msra.gmra.mxu3 %v3489_v55  ;;  %889 = vmatpush.msrb.mxu1 %v868_v2 }
  0xe7   : > { %869 = vmatpush.msrb.mxu3 %v852_v57 }
  0xe8   : > { %890 = vmatpush.msrb.mxu1 %v867_v4  ;;  %v951_v4 = vld [vmem:[#allocation2 + $0x538] sm:$0xff] }
  0xe9   : > { %870 = vmatpush.msrb.mxu3 %v851_v61  ;;  %v956_v61 = vld [vmem:[#allocation2 + $0x560] sm:$0xff] }
  0xea   : > { %891 = vmatpush.msrb.mxu1 %v866_v6 }
  0xeb   : > { %871 = vmatpush.msrb.mxu3 %v850_v63 }
  0xec   : > { %892 = vmatpush.msrb.mxu1 %v865_v8  ;;  %v949_v8 = vld [vmem:[#allocation2 + $0x528] sm:$0xff] }
  0xed   : > { %872 = vmatpush.msrb.mxu3 %v849_v1  ;;  %v953_v1 = vld [vmem:[#allocation2 + $0x548] sm:$0xff] }
  0xee   : > { %893 = vmatpush.msrb.mxu1 %v864_v11  ;;  %v948_v11 = vld [vmem:[#allocation2 + $0x520] sm:$0xff] }
  0xef   : > { %873 = vmatpush.msrb.mxu3 %v848_v3  ;;  %v952_v3 = vld [vmem:[#allocation2 + $0x540] sm:$0xff] }
  0xf0   : > { %894 = vmatpush.msrb.mxu1 %v863_v13 }
  0xf1   : > { %874 = vmatpush.msrb.mxu3 %v847_v5  ;;  %v950_v5 = vld [vmem:[#allocation2 + $0x530] sm:$0xff] }
  0xf2   : > { %895 = vmatpush.msrb.mxu1 %v862_v15  ;;  %v947_v15 = vld [vmem:[#allocation2 + $0x518] sm:$0xff] }
  0xf3   : > { %875 = vmatpush.msrb.mxu3 %v846_v7 }
  0xf4   : > { %896 = vmatpush.msrb.mxu1 %v861_v17  ;;  %v974_v17 = vld [vmem:[#allocation2 + $0x5f0] sm:$0xff] }
  0xf5   : > { %876 = vmatpush.msrb.mxu3 %v845_v10 }
  0xf6   : > { %897 = vmatpush.msrb.mxu1 %v860_v19  ;;  %v945_v19 = vld [vmem:[#allocation2 + $0x508] sm:$0xff] }
  0xf7   : > { %877 = vmatpush.msrb.mxu3 %v844_v12 }
  0xf8   : > { %898 = vmatpush.msrb.mxu1 %v859_v22  ;;  %v944_v22 = vld [vmem:[#allocation2 + $0x500] sm:$0xff] }
  0xf9   : > { %878 = vmatpush.msrb.mxu3 %v843_v14  ;;  %v2981_v14 = vld [vmem:[%s4134_s4 + $0x30] sm:$0xff] }
  0xfa   : > { %899 = vmatpush.msrb.mxu1 %v858_v24  ;;  %v2982_v24 = vld [vmem:[%s4134_s4 + $0x38] sm:$0xff] }
  0xfb   : > { %879 = vmatpush.msrb.mxu3 %v842_v16  ;;  %v975_v16 = vld [vmem:[#allocation2 + $0x5f8] sm:$0xff] }
  0xfc   : > { %900 = vmatpush.msrb.mxu1 %v857_v26  ;;  %v970_v26 = vld [vmem:[#allocation2 + $0x5d0] sm:$0xff] }
  0xfd   : > { %880 = vmatpush.msrb.mxu3 %v841_v18  ;;  %v946_v18 = vld [vmem:[#allocation2 + $0x510] sm:$0xff] }
  0xfe   : > { %901 = vmatpush.msrb.mxu1 %v856_v28  ;;  %v968_v28 = vld [vmem:[#allocation2 + $0x5c0] sm:$0xff] }
  0xff   : > { %881 = vmatpush.msrb.mxu3 %v840_v21  ;;  %v973_v21 = vld [vmem:[#allocation2 + $0x5e8] sm:$0xff] }
 0x100   : > { %902 = vmatpush.msrb.mxu1 %v855_v30  ;;  %v967_v30 = vld [vmem:[#allocation2 + $0x5b8] sm:$0xff] }
 0x101   : > { %882 = vmatpush.msrb.mxu3 %v839_v23  ;;  %v972_v23 = vld [vmem:[#allocation2 + $0x5e0] sm:$0xff] }
 0x102   : > { %903 = vmatpush.msrb.mxu1 %v854_v34  ;;  %v2986_v34 = vld [vmem:[%s4134_s4 + $0x48] sm:$0xff] }
 0x103   : > { %883 = vmatpush.msrb.mxu3 %v838_v25  ;;  %v971_v25 = vld [vmem:[#allocation2 + $0x5d8] sm:$0xff] }
 0x104   : > { %904 = vmatpush.msrb.mxu1 %v853_v36  ;;  %v962_v36 = vld [vmem:[#allocation2 + $0x590] sm:$0xff] }
 0x105   : > { %884 = vmatpush.msrb.mxu3 %v837_v27  ;;  %905 = vmatmul.f32.vlgmr.msrb.gmra.mxu1 %v3489_v55  ;;  %v969_v27 = vld [vmem:[#allocation2 + $0x5c8] sm:$0xff] }
 0x106   : > { %885 = vmatmul.f32.vlgmr.msrb.gmra.mxu3 %v3486_v54 }
 0x142   : > { %v3529_v53 = vpop.f32.mrf.mxu1 }
 0x149   : > { %v3514_v9 = vpop.f32.mrf.mxu3 }
 0x14a   : > { %v3531_v57 = vpop.f32.mrf.mxu1 }
 0x151   : > { %v3516_v20 = vpop.f32.mrf.mxu3 }
 0x162   : > { %v779_v63 = vpop.f32.mrf.mxu1 }
 0x169   : > { %v692_v31 = vpop.f32.mrf.mxu3 }
 0x16a   : > { %v693_v32 = vadd.f32 %v692_v31, %v672_v29  ;;  %v2985_v29 = vld [vmem:[%s4134_s4 + $0x40] sm:$0xff]  ;;  %v966_v31 = vld [vmem:[#allocation2 + $0x5b0] sm:$0xff] }
 0x16c   : > { %719 = vmatpush.msrb.mxu0 %v693_v32  ;;  %v965_v32 = vld [vmem:[#allocation2 + $0x5a8] sm:$0xff] }
 0x16d   : > { %2979 = vmatmul.msk.f32.vlgmr.msrb.gmra.mxu0 %vm563_vm0, %v2977_v33  ;;  %v964_v33 = vld [vmem:[#allocation2 + $0x5a0] sm:$0xff] }
 0x16e   : > { %782 = vmatpush.msra.mxu0 %v761_v35  ;;  %v963_v35 = vld [vmem:[#allocation2 + $0x598] sm:$0xff] }
 0x170   : > { %783 = vmatpush.msra.mxu0 %v760_v37  ;;  %v961_v37 = vld [vmem:[#allocation2 + $0x588] sm:$0xff] }
 0x172   : > { %784 = vmatpush.msra.mxu0 %v759_v38  ;;  %v960_v38 = vld [vmem:[#allocation2 + $0x580] sm:$0xff] }
 0x174   : > { %785 = vmatpush.msra.mxu0 %v758_v39 }
 0x175   : > { %2980 = vmatmul.msk.f32.gmra.mxu0 %vm563_vm0, %v2978_v40 }
 0x176   : > { %786 = vmatpush.msra.mxu0 %v757_v41  ;;  %v1066_v41 = vld [vmem:[#allocation2 + $0x678] sm:$0xff] }
 0x177   : > { %1083 = vmatpush.msra.mxu1 %v1066_v41 }
 0x178   : > { %787 = vmatpush.msra.mxu0 %v756_v42  ;;  %v1065_v42 = vld [vmem:[#allocation2 + $0x670] sm:$0xff] }
 0x179   : > { %1084 = vmatpush.msra.mxu1 %v1065_v42  ;;  %v1159_v42 = vld [vmem:[#allocation2 + $0x708] sm:$0xff] }
 0x17a   : > { %788 = vmatpush.msra.mxu0 %v755_v43  ;;  %v1064_v43 = vld [vmem:[#allocation2 + $0x668] sm:$0xff] }
 0x17b   : > { %1085 = vmatpush.msra.mxu1 %v1064_v43  ;;  %v1158_v43 = vld [vmem:[#allocation2 + $0x700] sm:$0xff] }
 0x17c   : > { %789 = vmatpush.msra.mxu0 %v754_v44  ;;  %v1063_v44 = vld [vmem:[#allocation2 + $0x660] sm:$0xff] }
 0x17d   : > { %1086 = vmatpush.msra.mxu1 %v1063_v44 }
 0x17e   : > { %790 = vmatpush.msra.mxu0 %v753_v45 }
 0x180   : > { %791 = vmatpush.msra.mxu0 %v752_v46  ;;  %v1062_v46 = vld [vmem:[#allocation2 + $0x658] sm:$0xff] }
 0x181   : > { %1087 = vmatpush.msra.mxu1 %v1062_v46 }
 0x182   : > { %792 = vmatpush.msra.mxu0 %v751_v47  ;;  %v906_v7 = vpop.f32.mrf.mxu1  ;;  %v1061_v47 = vld [vmem:[#allocation2 + $0x650] sm:$0xff] }
 0x183   : > { %1088 = vmatpush.msra.mxu1 %v1061_v47 }
 0x184   : > { %793 = vmatpush.msra.mxu0 %v750_v48  ;;  %v1060_v48 = vld [vmem:[#allocation2 + $0x648] sm:$0xff] }
 0x185   : > { %1089 = vmatpush.msra.mxu1 %v1060_v48  ;;  %v2993_v48 = vld [vmem:[%s4134_s4 + $0x60] sm:$0xff] }
 0x186   : > { %794 = vmatpush.msra.mxu0 %v749_v49  ;;  %v1059_v49 = vld [vmem:[#allocation2 + $0x640] sm:$0xff] }
 0x187   : > { %1090 = vmatpush.msra.mxu1 %v1059_v49  ;;  %v1189_v49 = vld [vmem:[#allocation2 + $0x7f8] sm:$0xff] }
 0x188   : > { %795 = vmatpush.msra.mxu0 %v748_v50 }
 0x189   : > { %v886_v6 = vpop.f32.mrf.mxu3 }
 0x18a   : > { %796 = vmatpush.msra.mxu0 %v747_v51  ;;  %v907_v13 = vadd.f32 %v906_v7, %v886_v6  ;;  %v1058_v51 = vld [vmem:[#allocation2 + $0x638] sm:$0xff]  ;;  %v1080_v6 = vld [vmem:[#allocation2 + $0x6e8] sm:$0xff]  ;;  %v1051_v7 = vld [vmem:[#allocation2 + $0x600] sm:$0xff] }
 0x18b   : > { %1091 = vmatpush.msra.mxu1 %v1058_v51  ;;  %v1188_v51 = vld [vmem:[#allocation2 + $0x7f0] sm:$0xff] }
 0x18c   : > { %797 = vmatpush.msra.mxu0 %v746_v52  ;;  %v1057_v52 = vld [vmem:[#allocation2 + $0x630] sm:$0xff] }
 0x18d   : > { %798 = vmatmul.f32.vlgmr.msra.gmra.mxu0 %v3489_v55  ;;  %1092 = vmatpush.msra.mxu1 %v1057_v52  ;;  %v1187_v52 = vld [vmem:[#allocation2 + $0x7e8] sm:$0xff] }
 0x18e   : > { %976 = vmatpush.msrb.mxu0 %v959_v56  ;;  %v1056_v56 = vld [vmem:[#allocation2 + $0x628] sm:$0xff] }
 0x18f   : > { %1093 = vmatpush.msra.mxu1 %v1056_v56  ;;  %v1186_v56 = vld [vmem:[#allocation2 + $0x7e0] sm:$0xff] }
 0x190   : > { %977 = vmatpush.msrb.mxu0 %v958_v58 }
 0x192   : > { %978 = vmatpush.msrb.mxu0 %v957_v60  ;;  %v1055_v60 = vld [vmem:[#allocation2 + $0x620] sm:$0xff] }
 0x193   : > { %1094 = vmatpush.msra.mxu1 %v1055_v60  ;;  %v1184_v60 = vld [vmem:[#allocation2 + $0x7d0] sm:$0xff] }
 0x194   : > { %979 = vmatpush.msrb.mxu0 %v956_v61 }
 0x196   : > { %980 = vmatpush.msrb.mxu0 %v955_v62 }
 0x198   : > { %981 = vmatpush.msrb.mxu0 %v954_v0  ;;  %v1054_v0 = vld [vmem:[#allocation2 + $0x618] sm:$0xff] }
 0x199   : > { %1095 = vmatpush.msra.mxu1 %v1054_v0  ;;  %v1180_v0 = vld [vmem:[#allocation2 + $0x7b0] sm:$0xff] }
 0x19a   : > { %982 = vmatpush.msrb.mxu0 %v953_v1  ;;  %v1082_v1 = vld [vmem:[#allocation2 + $0x6f8] sm:$0xff] }
 0x19c   : > { %983 = vmatpush.msrb.mxu0 %v952_v3  ;;  %v1081_v3 = vld [vmem:[#allocation2 + $0x6f0] sm:$0xff] }
 0x19e   : > { %984 = vmatpush.msrb.mxu0 %v951_v4  ;;  %v1053_v4 = vld [vmem:[#allocation2 + $0x610] sm:$0xff] }
 0x19f   : > { %1096 = vmatpush.msra.mxu1 %v1053_v4  ;;  %v1177_v4 = vld [vmem:[#allocation2 + $0x798] sm:$0xff] }
 0x1a0   : > { %985 = vmatpush.msrb.mxu0 %v950_v5  ;;  %v1052_v5 = vld [vmem:[#allocation2 + $0x608] sm:$0xff] }
 0x1a1   : > { %1097 = vmatpush.msra.mxu1 %v1052_v5  ;;  %v1176_v5 = vld [vmem:[#allocation2 + $0x790] sm:$0xff] }
 0x1a2   : > { %986 = vmatpush.msrb.mxu0 %v949_v8  ;;  %v1079_v8 = vld [vmem:[#allocation2 + $0x6e0] sm:$0xff] }
 0x1a3   : > { %1098 = vmatpush.msra.mxu1 %v1051_v7  ;;  %v1174_v7 = vld [vmem:[#allocation2 + $0x780] sm:$0xff] }
 0x1a4   : > { %987 = vmatpush.msrb.mxu0 %v948_v11  ;;  %v1078_v11 = vld [vmem:[#allocation2 + $0x6d8] sm:$0xff]  ;;  %1099 = vmatmul.f32.vlgmr.msra.gmra.mxu1 %v3486_v54 }
 0x1a6   : > { %988 = vmatpush.msrb.mxu0 %v947_v15  ;;  %v1074_v15 = vld [vmem:[#allocation2 + $0x6b8] sm:$0xff] }
 0x1a8   : > { %989 = vmatpush.msrb.mxu0 %v946_v18  ;;  %v1071_v18 = vld [vmem:[#allocation2 + $0x6a0] sm:$0xff] }
 0x1aa   : > { %990 = vmatpush.msrb.mxu0 %v945_v19  ;;  %v1070_v19 = vld [vmem:[#allocation2 + $0x698] sm:$0xff] }
 0x1ac   : > { %991 = vmatpush.msrb.mxu0 %v944_v22  ;;  %v1068_v22 = vld [vmem:[#allocation2 + $0x688] sm:$0xff] }
 0x1ad   : > { %992 = vmatmul.f32.vlgmr.msrb.gmra.mxu0 %v3486_v54 }
 0x1ea   : > { %v3533_v59 = vpop.f32.mrf.mxu0 }
 0x1f2   : > { %v3535_v2 = vpop.f32.mrf.mxu0 }
 0x20a   : > { %v799_v10 = vpop.f32.mrf.mxu0 }
 0x20b   : > { %v800_v12 = vadd.f32 %v799_v10, %v779_v63  ;;  %v2989_v63 = vld [vmem:[%s4134_s4 + $0x50] sm:$0xff]  ;;  %v2990_v10 = vld [vmem:[%s4134_s4 + $0x58] sm:$0xff] }
 0x20d   : > { %826 = vmatpush.msra.mxu2 %v800_v12  ;;  %v1077_v12 = vld [vmem:[#allocation2 + $0x6d0] sm:$0xff] }
 0x20e   : > { %2983 = vmatmul.msk.f32.vlgmr.msra.gmra.mxu2 %vm563_vm0, %v2981_v14  ;;  %v1075_v14 = vld [vmem:[#allocation2 + $0x6c0] sm:$0xff] }
 0x20f   : > { %933 = vmatpush.msrb.mxu2 %v907_v13  ;;  %v1076_v13 = vld [vmem:[#allocation2 + $0x6c8] sm:$0xff] }
 0x211   : > { %996 = vmatpush.msra.mxu2 %v975_v16  ;;  %v1073_v16 = vld [vmem:[#allocation2 + $0x6b0] sm:$0xff] }
 0x213   : > { %997 = vmatpush.msra.mxu2 %v974_v17  ;;  %v1072_v17 = vld [vmem:[#allocation2 + $0x6a8] sm:$0xff] }
 0x215   : > { %998 = vmatpush.msra.mxu2 %v973_v21  ;;  %v1069_v21 = vld [vmem:[#allocation2 + $0x690] sm:$0xff] }
 0x216   : > { %2984 = vmatmul.msk.f32.gmra.mxu2 %vm563_vm0, %v2982_v24  ;;  %v1173_v24 = vld [vmem:[#allocation2 + $0x778] sm:$0xff] }
 0x217   : > { %999 = vmatpush.msra.mxu2 %v972_v23  ;;  %v1067_v23 = vld [vmem:[#allocation2 + $0x680] sm:$0xff] }
 0x219   : > { %1000 = vmatpush.msra.mxu2 %v971_v25  ;;  %v1172_v25 = vld [vmem:[#allocation2 + $0x770] sm:$0xff] }
 0x21b   : > { %1001 = vmatpush.msra.mxu2 %v970_v26  ;;  %v1171_v26 = vld [vmem:[#allocation2 + $0x768] sm:$0xff] }
 0x21d   : > { %1002 = vmatpush.msra.mxu2 %v969_v27  ;;  %v1170_v27 = vld [vmem:[#allocation2 + $0x760] sm:$0xff] }
 0x21e   : > { %2987 = vmatmul.msk.f32.vlgmr.msrb.gmra.mxu2 %vm563_vm0, %v2985_v29  ;;  %v1168_v29 = vld [vmem:[#allocation2 + $0x750] sm:$0xff] }
 0x21f   : > { %1003 = vmatpush.msra.mxu2 %v968_v28  ;;  %v1169_v28 = vld [vmem:[#allocation2 + $0x758] sm:$0xff] }
 0x221   : > { %1004 = vmatpush.msra.mxu2 %v967_v30  ;;  %v1167_v30 = vld [vmem:[#allocation2 + $0x748] sm:$0xff]  ;;  %v1100_v44 = vpop.f32.mrf.mxu1 }
 0x223   : > { %1005 = vmatpush.msra.mxu2 %v966_v31  ;;  %v1166_v31 = vld [vmem:[#allocation2 + $0x740] sm:$0xff] }
 0x225   : > { %1006 = vmatpush.msra.mxu2 %v965_v32  ;;  %v1165_v32 = vld [vmem:[#allocation2 + $0x738] sm:$0xff] }
 0x226   : > { %2988 = vmatmul.msk.f32.gmra.mxu2 %vm563_vm0, %v2986_v34  ;;  %v1164_v34 = vld [vmem:[#allocation2 + $0x730] sm:$0xff] }
 0x227   : > { %1007 = vmatpush.msra.mxu2 %v964_v33 }
 0x229   : > { %1008 = vmatpush.msra.mxu2 %v963_v35  ;;  %v1163_v35 = vld [vmem:[#allocation2 + $0x728] sm:$0xff] }
 0x22a   : > { %v993_v58 = vpop.f32.mrf.mxu0 }
 0x22b   : > { %1009 = vmatpush.msra.mxu2 %v962_v36  ;;  %v1162_v36 = vld [vmem:[#allocation2 + $0x720] sm:$0xff] }
 0x22d   : > { %1010 = vmatpush.msra.mxu2 %v961_v37  ;;  %v1161_v37 = vld [vmem:[#allocation2 + $0x718] sm:$0xff] }
 0x22f   : > { %1011 = vmatpush.msra.mxu2 %v960_v38  ;;  %v1160_v38 = vld [vmem:[#allocation2 + $0x710] sm:$0xff] }
 0x230   : > { %1012 = vmatmul.f32.vlgmr.msra.gmra.mxu2 %v3489_v55 }
 0x231   : > { %1190 = vmatpush.msrb.mxu2 %v1173_v24 }
 0x233   : > { %1191 = vmatpush.msrb.mxu2 %v1172_v25  ;;  %v1266_v25 = vld [vmem:[#allocation2 + $0x808] sm:$0xff] }
 0x235   : > { %1192 = vmatpush.msrb.mxu2 %v1171_v26  ;;  %v1265_v26 = vld [vmem:[#allocation2 + $0x800] sm:$0xff] }
 0x237   : > { %1193 = vmatpush.msrb.mxu2 %v1170_v27 }
 0x239   : > { %1194 = vmatpush.msrb.mxu2 %v1169_v28  ;;  %v3184_v28 = vld [vmem:[%s3483_s19] sm:$0xff] }
 0x23b   : > { %1195 = vmatpush.msrb.mxu2 %v1168_v29 }
 0x23d   : > { %1196 = vmatpush.msrb.mxu2 %v1167_v30 }
 0x23f   : > { %1197 = vmatpush.msrb.mxu2 %v1166_v31  ;;  %v2997_v31 = vld [vmem:[%s4134_s4 + $0x70] sm:$0xff] }
 0x241   : > { %1198 = vmatpush.msrb.mxu2 %v1165_v32  ;;  %v1296_v32 = vld [vmem:[#allocation2 + $0x8f8] sm:$0xff] }
 0x243   : > { %1199 = vmatpush.msrb.mxu2 %v1164_v34  ;;  %v1295_v34 = vld [vmem:[#allocation2 + $0x8f0] sm:$0xff] }
 0x245   : > { %1200 = vmatpush.msrb.mxu2 %v1163_v35  ;;  %v1294_v35 = vld [vmem:[#allocation2 + $0x8e8] sm:$0xff] }
 0x247   : > { %1201 = vmatpush.msrb.mxu2 %v1162_v36  ;;  %v1293_v36 = vld [vmem:[#allocation2 + $0x8e0] sm:$0xff] }
 0x249   : > { %1202 = vmatpush.msrb.mxu2 %v1161_v37  ;;  %v2998_v37 = vld [vmem:[%s4134_s4 + $0x78] sm:$0xff] }
 0x24b   : > { %1203 = vmatpush.msrb.mxu2 %v1160_v38  ;;  %v1292_v38 = vld [vmem:[#allocation2 + $0x8d8] sm:$0xff] }
 0x24d   : > { %1204 = vmatpush.msrb.mxu2 %v1159_v42  ;;  %v1291_v42 = vld [vmem:[#allocation2 + $0x8d0] sm:$0xff] }
 0x24f   : > { %1205 = vmatpush.msrb.mxu2 %v1158_v43  ;;  %v1290_v43 = vld [vmem:[#allocation2 + $0x8c8] sm:$0xff] }
 0x250   : > { %1206 = vmatmul.f32.vlgmr.msrb.gmra.mxu2 %v3486_v54  ;;  %v2994_v54 = vld [vmem:[%s4134_s4 + $0x68] sm:$0xff] }
 0x291   : > { %v3555_v39 = vpop.f32.mrf.mxu2 }
 0x299   : > { %v3557_v40 = vpop.f32.mrf.mxu2 }
 0x2a1   : > { %v3559_v45 = vpop.f32.mrf.mxu2 }
 0x2a9   : > { %v3561_v50 = vpop.f32.mrf.mxu2 }
 0x2b3   : > { %v1013_v61 = vpop.f32.mrf.mxu2 }
 0x2b4   : > { %v1014_v62 = vadd.f32 %v1013_v61, %v993_v58  ;;  %v1185_v58 = vld [vmem:[#allocation2 + $0x7d8] sm:$0xff]  ;;  %v1183_v61 = vld [vmem:[#allocation2 + $0x7c8] sm:$0xff] }
 0x2b6   : > { %1040 = vmatpush.msra.mxu3 %v1014_v62  ;;  %v1182_v62 = vld [vmem:[#allocation2 + $0x7c0] sm:$0xff] }
 0x2b7   : > { %2991 = vmatmul.msk.f32.vlgmr.msra.gmra.mxu3 %vm563_vm0, %v2989_v63  ;;  %v1181_v63 = vld [vmem:[#allocation2 + $0x7b8] sm:$0xff] }
 0x2b8   : > { %1103 = vmatpush.msrb.mxu3 %v1082_v1  ;;  %v1179_v1 = vld [vmem:[#allocation2 + $0x7a8] sm:$0xff] }
 0x2ba   : > { %1104 = vmatpush.msrb.mxu3 %v1081_v3  ;;  %v1178_v3 = vld [vmem:[#allocation2 + $0x7a0] sm:$0xff] }
 0x2bc   : > { %1105 = vmatpush.msrb.mxu3 %v1080_v6  ;;  %v1175_v6 = vld [vmem:[#allocation2 + $0x788] sm:$0xff] }
 0x2be   : > { %1106 = vmatpush.msrb.mxu3 %v1079_v8  ;;  %v1280_v8 = vld [vmem:[#allocation2 + $0x878] sm:$0xff] }
 0x2bf   : > { %2992 = vmatmul.msk.f32.gmra.mxu3 %vm563_vm0, %v2990_v10  ;;  %v1279_v10 = vld [vmem:[#allocation2 + $0x870] sm:$0xff] }
 0x2c0   : > { %1107 = vmatpush.msrb.mxu3 %v1078_v11  ;;  %v1278_v11 = vld [vmem:[#allocation2 + $0x868] sm:$0xff] }
 0x2c2   : > { %1108 = vmatpush.msrb.mxu3 %v1077_v12  ;;  %v1277_v12 = vld [vmem:[#allocation2 + $0x860] sm:$0xff] }
 0x2c4   : > { %1109 = vmatpush.msrb.mxu3 %v1076_v13  ;;  %v1276_v13 = vld [vmem:[#allocation2 + $0x858] sm:$0xff] }
 0x2c6   : > { %1110 = vmatpush.msrb.mxu3 %v1075_v14  ;;  %v1275_v14 = vld [vmem:[#allocation2 + $0x850] sm:$0xff] }
 0x2c8   : > { %1111 = vmatpush.msrb.mxu3 %v1074_v15  ;;  %v1274_v15 = vld [vmem:[#allocation2 + $0x848] sm:$0xff] }
 0x2ca   : > { %1112 = vmatpush.msrb.mxu3 %v1073_v16  ;;  %v1273_v16 = vld [vmem:[#allocation2 + $0x840] sm:$0xff] }
 0x2cc   : > { %1113 = vmatpush.msrb.mxu3 %v1072_v17  ;;  %v1272_v17 = vld [vmem:[#allocation2 + $0x838] sm:$0xff] }
 0x2ce   : > { %1114 = vmatpush.msrb.mxu3 %v1071_v18 }
 0x2d0   : > { %1115 = vmatpush.msrb.mxu3 %v1070_v19  ;;  %v1270_v19 = vld [vmem:[#allocation2 + $0x828] sm:$0xff] }
 0x2d2   : > { %1116 = vmatpush.msrb.mxu3 %v1069_v21  ;;  %v1269_v21 = vld [vmem:[#allocation2 + $0x820] sm:$0xff] }
 0x2d3   : > { %v1207_v27 = vpop.f32.mrf.mxu2 }
 0x2d4   : > { %1117 = vmatpush.msrb.mxu3 %v1068_v22  ;;  %v1268_v22 = vld [vmem:[#allocation2 + $0x818] sm:$0xff] }
 0x2d6   : > { %1118 = vmatpush.msrb.mxu3 %v1067_v23  ;;  %v1267_v23 = vld [vmem:[#allocation2 + $0x810] sm:$0xff] }
 0x2d7   : > { %1119 = vmatmul.f32.vlgmr.msrb.gmra.mxu3 %v3489_v55 }
 0x2d8   : > { %1297 = vmatpush.msra.mxu3 %v1280_v8 }
 0x2da   : > { %1298 = vmatpush.msra.mxu3 %v1279_v10  ;;  %v2964_v10 = vld [vmem:[%s4137_s7 + $0x38] sm:$0xff] }
 0x2dc   : > { %1299 = vmatpush.msra.mxu3 %v1278_v11 }
 0x2de   : > { %1300 = vmatpush.msra.mxu3 %v1277_v12  ;;  %v3001_v12 = vld [vmem:[%s4134_s4 + $0x80] sm:$0xff] }
 0x2e0   : > { %1301 = vmatpush.msra.mxu3 %v1276_v13  ;;  %v3002_v13 = vld [vmem:[%s4134_s4 + $0x88] sm:$0xff] }
 0x2e2   : > { %1302 = vmatpush.msra.mxu3 %v1275_v14 }
 0x2e4   : > { %1303 = vmatpush.msra.mxu3 %v1274_v15 }
 0x2e6   : > { %1304 = vmatpush.msra.mxu3 %v1273_v16 }
 0x2e8   : > { %1305 = vmatpush.msra.mxu3 %v1272_v17 }
 0x33a   : > { %v3573_v33 = vpop.f32.mrf.mxu3 }
 0x342   : > { %v3575_v41 = vpop.f32.mrf.mxu3 }
 0x35a   : > { %v1120_v46 = vpop.f32.mrf.mxu3 }
 0x35b   : > { %v1121_v47 = vadd.f32 %v1120_v46, %v1100_v44  ;;  %v1289_v44 = vld [vmem:[#allocation2 + $0x8c0] sm:$0xff]  ;;  %v1288_v46 = vld [vmem:[#allocation2 + $0x8b8] sm:$0xff] }
 0x35d   : > { %1147 = vmatpush.msra.mxu0 %v1121_v47  ;;  %v1287_v47 = vld [vmem:[#allocation2 + $0x8b0] sm:$0xff] }
 0x35e   : > { %2995 = vmatmul.msk.f32.vlgmr.msra.gmra.mxu0 %vm563_vm0, %v2993_v48  ;;  %v1286_v48 = vld [vmem:[#allocation2 + $0x8a8] sm:$0xff] }
 0x35f   : > { %1210 = vmatpush.msrb.mxu0 %v1189_v49  ;;  %v1285_v49 = vld [vmem:[#allocation2 + $0x8a0] sm:$0xff] }
 0x361   : > { %1211 = vmatpush.msrb.mxu0 %v1188_v51  ;;  %v1284_v51 = vld [vmem:[#allocation2 + $0x898] sm:$0xff] }
 0x363   : > { %1212 = vmatpush.msrb.mxu0 %v1187_v52  ;;  %v1283_v52 = vld [vmem:[#allocation2 + $0x890] sm:$0xff] }
 0x365   : > { %1213 = vmatpush.msrb.mxu0 %v1186_v56  ;;  %v1282_v56 = vld [vmem:[#allocation2 + $0x888] sm:$0xff] }
 0x366   : > { %2996 = vmatmul.msk.f32.gmra.mxu0 %vm563_vm0, %v2994_v54  ;;  %v1281_v54 = vld [vmem:[#allocation2 + $0x880] sm:$0xff] }
 0x367   : > { %1214 = vmatpush.msrb.mxu0 %v1185_v58  ;;  %v3185_v58 = vld [vmem:[%s3483_s19 + $0x8] sm:$0xff] }
 0x369   : > { %1215 = vmatpush.msrb.mxu0 %v1184_v60  ;;  %v394_v60 = vld [vmem:[%s4137_s7 + $0x8] sm:$0xff] }
 0x36b   : > { %1216 = vmatpush.msrb.mxu0 %v1183_v61  ;;  %v3363_v61 = vmov 0  }
 0x36c   : > { %3157 = vset.pattern.permute.xlu0 %v3363_v61  ;;  %3158 = vset.pattern.permute.xlu1 %v3363_v61 }
 0x36d   : > { %1217 = vmatpush.msrb.mxu0 %v1182_v62  ;;  %1378 = vperm.xlu0 %3157, %v394_v60   ;;  %v393_v62 = vld [vmem:[%s4137_s7] sm:$0xff]  ;;  %v3677_v60 = vld [vmem:[#allocation4 + $0x78] sm:$0xff] }
 0x36e   : > { %3159 = vset.pattern.permute.xlu2 %v3363_v61 }
 0x36f   : > { %1218 = vmatpush.msrb.mxu0 %v1181_v63  ;;  %v617_v63 = vadd.f32 %v3529_v53, %v3514_v9  ;;  %v2959_v9 = vld [vmem:[%s4137_s7 + $0x10] sm:$0xff] }
 0x371   : > { %1219 = vmatpush.msrb.mxu0 %v1180_v0  ;;  %v727_v0 = vadd.f32 %v3533_v59, %v617_v63  ;;  %v3683_v63 = vld [vmem:[#allocation4 + $0x70] sm:$0xff] }
 0x373   : > { %1220 = vmatpush.msrb.mxu0 %v1179_v1  ;;  %v834_v1 = vadd.f32 %v3555_v39, %v727_v0 }
 0x375   : > { %1221 = vmatpush.msrb.mxu0 %v1178_v3  ;;  %1373 = vperm.xlu0 %3157, %v393_v62   ;;  %v941_v3 = vadd.f32 %v3559_v45, %v834_v1  ;;  %v3681_v62 = vld [vmem:[#allocation4 + $0x30] sm:$0xff]  ;;  %v3687_v1 = vld [vmem:[#allocation4 + $0x28] sm:$0xff] }
 0x377   : > { %1222 = vmatpush.msrb.mxu0 %v1177_v4  ;;  %v620_v4 = vadd.f32 %v3531_v57, %v3516_v20  ;;  %v2962_v20 = vld [vmem:[%s4137_s7 + $0x28] sm:$0xff] }
 0x379   : > { %1223 = vmatpush.msrb.mxu0 %v1176_v5  ;;  %v1048_v5 = vadd.f32 %v3573_v33, %v941_v3  ;;  %v3689_v3 = vld [vmem:[#allocation4 + $0x68] sm:$0xff] }
 0x37b   : > { %1224 = vmatpush.msrb.mxu0 %v1175_v6  ;;  %v728_v6 = vadd.f32 %v3535_v2, %v620_v4 }
 0x37d   : > { %1225 = vmatpush.msrb.mxu0 %v1174_v7  ;;  %v835_v53 = vadd.f32 %v3557_v40, %v728_v6  ;;  %1483 = vperm.xlu0 %3157, %v2959_v9   ;;  %v2963_v40 = vld [vmem:[%s4137_s7 + $0x30] sm:$0xff]  ;;  %v3695_v6 = vld [vmem:[#allocation4 + $0x60] sm:$0xff]  ;;  %v3699_v9 = vld [vmem:[#allocation4 + $0x18] sm:$0xff] }
 0x37e   : > { %1226 = vmatmul.f32.vlgmr.msrb.gmra.mxu0 %v3489_v55  ;;  %v1271_v55 = vld [vmem:[#allocation2 + $0x830] sm:$0xff] }
 0x37f   : > { %1306 = vmatpush.msra.mxu3 %v1271_v55  ;;  %v942_v39 = vadd.f32 %v3561_v50, %v835_v53  ;;  %v3701_v53 = vld [vmem:[#allocation4 + $0x58] sm:$0xff] }
 0x381   : > { %1307 = vmatpush.msra.mxu3 %v1270_v19  ;;  %v1049_v45 = vadd.f32 %v3575_v41, %v942_v39 }
 0x383   : > { %1308 = vmatpush.msra.mxu3 %v1269_v21 }
 0x385   : > { %1309 = vmatpush.msra.mxu3 %v1268_v22  ;;  %1500 = vperm.xlu0 %3157, %v2962_v20   ;;  %v3646_v22 = vld [vmem:[#allocation6] sm:$0xff]  ;;  %v3707_v20 = vld [vmem:[#allocation4 + $0x50] sm:$0xff] }
 0x387   : > { %1310 = vmatpush.msra.mxu3 %v1267_v23  ;;  %v3651_v23 = vld [vmem:[#allocation6 + $0x8] sm:$0xff] }
 0x389   : > { %1311 = vmatpush.msra.mxu3 %v1266_v25 }
 0x38b   : > { %1312 = vmatpush.msra.mxu3 %v1265_v26 }
 0x38c   : > { %1313 = vmatmul.f32.vlgmr.msra.gmra.mxu3 %v3184_v28 }
 0x38d   : > { %2146 = vperm.xlu0 %3157, %v2964_v10   ;;  %1601 = vmatpush.msrb.mxu3 %v3677_v60  ;;  %v3711_v10 = vld [vmem:[#allocation4 + $0x8] sm:$0xff] }
 0x38f   : > { %1602 = vmatpush.msrb.mxu3 %v3683_v63 }
 0x391   : > { %1603 = vmatpush.msrb.mxu3 %v3689_v3 }
 0x393   : > { %1604 = vmatpush.msrb.mxu3 %v3695_v6 }
 0x395   : > { %2141 = vperm.xlu0 %3157, %v2963_v40   ;;  %1605 = vmatpush.msrb.mxu3 %v3701_v53  ;;  %v3713_v40 = vld [vmem:[#allocation4 + $0x48] sm:$0xff] }
 0x397   : > { %1606 = vmatpush.msrb.mxu3 %v3707_v20 }
 0x399   : > { %1607 = vmatpush.msrb.mxu3 %v3713_v40 }
 0x3db   : > { %v3587_v18 = vpop.f32.mrf.mxu0 }
 0x3dc   : > { %v1155_v7 = vadd.f32 %v3587_v18, %v1048_v5  ;;  %v3693_v5 = vld [vmem:[#allocation4 + $0x20] sm:$0xff] }
 0x3df   : > { %v1379_v15 = vpop.permute.xlu0 %1378 }
 0x3e3   : > { %v3589_v24 = vpop.f32.mrf.mxu0 }
 0x3e4   : > { %v1156_v57 = vadd.f32 %v3589_v24, %v1049_v45  ;;  %v3705_v45 = vld [vmem:[#allocation4 + $0x10] sm:$0xff] }
 0x3e7   : > { %v1374_v19 = vpop.permute.xlu0 %1373 }
 0x3fb   : > { %v1227_v29 = vpop.f32.mrf.mxu0 }
 0x3fc   : > { %v1228_v30 = vadd.f32 %v1227_v29, %v1207_v27 }
 0x3fe   : > { %1254 = vmatpush.msrb.mxu1 %v1228_v30 }
 0x3ff   : > { %2999 = vmatmul.msk.f32.vlgmr.msrb.gmra.mxu1 %vm563_vm0, %v2997_v31 }
 0x400   : > { %1317 = vmatpush.msra.mxu1 %v1296_v32 }
 0x402   : > { %1318 = vmatpush.msra.mxu1 %v1295_v34 }
 0x404   : > { %1319 = vmatpush.msra.mxu1 %v1294_v35 }
 0x406   : > { %1320 = vmatpush.msra.mxu1 %v1293_v36 }
 0x407   : > { %3000 = vmatmul.msk.f32.gmra.mxu1 %vm563_vm0, %v2998_v37  ;;  %v2961_v37 = vld [vmem:[%s4137_s7 + $0x20] sm:$0xff] }
 0x408   : > { %1321 = vmatpush.msra.mxu1 %v1292_v38 }
 0x40a   : > { %1322 = vmatpush.msra.mxu1 %v1291_v42 }
 0x40c   : > { %1323 = vmatpush.msra.mxu1 %v1290_v43 }
 0x40e   : > { %1324 = vmatpush.msra.mxu1 %v1289_v44 }
 0x40f   : > { %v1314_v50 = vpop.f32.mrf.mxu3 }
 0x410   : > { %1325 = vmatpush.msra.mxu1 %v1288_v46  ;;  %v2960_v46 = vld [vmem:[%s4137_s7 + $0x18] sm:$0xff] }
 0x412   : > { %1326 = vmatpush.msra.mxu1 %v1287_v47 }
 0x414   : > { %1327 = vmatpush.msra.mxu1 %v1286_v48 }
 0x416   : > { %1328 = vmatpush.msra.mxu1 %v1285_v49 }
 0x418   : > { %1329 = vmatpush.msra.mxu1 %v1284_v51 }
 0x41a   : > { %1330 = vmatpush.msra.mxu1 %v1283_v52 }
 0x41c   : > { %1331 = vmatpush.msra.mxu1 %v1282_v56 }
 0x41e   : > { %1332 = vmatpush.msra.mxu1 %v1281_v54 }
 0x41f   : > { %1333 = vmatmul.f32.vlgmr.msra.gmra.mxu1 %v3185_v58  ;;  %v3675_v58 = vld [vmem:[#allocation4 + $0x38] sm:$0xff] }
 0x47c   : > { %v1256_v8 = vpop.f32.mrf.mxu1 }
 0x47d   : > { %v1262_v59 = vadd.f32 %v1256_v8, %v1155_v7 }
 0x484   : > { %v1259_v2 = vpop.f32.mrf.mxu1 }
 0x485   : > { %v1263_v33 = vadd.f32 %v1259_v2, %v1156_v57 }
 0x49c   : > { %v1334_v41 = vpop.f32.mrf.mxu1 }
 0x49d   : > { %v1335_v11 = vadd.f32 %v1334_v41, %v1314_v50  ;;  %v1484_v50 = vpop.permute.xlu0 %1483 }
 0x49f   : > { %1361 = vmatpush.msra.mxu2 %v1335_v11 }
 0x4a0   : > { %3003 = vmatmul.msk.f32.vlgmr.msra.gmra.mxu2 %vm563_vm0, %v3001_v12 }
 0x4a8   : > { %3004 = vmatmul.msk.f32.gmra.mxu2 %vm563_vm0, %v3002_v13  ;;  %v3717_v13 = vld [vmem:[#allocation4] sm:$0xff] }
 0x523   : > { %v1363_v14 = vpop.f32.mrf.mxu2 }
 0x524   : > { %v1369_v17 = vadd.f32 %v1363_v14, %v1262_v59  ;;  %v3719_v14 = vld [vmem:[#allocation4 + $0x40] sm:$0xff] }
 0x525   : > { %1608 = vmatpush.msrb.mxu3 %v3719_v14 }
 0x526   : > { %v3643_v21 = vadd.f32 %v1374_v19, %v1369_v17  ;;  %v3725_v17 = vld [vmem:[#allocation4 + $0xb8] sm:$0xff] }
 0x528   : > { %4165 = vst [vmem:[#allocation14_spill] sm:$0xff] %v3643_v21 }
 0x52b   : > { %v1366_v16 = vpop.f32.mrf.mxu2 }
 0x52c   : > { %v1370_v18 = vadd.f32 %v1366_v16, %v1263_v33 }
 0x52e   : > { %v3641_v55 = vadd.f32 %v1379_v15, %v1370_v18  ;;  %v3727_v18 = vld [vmem:[#allocation4 + $0xf8] sm:$0xff] }
 0x52f   : > { %1760 = vmatpush.msra.mxu3 %v3727_v18 }
 0x530   : > { %4164 = vst [vmem:[#allocation13_spill] sm:$0xff] %v3641_v55  ;;  %1404 = vmatpush.msra.mxu0 %v3641_v55 }
 0x532   : > { %1405 = vmatpush.msra.mxu0 %v3643_v21 }
 0x533   : > { %3005 = vmatmul.msk.f32.vlgmr.msra.gmra.mxu0 %vm1383_vm1, %v3646_v22 }
 0x534   : > { %1567 = vmatpush.msrb.mxu0 %v3675_v58 }
 0x536   : > { %1568 = vmatpush.msrb.mxu0 %v3681_v62 }
 0x538   : > { %1569 = vmatpush.msrb.mxu0 %v3687_v1 }
 0x53a   : > { %1570 = vmatpush.msrb.mxu0 %v3693_v5 }
 0x53b   : > { %3006 = vmatmul.msk.f32.gmra.mxu0 %vm1383_vm1, %v3651_v23 }
 0x53c   : > { %1571 = vmatpush.msrb.mxu0 %v3699_v9 }
 0x53e   : > { %1572 = vmatpush.msrb.mxu0 %v3705_v45 }
 0x540   : > { %1573 = vmatpush.msrb.mxu0 %v3711_v10 }
 0x542   : > { %1574 = vmatpush.msrb.mxu0 %v3717_v13 }
 0x544   : > { %1694 = vmatpush.msra.mxu0 %v3725_v17 }
 0x5b0   : > { %v1407_v24 = vpop.f32.mrf.mxu0 }
 0x5b1   : > { %v1414_v27 = vsel %vm1413_vm2, %v1407_v24, 0.0 }
 0x5b8   : > { %v1410_v25 = vpop.f32.mrf.mxu0 }
 0x5b9   : > { %v1417_v26 = vsel %vm1413_vm2, %v1410_v25, 0.0  ;;  %v3732_v25 = vld [vmem:[#allocation4 + $0xb0] sm:$0xff] }
 0x5ba   : > { %1418 = vadd.xlane.f32.xlu1 %v1417_v26  ;;  %v3734_v26 = vld [vmem:[#allocation4 + $0xf0] sm:$0xff]  ;;  %1695 = vmatpush.msra.mxu0 %v3732_v25 }
 0x5bb   : > { %1761 = vmatpush.msra.mxu3 %v3734_v26 }
 0x5c2   : > { %1415 = vadd.xlane.f32.xlu1 %v1414_v27 }
 0x5db   : > { %1495 = vperm.xlu1 %3158, %v2961_v37   ;;  %v1501_v37 = vpop.permute.xlu0 %1500 }
 0x62d   : > { %v1419_v28 = vpop.xlane.xlu1 %1418 }
 0x62e   : > { %v1421_v29 = vmul.f32 0.0078125, %v1419_v28 }
 0x630   : > { %v3658_v30 = vsub.f32 %v3641_v55, %v1421_v29  ;;  %v3876_v55 = vld [vmem:[#allocation4 + $0x190] sm:$0xff] }
 0x632   : > { %v1425_v31 = vmul.f32 %v3658_v30, %v3658_v30 }
 0x634   : > { %1440 = vmatpush.msrb.mxu2 %v1425_v31  ;;  %v3739_v31 = vld [vmem:[#allocation4 + $0xa8] sm:$0xff] }
 0x635   : > { %v1416_v32 = vpop.xlane.xlu1 %1415  ;;  %1696 = vmatpush.msra.mxu0 %v3739_v31 }
 0x636   : > { %v1420_v34 = vmul.f32 0.0078125, %v1416_v32  ;;  %v3741_v32 = vld [vmem:[#allocation4 + $0xe8] sm:$0xff] }
 0x637   : > { %1762 = vmatpush.msra.mxu3 %v3741_v32 }
 0x638   : > { %v1422_v35 = vsub.f32 %v3643_v21, %v1420_v34  ;;  %v3878_v21 = vld [vmem:[#allocation4 + $0x1d0] sm:$0xff] }
 0x639   : > { %4184 = vst [vmem:[#allocation33_spill] sm:$0xff] %v3878_v21 }
 0x63a   : > { %v1424_v36 = vmul.f32 %v1422_v35, %v1422_v35 }
 0x63c   : > { %1441 = vmatpush.msrb.mxu2 %v1424_v36  ;;  %v3747_v36 = vld [vmem:[#allocation4 + $0xe0] sm:$0xff] }
 0x63d   : > { %3007 = vmatmul.msk.f32.vlgmr.msrb.gmra.mxu2 %vm1383_vm1, %v3646_v22  ;;  %4166 = vst [vmem:[#allocation15_spill] sm:$0xff] %v3747_v36  ;;  %1763 = vmatpush.msra.mxu3 %v3747_v36 }
 0x645   : > { %3008 = vmatmul.msk.f32.gmra.mxu2 %vm1383_vm1, %v3651_v23 }
 0x64d   : > { %v1496_v11 = vpop.permute.xlu1 %1495 }
 0x6c0   : > { %v1443_v38 = vpop.f32.mrf.mxu2 }
 0x6c1   : > { %v1449_v42 = vsel %vm1413_vm2, %v1443_v38, 0.0 }
 0x6c2   : > { %1450 = vadd.xlane.f32.xlu2 %v1449_v42  ;;  %v3755_v42 = vld [vmem:[#allocation4 + $0xd8] sm:$0xff] }
 0x6c3   : > { %4167 = vst [vmem:[#allocation16_spill] sm:$0xff] %v3755_v42  ;;  %1764 = vmatpush.msra.mxu3 %v3755_v42 }
 0x6c8   : > { %v1446_v43 = vpop.f32.mrf.mxu2 }
 0x6c9   : > { %v1452_v44 = vsel %vm1413_vm2, %v1446_v43, 0.0  ;;  %v3757_v43 = vld [vmem:[#allocation4 + $0x90] sm:$0xff] }
 0x6ca   : > { %1453 = vadd.xlane.f32.xlu2 %v1452_v44  ;;  %v3761_v44 = vld [vmem:[#allocation4 + $0xd0] sm:$0xff] }
 0x6cb   : > { %4168 = vst [vmem:[#allocation17_spill] sm:$0xff] %v3761_v44  ;;  %1765 = vmatpush.msra.mxu3 %v3761_v44 }
 0x6e2   : > { %1488 = vperm.xlu2 %3159, %v2960_v46  }
 0x735   : > { %v1451_v47 = vpop.xlane.xlu2 %1450 }
 0x736   : > { %v1455_v48 = vmul.f32 0.0078125, %v1451_v47 }
 0x738   : > { %v1457_v49 = vadd.f32 1e-06, %v1455_v48  ;;  %v3764_v48 = vld [vmem:[#allocation4 + $0x88] sm:$0xff] }
 0x73a   : > { %3160 = vrsqrt.f32 %v1457_v49  ;;  %vm1465_vm4 = vweird.f32 %v1457_v49 }
 0x73d   : > { %v1454_v51 = vpop.xlane.xlu2 %1453 }
 0x73e   : > { %v1456_v52 = vmul.f32 0.0078125, %v1454_v51 }
 0x740   : > { %v3161_v56 = vpop.eup %3160  ;;  %v1458_v54 = vadd.f32 1e-06, %v1456_v52  ;;  %v3770_v52 = vld [vmem:[#allocation4 + $0x80] sm:$0xff] }
 0x741   : > { %v1460_v61 = vmul.f32 %v3161_v56, %v1457_v49  ;;  %vm1466_vm3 = vweird.f32 %v3161_v56  ;;  %v3766_v49 = vld [vmem:[#allocation4 + $0xc8] sm:$0xff] }
 0x742   : > { %3162 = vrsqrt.f32 %v1458_v54  ;;  %vm1467_vm5 = vmor %vm1465_vm4, %vm1466_vm3  ;;  %vm1475_vm7 = vweird.f32 %v1458_v54  ;;  %4169 = vst [vmem:[#allocation18_spill] sm:$0xff] %v3766_v49  ;;  %1766 = vmatpush.msra.mxu3 %v3766_v49 }
 0x743   : > { %v1461_v0 = vmul.f32 %v3161_v56, %v1460_v61 }
 0x745   : > { %v1462_v4 = vmul.f32 0.5, %v1461_v0  ;;  %v1489_v28 = vpop.permute.xlu2 %1488 }
 0x747   : > { %v1463_v7 = vsub.f32 1.5, %v1462_v4 }
 0x748   : > { %v3163_v8 = vpop.eup %3162 }
 0x749   : > { %v1470_v59 = vmul.f32 %v3163_v8, %v1458_v54  ;;  %v1464_v39 = vmul.f32 %v3161_v56, %v1463_v7  ;;  %vm1476_vm6 = vweird.f32 %v3163_v8 }
 0x74a   : > { %vm1477_vm8 = vmor %vm1475_vm7, %vm1476_vm6 }
 0x74b   : > { %v1471_v57 = vmul.f32 %v3163_v8, %v1470_v59  ;;  %v1468_v2 = vsel %vm1467_vm5, %v3161_v56, %v1464_v39  ;;  %v3772_v56 = vld [vmem:[#allocation4 + $0xc0] sm:$0xff] }
 0x74c   : > { %v1479_v33 = vmul.f32 %v1468_v2, %v1422_v35  ;;  %v3745_v35 = vld [vmem:[#allocation4 + $0xa0] sm:$0xff]  ;;  %4170 = vst [vmem:[#allocation19_spill] sm:$0xff] %v3772_v56  ;;  %1767 = vmatpush.msra.mxu3 %v3772_v56 }
 0x74d   : > { %v1472_v41 = vmul.f32 0.5, %v1471_v57  ;;  %1697 = vmatpush.msra.mxu0 %v3745_v35 }
 0x74e   : > { %v1491_v12 = vmul.f32 %v1484_v50, %v1479_v33 }
 0x74f   : > { %v1473_v15 = vsub.f32 1.5, %v1472_v41 }
 0x750   : > { %v3723_v16 = vadd.f32 %v1496_v11, %v1491_v12 }
 0x751   : > { %v1474_v19 = vmul.f32 %v3163_v8, %v1473_v15 }
 0x752   : > { %v3009_v24 = vmul.f32 -1.442695, %v3723_v16 }
 0x753   : > { %v1478_v27 = vsel %vm1477_vm8, %v3163_v8, %v1474_v19  ;;  %v3781_v19 = vld [vmem:[#allocation4 + $0x138] sm:$0xff] }
 0x754   : > { %3164 = vpow2.f32 %v3009_v24  ;;  %v1480_v29 = vmul.f32 %v1478_v27, %v3658_v30  ;;  %v3753_v30 = vld [vmem:[#allocation4 + $0x98] sm:$0xff] }
 0x755   : > { %1698 = vmatpush.msra.mxu0 %v3753_v30  ;;  %v3783_v24 = vld [vmem:[#allocation4 + $0x178] sm:$0xff] }
 0x756   : > { %v1492_v34 = vmul.f32 %v1489_v28, %v1480_v29  ;;  %4171 = vst [vmem:[#allocation20_spill] sm:$0xff] %v3783_v24 }
 0x757   : > { %1699 = vmatpush.msra.mxu0 %v3757_v43 }
 0x758   : > { %v3751_v38 = vadd.f32 %v1501_v37, %v1492_v34  ;;  %v3789_v34 = vld [vmem:[#allocation4 + $0x130] sm:$0xff] }
 0x759   : > { %1700 = vmatpush.msra.mxu0 %v3764_v48  ;;  %v3791_v37 = vld [vmem:[#allocation4 + $0x170] sm:$0xff] }
 0x75a   : > { %v3165_v46 = vpop.eup %3164  ;;  %v3010_v47 = vmul.f32 -1.442695, %v3751_v38  ;;  %4172 = vst [vmem:[#allocation21_spill] sm:$0xff] %v3791_v37 }
 0x75b   : > { %v1511_v51 = vadd.f32 1.0, %v3165_v46  ;;  %1701 = vmatpush.msra.mxu0 %v3770_v52  ;;  %v3795_v46 = vld [vmem:[#allocation4 + $0x128] sm:$0xff] }
 0x75c   : > { %3166 = vpow2.f32 %v3010_v47  ;;  %v3797_v47 = vld [vmem:[#allocation4 + $0x168] sm:$0xff] }
 0x75d   : > { %3168 = vrcp.f32 %v1511_v51  ;;  %v1524_v8 = vand.u32 2147483648, %v1511_v51  ;;  %v1522_v39 = vand.u32 2147483647, %v1511_v51  ;;  %vm1518_vm10 = vweird.f32 %v1511_v51  ;;  %4173 = vst [vmem:[#allocation22_spill] sm:$0xff] %v3797_v47 }
 0x75f   : > { %v1525_v33 = vor.u32 1.1754944e-38, %v1524_v8  ;;  %vm1523_vm12 = vcmp.eq.f32.partialorder %v1522_v39, 8.507059e+37  ;;  %v3810_v8 = vld [vmem:[#allocation4 + $0x118] sm:$0xff]  ;;  %v3820_v39 = vld [vmem:[#allocation4 + $0x110] sm:$0xff] }
 0x762   : > { %v3167_v54 = vpop.eup %3166 }
 0x763   : > { %v3169_v61 = vpop.eup %3168  ;;  %v1512_v0 = vadd.f32 1.0, %v3167_v54 }
 0x764   : > { %v1514_v4 = vmul.f32 %v3169_v61, %v1511_v51  ;;  %vm1519_vm9 = vweird.f32 %v3169_v61 }
 0x765   : > { %3170 = vrcp.f32 %v1512_v0  ;;  %vm1520_vm11 = vmor %vm1518_vm10, %vm1519_vm9  ;;  %v1539_v27 = vand.u32 2147483648, %v1512_v0  ;;  %v1537_v29 = vand.u32 2147483647, %v1512_v0  ;;  %vm1533_vm14 = vweird.f32 %v1512_v0 }
 0x766   : > { %v1515_v7 = vsub.f32 1.0, %v1514_v4  ;;  %v3803_v4 = vld [vmem:[#allocation4 + $0x160] sm:$0xff] }
 0x767   : > { %v1540_v51 = vor.u32 1.1754944e-38, %v1539_v27  ;;  %vm1538_vm0 = vcmp.eq.f32.partialorder %v1537_v29, 8.507059e+37  ;;  %4174 = vst [vmem:[#allocation23_spill] sm:$0xff] %v3803_v4  ;;  %v3850_v27 = vld [vmem:[#allocation4 + $0x1f0] sm:$0xff]  ;;  %v3856_v29 = vld [vmem:[#allocation4 + $0x1e8] sm:$0xff] }
 0x768   : > { %v1516_v59 = vmul.f32 %v3169_v61, %v1515_v7  ;;  %4180 = vst [vmem:[#allocation29_spill] sm:$0xff] %v3850_v27 }
 0x769   : > { %4181 = vst [vmem:[#allocation30_spill] sm:$0xff] %v3856_v29 }
 0x76a   : > { %v1517_v57 = vadd.f32 %v3169_v61, %v1516_v59  ;;  %v3812_v59 = vld [vmem:[#allocation4 + $0x158] sm:$0xff] }
 0x76b   : > { %v3171_v2 = vpop.eup %3170  ;;  %4175 = vst [vmem:[#allocation24_spill] sm:$0xff] %v3812_v59 }
 0x76c   : > { %v1521_v50 = vsel %vm1520_vm11, %v3169_v61, %v1517_v57  ;;  %v1529_v41 = vmul.f32 %v3171_v2, %v1512_v0  ;;  %vm1534_vm13 = vweird.f32 %v3171_v2  ;;  %v3801_v61 = vld [vmem:[#allocation4 + $0x120] sm:$0xff]  ;;  %v3822_v57 = vld [vmem:[#allocation4 + $0x150] sm:$0xff] }
 0x76d   : > { %v1526_v11 = vsel %vm1523_vm12, %v1525_v33, %v1521_v50  ;;  %vm1535_vm15 = vmor %vm1533_vm14, %vm1534_vm13  ;;  %4176 = vst [vmem:[#allocation25_spill] sm:$0xff] %v3822_v57  ;;  %v3832_v33 = vld [vmem:[#allocation4 + $0x100] sm:$0xff] }
 0x76e   : > { %v3779_v12 = vmul.f32 %v1526_v11, %v3723_v16  ;;  %v1530_v15 = vsub.f32 1.0, %v1529_v41  ;;  %v3834_v50 = vld [vmem:[#allocation4 + $0x140] sm:$0xff]  ;;  %v3838_v41 = vld [vmem:[#allocation4 + $0x1b8] sm:$0xff] }
 0x76f   : > { %4178 = vst [vmem:[#allocation27_spill] sm:$0xff] %v3834_v50  ;;  %v3840_v11 = vld [vmem:[#allocation4 + $0x1f8] sm:$0xff] }
 0x770   : > { %v1531_v28 = vmul.f32 %v3171_v2, %v1530_v15  ;;  %3011 = vmatmul.msk.f32.vlgmr.msrb.gmra.mxu0 %vm1413_vm2, %v3779_v12  ;;  %3013 = vmatmul.msk.f32.vlgmr.msrb.gmra.mxu3 %vm1413_vm2, %v3779_v12  ;;  %4179 = vst [vmem:[#allocation28_spill] sm:$0xff] %v3840_v11  ;;  %v3848_v15 = vld [vmem:[#allocation4 + $0x1b0] sm:$0xff] }
 0x771   : > { %1826 = vmatpush.msrb.mxu0 %v3781_v19  ;;  %1892 = vmatpush.msrb.mxu3 %v3783_v24 }
 0x772   : > { %v1532_v16 = vadd.f32 %v3171_v2, %v1531_v28  ;;  %v3854_v28 = vld [vmem:[#allocation4 + $0x1a8] sm:$0xff] }
 0x773   : > { %1827 = vmatpush.msrb.mxu0 %v3789_v34  ;;  %1893 = vmatpush.msrb.mxu3 %v3791_v37 }
 0x774   : > { %v1536_v54 = vsel %vm1535_vm15, %v3171_v2, %v1532_v16  ;;  %v3828_v2 = vld [vmem:[#allocation4 + $0x148] sm:$0xff]  ;;  %v3860_v16 = vld [vmem:[#allocation4 + $0x1a0] sm:$0xff] }
 0x775   : > { %v1541_v7 = vsel %vm1538_vm0, %v1540_v51, %v1536_v54  ;;  %1828 = vmatpush.msrb.mxu0 %v3795_v46  ;;  %1894 = vmatpush.msrb.mxu3 %v3797_v47  ;;  %4177 = vst [vmem:[#allocation26_spill] sm:$0xff] %v3828_v2  ;;  %v3862_v51 = vld [vmem:[#allocation4 + $0x1e0] sm:$0xff]  ;;  %v3866_v54 = vld [vmem:[#allocation4 + $0x198] sm:$0xff] }
 0x776   : > { %v3808_v0 = vmul.f32 %v1541_v7, %v3751_v38  ;;  %v3826_v38 = vld [vmem:[#allocation4 + $0x108] sm:$0xff]  ;;  %4182 = vst [vmem:[#allocation31_spill] sm:$0xff] %v3862_v51  ;;  %v3868_v7 = vld [vmem:[#allocation4 + $0x1d8] sm:$0xff] }
 0x777   : > { %1829 = vmatpush.msrb.mxu0 %v3801_v61  ;;  %1895 = vmatpush.msrb.mxu3 %v3803_v4  ;;  %4183 = vst [vmem:[#allocation32_spill] sm:$0xff] %v3868_v7 }
 0x778   : > { %3012 = vmatmul.msk.f32.gmra.mxu0 %vm1413_vm2, %v3808_v0  ;;  %3014 = vmatmul.msk.f32.gmra.mxu3 %vm1413_vm2, %v3808_v0 }
 0x779   : > { %1830 = vmatpush.msrb.mxu0 %v3810_v8  ;;  %1896 = vmatpush.msrb.mxu3 %v3812_v59  ;;  %v3924_v59 = vld [vmem:[#allocation4 + $0x200] sm:$0xff] }
 0x77b   : > { %1831 = vmatpush.msrb.mxu0 %v3820_v39  ;;  %1897 = vmatpush.msrb.mxu3 %v3822_v57  ;;  %v3921_v57 = vld [vmem:[#allocation4 + $0x208] sm:$0xff] }
 0x77d   : > { %1832 = vmatpush.msrb.mxu0 %v3826_v38  ;;  %1898 = vmatpush.msrb.mxu3 %v3828_v2  ;;  %v3911_v2 = vld [vmem:[#allocation4 + $0x218] sm:$0xff] }
 0x77f   : > { %1833 = vmatpush.msrb.mxu0 %v3832_v33  ;;  %1899 = vmatpush.msrb.mxu3 %v3834_v50  ;;  %v3894_v50 = vld [vmem:[#allocation4 + $0x238] sm:$0xff] }
 0x780   : > { %3019 = vmatmul.msk.f32.vlgmr.msra.gmra.mxu0 %vm1413_vm2, %v3779_v12  ;;  %3023 = vmatmul.msk.f32.vlgmr.msra.gmra.mxu3 %vm1413_vm2, %v3779_v12 }
 0x781   : > { %1958 = vmatpush.msra.mxu0 %v3838_v41  ;;  %2024 = vmatpush.msra.mxu3 %v3840_v11  ;;  %v3890_v11 = vld [vmem:[#allocation4 + $0x1c0] sm:$0xff] }
 0x782   : > { %4186 = vst [vmem:[#allocation35_spill] sm:$0xff] %v3890_v11 }
 0x783   : > { %1959 = vmatpush.msra.mxu0 %v3848_v15  ;;  %2025 = vmatpush.msra.mxu3 %v3850_v27  ;;  %v3884_v27 = vld [vmem:[#allocation4 + $0x1c8] sm:$0xff] }
 0x784   : > { %4185 = vst [vmem:[#allocation34_spill] sm:$0xff] %v3884_v27 }
 0x785   : > { %1960 = vmatpush.msra.mxu0 %v3854_v28  ;;  %2026 = vmatpush.msra.mxu3 %v3856_v29  ;;  %v3882_v29 = vld [vmem:[#allocation4 + $0x188] sm:$0xff] }
 0x787   : > { %1961 = vmatpush.msra.mxu0 %v3860_v16  ;;  %2027 = vmatpush.msra.mxu3 %v3862_v51  ;;  %v3888_v51 = vld [vmem:[#allocation4 + $0x180] sm:$0xff] }
 0x788   : > { %3020 = vmatmul.msk.f32.gmra.mxu0 %vm1413_vm2, %v3808_v0  ;;  %3024 = vmatmul.msk.f32.gmra.mxu3 %vm1413_vm2, %v3808_v0 }
 0x789   : > { %1962 = vmatpush.msra.mxu0 %v3866_v54  ;;  %2028 = vmatpush.msra.mxu3 %v3868_v7  ;;  %v3905_v7 = vld [vmem:[#allocation4 + $0x228] sm:$0xff] }
 0x78b   : > { %1963 = vmatpush.msra.mxu0 %v3876_v55  ;;  %2029 = vmatpush.msra.mxu3 %v3878_v21  ;;  %v3902_v21 = vld [vmem:[#allocation4 + $0x230] sm:$0xff] }
 0x78d   : > { %1964 = vmatpush.msra.mxu0 %v3882_v29  ;;  %2030 = vmatpush.msra.mxu3 %v3884_v27  ;;  %v3908_v27 = vld [vmem:[#allocation4 + $0x220] sm:$0xff] }
 0x78f   : > { %1965 = vmatpush.msra.mxu0 %v3888_v51  ;;  %2031 = vmatpush.msra.mxu3 %v3890_v11  ;;  %v3918_v11 = vld [vmem:[#allocation4 + $0x210] sm:$0xff] }
 0x790   : > { %3027 = vmatmul.msk.f32.vlgmr.msrb.gmra.mxu0 %vm1413_vm2, %v3779_v12  ;;  %3031 = vmatmul.msk.f32.vlgmr.msrb.gmra.mxu3 %vm1413_vm2, %v3779_v12 }
 0x791   : > { %2090 = vmatpush.msrb.mxu0 %v3894_v50 }
 0x793   : > { %2091 = vmatpush.msrb.mxu0 %v3902_v21 }
 0x795   : > { %2092 = vmatpush.msrb.mxu0 %v3905_v7 }
 0x797   : > { %2093 = vmatpush.msrb.mxu0 %v3908_v27 }
 0x798   : > { %3028 = vmatmul.msk.f32.gmra.mxu0 %vm1413_vm2, %v3808_v0  ;;  %3032 = vmatmul.msk.f32.gmra.mxu3 %vm1413_vm2, %v3808_v0 }
 0x799   : > { %2094 = vmatpush.msrb.mxu0 %v3911_v2 }
 0x79b   : > { %2095 = vmatpush.msrb.mxu0 %v3918_v11 }
 0x79d   : > { %2096 = vmatpush.msrb.mxu0 %v3921_v57 }
 0x79f   : > { %2097 = vmatpush.msrb.mxu0 %v3924_v59 }
 0x7a0   : > { %3035 = vmatmul.msk.f32.vlgmr.msra.gmra.mxu0 %vm1413_vm2, %v3779_v12  ;;  %3039 = vmatmul.msk.f32.vlgmr.msra.gmra.mxu3 %vm1413_vm2, %v3779_v12 }
 0x7a1   : > { %2319 = vmatpush.msra.mxu0 %v3675_v58 }
 0x7a3   : > { %2320 = vmatpush.msra.mxu0 %v3681_v62 }
 0x7a5   : > { %2321 = vmatpush.msra.mxu0 %v3687_v1 }
 0x7a7   : > { %2322 = vmatpush.msra.mxu0 %v3693_v5  ;;  %v1582_v5 = vld [vmem:[#allocation7] sm:$0xff] }
 0x7a8   : > { %3036 = vmatmul.msk.f32.gmra.mxu0 %vm1413_vm2, %v3808_v0  ;;  %3040 = vmatmul.msk.f32.gmra.mxu3 %vm1413_vm2, %v3808_v0 }
 0x7a9   : > { %2323 = vmatpush.msra.mxu0 %v3699_v9 }
 0x7ab   : > { %2324 = vmatpush.msra.mxu0 %v3705_v45  ;;  %v1617_v45 = vld [vmem:[#allocation7 + $0x10] sm:$0xff] }
 0x7ad   : > { %2325 = vmatpush.msra.mxu0 %v3711_v10 }
 0x7af   : > { %2326 = vmatpush.msra.mxu0 %v3717_v13  ;;  %v1583_v13 = vld [vmem:[#allocation7 + $0x8] sm:$0xff] }
 0x7b0   : > { %3043 = vmatmul.msk.f32.vlgmr.msrb.gmra.mxu0 %vm1413_vm2, %v3779_v12  ;;  %v1711_v12 = vld [vmem:[#allocation7 + $0x28] sm:$0xff] }
 0x7b1   : > { %2428 = vmatpush.msrb.mxu0 %v3725_v17 }
 0x7b3   : > { %2429 = vmatpush.msrb.mxu0 %v3732_v25  ;;  %v1618_v25 = vld [vmem:[#allocation7 + $0x18] sm:$0xff] }
 0x7b5   : > { %2430 = vmatpush.msrb.mxu0 %v3739_v31 }
 0x7b7   : > { %2431 = vmatpush.msrb.mxu0 %v3745_v35 }
 0x7b8   : > { %3044 = vmatmul.msk.f32.gmra.mxu0 %vm1413_vm2, %v3808_v0  ;;  %v1777_v0 = vld [vmem:[#allocation7 + $0x38] sm:$0xff] }
 0x7b9   : > { %2432 = vmatpush.msrb.mxu0 %v3753_v30  ;;  %v1710_v30 = vld [vmem:[#allocation7 + $0x20] sm:$0xff] }
 0x7bb   : > { %2433 = vmatpush.msrb.mxu0 %v3757_v43  ;;  %v1776_v43 = vld [vmem:[#allocation7 + $0x30] sm:$0xff] }
 0x7bd   : > { %2434 = vmatpush.msrb.mxu0 %v3764_v48 }
 0x7bf   : > { %2435 = vmatpush.msrb.mxu0 %v3770_v52 }
 0x7ed   : > { %v1576_v58 = vpop.f32.mrf.mxu0 }
 0x7f3   : > { %v1610_v62 = vpop.f32.mrf.mxu3 }
 0x7f5   : > { %v1579_v1 = vpop.f32.mrf.mxu0 }
 0x7f6   : > { %1668 = vmatpush.msra.mxu2 %v1579_v1  ;;  %v1842_v1 = vld [vmem:[#allocation7 + $0x40] sm:$0xff] }
 0x7f8   : > { %1669 = vmatpush.msra.mxu2 %v1576_v58 }
 0x7f9   : > { %3017 = vmatmul.msk.f32.vlgmr.msra.gmra.mxu2 %vm1383_vm1, %v1582_v5  ;;  %v1908_v5 = vld [vmem:[#allocation7 + $0x50] sm:$0xff] }
 0x7fb   : > { %v1613_v9 = vpop.f32.mrf.mxu3 }
 0x7fc   : > { %1639 = vmatpush.msrb.mxu1 %v1613_v9 }
 0x7fd   : > { %v1703_v10 = vpop.f32.mrf.mxu0 }
 0x7fe   : > { %1640 = vmatpush.msrb.mxu1 %v1610_v62 }
 0x7ff   : > { %3015 = vmatmul.msk.f32.vlgmr.msrb.gmra.mxu1 %vm1383_vm1, %v1617_v45 }
 0x801   : > { %3018 = vmatmul.msk.f32.gmra.mxu2 %vm1383_vm1, %v1583_v13  ;;  %v1909_v13 = vld [vmem:[#allocation7 + $0x58] sm:$0xff] }
 0x803   : > { %v1769_v17 = vpop.f32.mrf.mxu3 }
 0x805   : > { %v1706_v31 = vpop.f32.mrf.mxu0 }
 0x806   : > { %1732 = vmatpush.msra.mxu1 %v1706_v31  ;;  %v1974_v31 = vld [vmem:[#allocation7 + $0x60] sm:$0xff] }
 0x807   : > { %3016 = vmatmul.msk.f32.gmra.mxu1 %vm1383_vm1, %v1618_v25 }
 0x808   : > { %1733 = vmatpush.msra.mxu1 %v1703_v10  ;;  %v1843_v10 = vld [vmem:[#allocation7 + $0x48] sm:$0xff] }
 0x80b   : > { %v1772_v35 = vpop.f32.mrf.mxu3 }
 0x80c   : > { %1798 = vmatpush.msrb.mxu2 %v1772_v35  ;;  %v2040_v35 = vld [vmem:[#allocation7 + $0x70] sm:$0xff] }
 0x80d   : > { %v1835_v48 = vpop.f32.mrf.mxu0 }
 0x80e   : > { %1799 = vmatpush.msrb.mxu2 %v1769_v17 }
 0x80f   : > { %3021 = vmatmul.msk.f32.vlgmr.msra.gmra.mxu1 %vm1383_vm1, %v1710_v30  ;;  %3025 = vmatmul.msk.f32.vlgmr.msrb.gmra.mxu2 %vm1383_vm1, %v1776_v43  ;;  %v1975_v43 = vld [vmem:[#allocation7 + $0x68] sm:$0xff] }
 0x813   : > { %v1901_v52 = vpop.f32.mrf.mxu3 }
 0x815   : > { %v1838_v58 = vpop.f32.mrf.mxu0 }
 0x816   : > { %1864 = vmatpush.msrb.mxu1 %v1838_v58 }
 0x817   : > { %3022 = vmatmul.msk.f32.gmra.mxu1 %vm1383_vm1, %v1711_v12  ;;  %3026 = vmatmul.msk.f32.gmra.mxu2 %vm1383_vm1, %v1777_v0  ;;  %v2106_v12 = vld [vmem:[#allocation7 + $0x80] sm:$0xff]  ;;  %v2107_v0 = vld [vmem:[#allocation7 + $0x88] sm:$0xff] }
 0x818   : > { %1865 = vmatpush.msrb.mxu1 %v1835_v48  ;;  %v2041_v48 = vld [vmem:[#allocation7 + $0x78] sm:$0xff] }
 0x81b   : > { %v1904_v62 = vpop.f32.mrf.mxu3 }
 0x81c   : > { %1930 = vmatpush.msra.mxu2 %v1904_v62 }
 0x81d   : > { %v1967_v9 = vpop.f32.mrf.mxu0 }
 0x81e   : > { %1931 = vmatpush.msra.mxu2 %v1901_v52 }
 0x81f   : > { %3029 = vmatmul.msk.f32.vlgmr.msrb.gmra.mxu1 %vm1383_vm1, %v1842_v1  ;;  %3033 = vmatmul.msk.f32.vlgmr.msra.gmra.mxu2 %vm1383_vm1, %v1908_v5 }
 0x823   : > { %v2033_v45 = vpop.f32.mrf.mxu3 }
 0x825   : > { %v1970_v17 = vpop.f32.mrf.mxu0 }
 0x826   : > { %1996 = vmatpush.msra.mxu1 %v1970_v17 }
 0x827   : > { %3030 = vmatmul.msk.f32.gmra.mxu1 %vm1383_vm1, %v1843_v10  ;;  %3034 = vmatmul.msk.f32.gmra.mxu2 %vm1383_vm1, %v1909_v13 }
 0x828   : > { %1997 = vmatpush.msra.mxu1 %v1967_v9 }
 0x82b   : > { %v2036_v25 = vpop.f32.mrf.mxu3 }
 0x82c   : > { %2062 = vmatpush.msrb.mxu2 %v2036_v25 }
 0x82d   : > { %v2099_v30 = vpop.f32.mrf.mxu0 }
 0x82e   : > { %2063 = vmatpush.msrb.mxu2 %v2033_v45 }
 0x82f   : > { %3037 = vmatmul.msk.f32.vlgmr.msra.gmra.mxu1 %vm1383_vm1, %v1974_v31  ;;  %3041 = vmatmul.msk.f32.vlgmr.msrb.gmra.mxu2 %vm1383_vm1, %v2040_v35 }
 0x835   : > { %v2102_v52 = vpop.f32.mrf.mxu0 }
 0x836   : > { %2128 = vmatpush.msrb.mxu1 %v2102_v52 }
 0x837   : > { %3038 = vmatmul.msk.f32.gmra.mxu1 %vm1383_vm1, %v1975_v43  ;;  %3042 = vmatmul.msk.f32.gmra.mxu2 %vm1383_vm1, %v2041_v48 }
 0x838   : > { %2129 = vmatpush.msrb.mxu1 %v2099_v30 }
 0x83a   : > { %2344 = vmatpush.msra.mxu1 %v3677_v60 }
 0x83c   : > { %2345 = vmatpush.msra.mxu1 %v3683_v63 }
 0x83e   : > { %2346 = vmatpush.msra.mxu1 %v3689_v3 }
 0x83f   : > { %3045 = vmatmul.msk.f32.vlgmr.msrb.gmra.mxu1 %vm1383_vm1, %v2106_v12  ;;  %v2147_v12 = vpop.permute.xlu0 %2146 }
 0x840   : > { %2347 = vmatpush.msra.mxu1 %v3695_v6 }
 0x842   : > { %2348 = vmatpush.msra.mxu1 %v3701_v53 }
 0x844   : > { %2349 = vmatpush.msra.mxu1 %v3707_v20 }
 0x846   : > { %2350 = vmatpush.msra.mxu1 %v3713_v40 }
 0x847   : > { %3046 = vmatmul.msk.f32.gmra.mxu1 %vm1383_vm1, %v2107_v0 }
 0x848   : > { %2351 = vmatpush.msra.mxu1 %v3719_v14 }
 0x87c   : > { %v1642_v60 = vpop.f32.mrf.mxu1  ;;  %v1671_v63 = vpop.f32.mrf.mxu2 }
 0x87d   : > { %v1672_v40 = vadd.f32 %v1671_v63, %v1642_v60  ;;  %v2142_v63 = vpop.permute.xlu0 %2141 }
 0x884   : > { %v1645_v58 = vpop.f32.mrf.mxu1  ;;  %v1674_v62 = vpop.f32.mrf.mxu2 }
 0x885   : > { %v1675_v25 = vadd.f32 %v1674_v62, %v1645_v58 }
 0x88c   : > { %v1735_v3 = vpop.f32.mrf.mxu1 }
 0x88d   : > { %v1741_v31 = vadd.f32 %v1735_v3, %v1672_v40 }
 0x892   : > { %v1801_v1 = vpop.f32.mrf.mxu2 }
 0x893   : > { %v1807_v14 = vadd.f32 %v1801_v1, %v1741_v31 }
 0x894   : > { %v1738_v5 = vpop.f32.mrf.mxu1 }
 0x895   : > { %v1742_v35 = vadd.f32 %v1738_v5, %v1675_v25 }
 0x89a   : > { %v1804_v9 = vpop.f32.mrf.mxu2 }
 0x89b   : > { %v1808_v30 = vadd.f32 %v1804_v9, %v1742_v35 }
 0x89c   : > { %v1867_v6 = vpop.f32.mrf.mxu1 }
 0x89d   : > { %v1873_v48 = vadd.f32 %v1867_v6, %v1807_v14 }
 0x8a2   : > { %v1933_v45 = vpop.f32.mrf.mxu2 }
 0x8a3   : > { %v1939_v0 = vadd.f32 %v1933_v45, %v1873_v48 }
 0x8a4   : > { %v1870_v53 = vpop.f32.mrf.mxu1 }
 0x8a5   : > { %v1874_v52 = vadd.f32 %v1870_v53, %v1808_v30 }
 0x8aa   : > { %v1936_v10 = vpop.f32.mrf.mxu2 }
 0x8ab   : > { %v1940_v4 = vadd.f32 %v1936_v10, %v1874_v52 }
 0x8ac   : > { %v1999_v13 = vpop.f32.mrf.mxu1 }
 0x8ad   : > { %v2005_v37 = vadd.f32 %v1999_v13, %v1939_v0  ;;  %v2966_v13 = vld [vmem:[%s4137_s7 + $0x48] sm:$0xff] }
 0x8b2   : > { %v2065_v17 = vpop.f32.mrf.mxu2 }
 0x8b3   : > { %v2071_v56 = vadd.f32 %v2065_v17, %v2005_v37 }
 0x8b4   : > { %v2002_v20 = vpop.f32.mrf.mxu1 }
 0x8b5   : > { %v2006_v24 = vadd.f32 %v2002_v20, %v1940_v4  ;;  %v2970_v20 = vld [vmem:[%s4137_s7 + $0x68] sm:$0xff] }
 0x8ba   : > { %v2068_v47 = vpop.f32.mrf.mxu2 }
 0x8bb   : > { %v2072_v49 = vadd.f32 %v2068_v47, %v2006_v24 }
 0x8bc   : > { %v2131_v43 = vpop.f32.mrf.mxu1 }
 0x8bd   : > { %v2137_v42 = vadd.f32 %v2131_v43, %v2071_v56 }
 0x8bf   : > { %v2149_v58 = vadd.f32 %v2142_v63, %v2137_v42  ;;  %v2968_v42 = vld [vmem:[%s4137_s7 + $0x58] sm:$0xff] }
 0x8c4   : > { %v2134_v44 = vpop.f32.mrf.mxu1 }
 0x8c5   : > { %v2138_v36 = vadd.f32 %v2134_v44, %v2072_v49 }
 0x8c7   : > { %v2150_v60 = vadd.f32 %v2147_v12, %v2138_v36  ;;  %v2965_v36 = vld [vmem:[%s4137_s7 + $0x40] sm:$0xff] }
 0x8c9   : > { %2165 = vmatpush.msrb.mxu3 %v2150_v60 }
 0x8cb   : > { %2166 = vmatpush.msrb.mxu3 %v2149_v58 }
 0x8cc   : > { %3047 = vmatmul.msk.f32.vlgmr.msrb.gmra.mxu3 %vm1383_vm1, %v3646_v22 }
 0x8d4   : > { %3048 = vmatmul.msk.f32.gmra.mxu3 %vm1383_vm1, %v3651_v23 }
 0x94f   : > { %v2168_v62 = vpop.f32.mrf.mxu3 }
 0x950   : > { %v2174_v3 = vsel %vm1413_vm2, %v2168_v62, 0.0 }
 0x951   : > { %2175 = vadd.xlane.f32.xlu1 %v2174_v3 }
 0x957   : > { %v2171_v37 = vpop.f32.mrf.mxu3 }
 0x958   : > { %v2177_v24 = vsel %vm1413_vm2, %v2171_v37, 0.0 }
 0x959   : > { %2178 = vadd.xlane.f32.xlu2 %v2177_v24 }
 0x96a   : > { %2243 = vperm.xlu1 %3158, %v2965_v36  }
 0x972   : > { %2260 = vperm.xlu1 %3158, %v2968_v42  }
 0x9c4   : > { %v2176_v44 = vpop.xlane.xlu1 %2175 }
 0x9c5   : > { %v2180_v49 = vmul.f32 0.0078125, %v2176_v44 }
 0x9c7   : > { %v2182_v4 = vsub.f32 %v2149_v58, %v2180_v49 }
 0x9c9   : > { %v2184_v9 = vmul.f32 %v2182_v4, %v2182_v4 }
 0x9cc   : > { %v2179_v56 = vpop.xlane.xlu2 %2178 }
 0x9cd   : > { %v2181_v47 = vmul.f32 0.0078125, %v2179_v56 }
 0x9cf   : > { %v2183_v1 = vsub.f32 %v2150_v60, %v2181_v47 }
 0x9d1   : > { %v2185_v5 = vmul.f32 %v2183_v1, %v2183_v1 }
 0x9d3   : > { %2200 = vmatpush.msra.mxu2 %v2185_v5 }
 0x9d5   : > { %2201 = vmatpush.msra.mxu2 %v2184_v9 }
 0x9d6   : > { %3049 = vmatmul.msk.f32.vlgmr.msra.gmra.mxu2 %vm1383_vm1, %v3646_v22  ;;  %v2969_v22 = vld [vmem:[%s4137_s7 + $0x60] sm:$0xff] }
 0x9dc   : > { %v2244_v37 = vpop.permute.xlu1 %2243 }
 0x9de   : > { %3050 = vmatmul.msk.f32.gmra.mxu2 %vm1383_vm1, %v3651_v23  ;;  %v2967_v23 = vld [vmem:[%s4137_s7 + $0x50] sm:$0xff] }
 0xa59   : > { %v2203_v6 = vpop.f32.mrf.mxu2 }
 0xa5a   : > { %v2209_v45 = vsel %vm1413_vm2, %v2203_v6, 0.0 }
 0xa5b   : > { %2210 = vadd.xlane.f32.xlu0 %v2209_v45 }
 0xa61   : > { %v2206_v53 = vpop.f32.mrf.mxu2 }
 0xa62   : > { %v2212_v10 = vsel %vm1413_vm2, %v2206_v53, 0.0  ;;  %v2261_v53 = vpop.permute.xlu1 %2260 }
 0xa63   : > { %2213 = vadd.xlane.f32.xlu2 %v2212_v10 }
 0xa6f   : > { %2248 = vperm.xlu0 %3157, %v2966_v13  }
 0xa77   : > { %2821 = vperm.xlu0 %3157, %v2969_v22  }
 0xa7b   : > { %2255 = vperm.xlu2 %3159, %v2967_v23  }
 0xa83   : > { %2826 = vperm.xlu2 %3159, %v2970_v20  }
 0xace   : > { %v2211_v17 = vpop.xlane.xlu0 %2210 }
 0xacf   : > { %v2215_v40 = vmul.f32 0.0078125, %v2211_v17 }
 0xad1   : > { %v2217_v25 = vadd.f32 1e-06, %v2215_v40 }
 0xad3   : > { %3172 = vrsqrt.f32 %v2217_v25  ;;  %vm2225_vm4 = vweird.f32 %v2217_v25 }
 0xad6   : > { %v2214_v31 = vpop.xlane.xlu2 %2213 }
 0xad7   : > { %v2216_v35 = vmul.f32 0.0078125, %v2214_v31 }
 0xad9   : > { %v3173_v14 = vpop.eup %3172  ;;  %v2218_v30 = vadd.f32 1e-06, %v2216_v35 }
 0xada   : > { %v2220_v43 = vmul.f32 %v3173_v14, %v2217_v25  ;;  %vm2226_vm3 = vweird.f32 %v3173_v14 }
 0xadb   : > { %3174 = vrsqrt.f32 %v2218_v30  ;;  %vm2227_vm5 = vmor %vm2225_vm4, %vm2226_vm3  ;;  %vm2235_vm7 = vweird.f32 %v2218_v30 }
 0xadc   : > { %v2221_v48 = vmul.f32 %v3173_v14, %v2220_v43 }
 0xade   : > { %v2222_v52 = vmul.f32 0.5, %v2221_v48  ;;  %v2256_v44 = vpop.permute.xlu2 %2255 }
 0xae0   : > { %v2223_v12 = vsub.f32 1.5, %v2222_v52 }
 0xae1   : > { %v3175_v0 = vpop.eup %3174  ;;  %v2249_v6 = vpop.permute.xlu0 %2248 }
 0xae2   : > { %v2230_v60 = vmul.f32 %v3175_v0, %v2218_v30  ;;  %v2224_v63 = vmul.f32 %v3173_v14, %v2223_v12  ;;  %vm2236_vm6 = vweird.f32 %v3175_v0 }
 0xae3   : > { %vm2237_vm8 = vmor %vm2235_vm7, %vm2236_vm6 }
 0xae4   : > { %v2231_v58 = vmul.f32 %v3175_v0, %v2230_v60  ;;  %v2228_v62 = vsel %vm2227_vm5, %v3173_v14, %v2224_v63 }
 0xae5   : > { %v2239_v3 = vmul.f32 %v2228_v62, %v2182_v4 }
 0xae6   : > { %v2232_v24 = vmul.f32 0.5, %v2231_v58 }
 0xae7   : > { %v2251_v36 = vmul.f32 %v2244_v37, %v2239_v3 }
 0xae8   : > { %v2233_v42 = vsub.f32 1.5, %v2232_v24 }
 0xae9   : > { %v2263_v49 = vadd.f32 %v2256_v44, %v2251_v36  ;;  %v4199_v44 = vld [vmem:[#allocation27_spill] sm:$0xff] }
 0xaea   : > { %v2234_v56 = vmul.f32 %v3175_v0, %v2233_v42 }
 0xaeb   : > { %v3051_v47 = vmul.f32 -1.442695, %v2263_v49 }
 0xaec   : > { %v2238_v5 = vsel %vm2237_vm8, %v3175_v0, %v2234_v56  ;;  %v4201_v56 = vld [vmem:[#allocation29_spill] sm:$0xff] }
 0xaed   : > { %3176 = vpow2.f32 %v3051_v47  ;;  %v2240_v9 = vmul.f32 %v2238_v5, %v2183_v1  ;;  %v4202_v5 = vld [vmem:[#allocation30_spill] sm:$0xff] }
 0xaef   : > { %v2252_v45 = vmul.f32 %v2249_v6, %v2240_v9  ;;  %v4203_v9 = vld [vmem:[#allocation31_spill] sm:$0xff]  ;;  %v4204_v6 = vld [vmem:[#allocation32_spill] sm:$0xff] }
 0xaf1   : > { %v2264_v10 = vadd.f32 %v2261_v53, %v2252_v45  ;;  %v4205_v45 = vld [vmem:[#allocation33_spill] sm:$0xff] }
 0xaf3   : > { %v3177_v13 = vpop.eup %3176  ;;  %v3052_v4 = vmul.f32 -1.442695, %v2264_v10 }
 0xaf4   : > { %v2271_v22 = vadd.f32 1.0, %v3177_v13  ;;  %v4207_v13 = vld [vmem:[#allocation35_spill] sm:$0xff] }
 0xaf5   : > { %3178 = vpow2.f32 %v3052_v4 }
 0xaf6   : > { %3180 = vrcp.f32 %v2271_v22  ;;  %v2284_v31 = vand.u32 2147483648, %v2271_v22  ;;  %v2282_v14 = vand.u32 2147483647, %v2271_v22  ;;  %vm2278_vm10 = vweird.f32 %v2271_v22 }
 0xaf8   : > { %v2285_v43 = vor.u32 1.1754944e-38, %v2284_v31  ;;  %vm2283_vm12 = vcmp.eq.f32.partialorder %v2282_v14, 8.507059e+37  ;;  %v2673_v14 = vld [vmem:[#allocation9 + $0x68] sm:$0xff] }
 0xafb   : > { %v3179_v23 = vpop.eup %3178 }
 0xafc   : > { %v3181_v20 = vpop.eup %3180  ;;  %v2272_v17 = vadd.f32 1.0, %v3179_v23 }
 0xafd   : > { %v2274_v40 = vmul.f32 %v3181_v20, %v2271_v22  ;;  %vm2279_vm9 = vweird.f32 %v3181_v20 }
 0xafe   : > { %3182 = vrcp.f32 %v2272_v17  ;;  %vm2280_vm11 = vmor %vm2278_vm10, %vm2279_vm9  ;;  %v2299_v63 = vand.u32 2147483648, %v2272_v17  ;;  %v2297_v62 = vand.u32 2147483647, %v2272_v17  ;;  %vm2293_vm14 = vweird.f32 %v2272_v17 }
 0xaff   : > { %v2275_v25 = vsub.f32 1.0, %v2274_v40 }
 0xb00   : > { %v2300_v37 = vor.u32 1.1754944e-38, %v2299_v63  ;;  %vm2298_vm0 = vcmp.eq.f32.partialorder %v2297_v62, 8.507059e+37  ;;  %v2730_v62 = vld [vmem:[#allocation9 + $0x78] sm:$0xff] }
 0xb01   : > { %v2276_v35 = vmul.f32 %v3181_v20, %v2275_v25  ;;  %v2672_v25 = vld [vmem:[#allocation9 + $0x60] sm:$0xff] }
 0xb03   : > { %v2277_v1 = vadd.f32 %v3181_v20, %v2276_v35  ;;  %v2501_v35 = vld [vmem:[#allocation9 + $0x30] sm:$0xff] }
 0xb04   : > { %v3183_v30 = vpop.eup %3182 }
 0xb05   : > { %v2281_v48 = vsel %vm2280_vm11, %v3181_v20, %v2277_v1  ;;  %v2289_v52 = vmul.f32 %v3183_v30, %v2272_v17  ;;  %vm2294_vm13 = vweird.f32 %v3183_v30  ;;  %v2559_v17 = vld [vmem:[#allocation9 + $0x48] sm:$0xff] }
 0xb06   : > { %v2286_v12 = vsel %vm2283_vm12, %v2285_v43, %v2281_v48  ;;  %vm2295_vm15 = vmor %vm2293_vm14, %vm2294_vm13  ;;  %v2786_v43 = vld [vmem:[#allocation9 + $0x80] sm:$0xff]  ;;  %v2787_v48 = vld [vmem:[#allocation9 + $0x88] sm:$0xff] }
 0xb07   : > { %v4012_v0 = vmul.f32 %v2286_v12, %v2263_v49  ;;  %v2290_v60 = vsub.f32 1.0, %v2289_v52  ;;  %v4200_v49 = vld [vmem:[#allocation28_spill] sm:$0xff]  ;;  %v2615_v12 = vld [vmem:[#allocation9 + $0x50] sm:$0xff] }
 0xb09   : > { %v2291_v58 = vmul.f32 %v3183_v30, %v2290_v60  ;;  %3053 = vmatmul.msk.f32.vlgmr.msra.gmra.mxu0 %vm1413_vm2, %v4012_v0  ;;  %3055 = vmatmul.msk.f32.vlgmr.msra.gmra.mxu1 %vm1413_vm2, %v4012_v0  ;;  %v2616_v60 = vld [vmem:[#allocation9 + $0x58] sm:$0xff] }
 0xb0a   : > { %2542 = vmatpush.msra.mxu0 %v3781_v19 }
 0xb0b   : > { %v2292_v3 = vadd.f32 %v3183_v30, %v2291_v58  ;;  %v2729_v58 = vld [vmem:[#allocation9 + $0x70] sm:$0xff] }
 0xb0c   : > { %2543 = vmatpush.msra.mxu0 %v3789_v34 }
 0xb0d   : > { %v2296_v24 = vsel %vm2295_vm15, %v3183_v30, %v2292_v3  ;;  %v2502_v30 = vld [vmem:[#allocation9 + $0x38] sm:$0xff] }
 0xb0e   : > { %v2301_v36 = vsel %vm2298_vm0, %v2300_v37, %v2296_v24  ;;  %2544 = vmatpush.msra.mxu0 %v3795_v46  ;;  %v2360_v46 = vld [vmem:[#allocation9 + $0x10] sm:$0xff] }
 0xb0f   : > { %v4021_v42 = vmul.f32 %v2301_v36, %v2264_v10  ;;  %v4206_v10 = vld [vmem:[#allocation34_spill] sm:$0xff] }
 0xb10   : > { %2545 = vmatpush.msra.mxu0 %v3801_v61  ;;  %v2334_v61 = vld [vmem:[#allocation9] sm:$0xff] }
 0xb11   : > { %3054 = vmatmul.msk.f32.gmra.mxu0 %vm1413_vm2, %v4021_v42  ;;  %3056 = vmatmul.msk.f32.gmra.mxu1 %vm1413_vm2, %v4021_v42 }
 0xb12   : > { %2546 = vmatpush.msra.mxu0 %v3810_v8 }
 0xb14   : > { %2547 = vmatpush.msra.mxu0 %v3820_v39  ;;  %v2335_v39 = vld [vmem:[#allocation9 + $0x8] sm:$0xff] }
 0xb16   : > { %2548 = vmatpush.msra.mxu0 %v3826_v38  ;;  %v4188_v38 = vld [vmem:[#allocation16_spill] sm:$0xff] }
 0xb18   : > { %2549 = vmatpush.msra.mxu0 %v3832_v33 }
 0xb19   : > { %3061 = vmatmul.msk.f32.vlgmr.msrb.gmra.mxu0 %vm1413_vm2, %v4012_v0 }
 0xb1a   : > { %2656 = vmatpush.msrb.mxu0 %v3838_v41  ;;  %v4193_v41 = vld [vmem:[#allocation21_spill] sm:$0xff] }
 0xb1c   : > { %2657 = vmatpush.msrb.mxu0 %v3848_v15  ;;  %v4194_v15 = vld [vmem:[#allocation22_spill] sm:$0xff] }
 0xb1e   : > { %2658 = vmatpush.msrb.mxu0 %v3854_v28  ;;  %v4195_v28 = vld [vmem:[#allocation23_spill] sm:$0xff] }
 0xb20   : > { %2659 = vmatpush.msrb.mxu0 %v3860_v16  ;;  %v4197_v16 = vld [vmem:[#allocation25_spill] sm:$0xff] }
 0xb21   : > { %3062 = vmatmul.msk.f32.gmra.mxu0 %vm1413_vm2, %v4021_v42 }
 0xb22   : > { %2660 = vmatpush.msrb.mxu0 %v3866_v54  ;;  %v4198_v54 = vld [vmem:[#allocation26_spill] sm:$0xff] }
 0xb24   : > { %2661 = vmatpush.msrb.mxu0 %v3876_v55 }
 0xb26   : > { %2662 = vmatpush.msrb.mxu0 %v3882_v29  ;;  %v4196_v29 = vld [vmem:[#allocation24_spill] sm:$0xff] }
 0xb28   : > { %2663 = vmatpush.msrb.mxu0 %v3888_v51 }
 0xb29   : > { %3069 = vmatmul.msk.f32.vlgmr.msra.gmra.mxu0 %vm1413_vm2, %v4012_v0 }
 0xb2a   : > { %2770 = vmatpush.msra.mxu0 %v3894_v50  ;;  %v4191_v50 = vld [vmem:[#allocation19_spill] sm:$0xff] }
 0xb2c   : > { %2771 = vmatpush.msra.mxu0 %v3902_v21 }
 0xb2e   : > { %2772 = vmatpush.msra.mxu0 %v3905_v7  ;;  %v2558_v7 = vld [vmem:[#allocation9 + $0x40] sm:$0xff] }
 0xb30   : > { %2773 = vmatpush.msra.mxu0 %v3908_v27  ;;  %v2445_v27 = vld [vmem:[#allocation9 + $0x28] sm:$0xff] }
 0xb31   : > { %3070 = vmatmul.msk.f32.gmra.mxu0 %vm1413_vm2, %v4021_v42 }
 0xb32   : > { %2774 = vmatpush.msra.mxu0 %v3911_v2  ;;  %v4189_v2 = vld [vmem:[#allocation17_spill] sm:$0xff] }
 0xb34   : > { %2775 = vmatpush.msra.mxu0 %v3918_v11 }
 0xb36   : > { %2776 = vmatpush.msra.mxu0 %v3921_v57  ;;  %v4187_v57 = vld [vmem:[#allocation15_spill] sm:$0xff] }
 0xb38   : > { %2777 = vmatpush.msra.mxu0 %v3924_v59  ;;  %v2361_v59 = vld [vmem:[#allocation9 + $0x18] sm:$0xff] }
 0xb39   : > { %3077 = vmatmul.msk.f32.vlgmr.msrb.gmra.mxu0 %vm1413_vm2, %v4012_v0 }
 0xb41   : > { %3078 = vmatmul.msk.f32.gmra.mxu0 %vm1413_vm2, %v4021_v42 }
 0xb49   : > { %3085 = vmatmul.msk.f32.vlgmr.msra.gmra.mxu0 %vm1413_vm2, %v4012_v0 }
 0xb51   : > { %3086 = vmatmul.msk.f32.gmra.mxu0 %vm1413_vm2, %v4021_v42 }
 0xb86   : > { %v2328_v55 = vpop.f32.mrf.mxu0  ;;  %v2353_v21 = vpop.f32.mrf.mxu1 }
 0xb8e   : > { %v2331_v19 = vpop.f32.mrf.mxu0  ;;  %v2356_v34 = vpop.f32.mrf.mxu1 }
 0xb8f   : > { %2382 = vmatpush.msra.mxu3 %v2356_v34  ;;  %2411 = vmatpush.msrb.mxu2 %v2331_v19 }
 0xb91   : > { %2383 = vmatpush.msra.mxu3 %v2353_v21  ;;  %2412 = vmatpush.msrb.mxu2 %v2328_v55 }
 0xb92   : > { %3057 = vmatmul.msk.f32.vlgmr.msra.gmra.mxu3 %vm1383_vm1, %v2360_v46  ;;  %3059 = vmatmul.msk.f32.vlgmr.msrb.gmra.mxu2 %vm1383_vm1, %v2334_v61 }
 0xb93   : > { %2485 = vmatpush.msrb.mxu3 %v3727_v18  ;;  %v4190_v18 = vld [vmem:[#allocation18_spill] sm:$0xff] }
 0xb95   : > { %2486 = vmatpush.msrb.mxu3 %v3734_v26  ;;  %v2444_v26 = vld [vmem:[#allocation9 + $0x20] sm:$0xff] }
 0xb96   : > { %v2437_v8 = vpop.f32.mrf.mxu0 }
 0xb97   : > { %2487 = vmatpush.msrb.mxu3 %v3741_v32  ;;  %v4192_v32 = vld [vmem:[#allocation20_spill] sm:$0xff] }
 0xb99   : > { %2488 = vmatpush.msrb.mxu3 %v4187_v57 }
 0xb9a   : > { %3058 = vmatmul.msk.f32.gmra.mxu3 %vm1383_vm1, %v2361_v59  ;;  %3060 = vmatmul.msk.f32.gmra.mxu2 %vm1383_vm1, %v2335_v39 }
 0xb9b   : > { %2489 = vmatpush.msrb.mxu3 %v4188_v38 }
 0xb9d   : > { %2490 = vmatpush.msrb.mxu3 %v4189_v2 }
 0xb9e   : > { %v2440_v33 = vpop.f32.mrf.mxu0 }
 0xb9f   : > { %2466 = vmatpush.msrb.mxu1 %v2440_v33  ;;  %2491 = vmatpush.msrb.mxu3 %v4190_v18 }
 0xba1   : > { %2467 = vmatpush.msrb.mxu1 %v2437_v8  ;;  %2492 = vmatpush.msrb.mxu3 %v4191_v50 }
 0xba2   : > { %3063 = vmatmul.msk.f32.vlgmr.msrb.gmra.mxu1 %vm1383_vm1, %v2444_v26  ;;  %3065 = vmatmul.msk.f32.vlgmr.msrb.gmra.mxu3 %vm1413_vm2, %v4012_v0 }
 0xba3   : > { %2599 = vmatpush.msra.mxu3 %v4192_v32 }
 0xba5   : > { %2600 = vmatpush.msra.mxu3 %v4193_v41 }
 0xba6   : > { %v2551_v11 = vpop.f32.mrf.mxu0 }
 0xba7   : > { %2601 = vmatpush.msra.mxu3 %v4194_v15 }
 0xba9   : > { %2602 = vmatpush.msra.mxu3 %v4195_v28 }
 0xbaa   : > { %3064 = vmatmul.msk.f32.gmra.mxu1 %vm1383_vm1, %v2445_v27  ;;  %3066 = vmatmul.msk.f32.gmra.mxu3 %vm1413_vm2, %v4021_v42 }
 0xbab   : > { %2603 = vmatpush.msra.mxu3 %v4196_v29  ;;  %v2822_v29 = vpop.permute.xlu0 %2821 }
 0xbad   : > { %2604 = vmatpush.msra.mxu3 %v4197_v16 }
 0xbae   : > { %v2554_v51 = vpop.f32.mrf.mxu0 }
 0xbaf   : > { %2580 = vmatpush.msra.mxu1 %v2554_v51  ;;  %2605 = vmatpush.msra.mxu3 %v4198_v54  ;;  %v4208_v54 = vld [vmem:[#allocation14_spill] sm:$0xff] }
 0xbb1   : > { %2581 = vmatpush.msra.mxu1 %v2551_v11  ;;  %2606 = vmatpush.msra.mxu3 %v4199_v44 }
 0xbb2   : > { %3073 = vmatmul.msk.f32.vlgmr.msra.gmra.mxu3 %vm1413_vm2, %v4012_v0  ;;  %3071 = vmatmul.msk.f32.vlgmr.msra.gmra.mxu1 %vm1383_vm1, %v2558_v7 }
 0xbb3   : > { %2713 = vmatpush.msrb.mxu3 %v4200_v49 }
 0xbb5   : > { %2714 = vmatpush.msrb.mxu3 %v4201_v56 }
 0xbb6   : > { %v2665_v47 = vpop.f32.mrf.mxu0 }
 0xbb7   : > { %2715 = vmatpush.msrb.mxu3 %v4202_v5  ;;  %v2827_v5 = vpop.permute.xlu2 %2826 }
 0xbb9   : > { %2716 = vmatpush.msrb.mxu3 %v4203_v9 }
 0xbba   : > { %3074 = vmatmul.msk.f32.gmra.mxu3 %vm1413_vm2, %v4021_v42  ;;  %3072 = vmatmul.msk.f32.gmra.mxu1 %vm1383_vm1, %v2559_v17 }
 0xbbb   : > { %2717 = vmatpush.msrb.mxu3 %v4204_v6  ;;  %v4209_v6 = vld [vmem:[#allocation13_spill] sm:$0xff] }
 0xbbd   : > { %2718 = vmatpush.msrb.mxu3 %v4205_v45 }
 0xbbe   : > { %v2668_v53 = vpop.f32.mrf.mxu0 }
 0xbbf   : > { %2694 = vmatpush.msrb.mxu1 %v2668_v53  ;;  %2719 = vmatpush.msrb.mxu3 %v4206_v10 }
 0xbc1   : > { %2695 = vmatpush.msrb.mxu1 %v2665_v47  ;;  %2720 = vmatpush.msrb.mxu3 %v4207_v13 }
 0xbc2   : > { %3081 = vmatmul.msk.f32.vlgmr.msrb.gmra.mxu3 %vm1413_vm2, %v4012_v0  ;;  %3079 = vmatmul.msk.f32.vlgmr.msrb.gmra.mxu1 %vm1383_vm1, %v2672_v25 }
 0xbc6   : > { %v2779_v4 = vpop.f32.mrf.mxu0 }
 0xbca   : > { %3082 = vmatmul.msk.f32.gmra.mxu3 %vm1413_vm2, %v4021_v42  ;;  %3080 = vmatmul.msk.f32.gmra.mxu1 %vm1383_vm1, %v2673_v14 }
 0xbce   : > { %v2782_v22 = vpop.f32.mrf.mxu0 }
 0xbcf   : > { %2808 = vmatpush.msrb.mxu0 %v2782_v22  ;;  %3093 = vmatpush.msra.mxu1 %v2782_v22 }
 0xbd1   : > { %2809 = vmatpush.msrb.mxu0 %v2779_v4  ;;  %3094 = vmatpush.msra.mxu1 %v2779_v4 }
 0xbd2   : > { %3087 = vmatmul.msk.f32.vlgmr.msrb.gmra.mxu0 %vm1383_vm1, %v2786_v43  ;;  %3088 = vmatmul.msk.f32.vlgmr.msra.gmra.mxu1 %vm1383_vm1, %v2787_v48 }
 0xc15   : > { %v2385_v23 = vpop.f32.mrf.mxu3  ;;  %v2414_v3 = vpop.f32.mrf.mxu2 }
 0xc16   : > { %v2415_v46 = vadd.f32 %v2414_v3, %v2385_v23 }
 0xc1d   : > { %v2388_v20 = vpop.f32.mrf.mxu3  ;;  %v2417_v24 = vpop.f32.mrf.mxu2 }
 0xc1e   : > { %v2418_v57 = vadd.f32 %v2417_v24, %v2388_v20 }
 0xc1f   : > { %v2469_v37 = vpop.f32.mrf.mxu1 }
 0xc20   : > { %v2475_v61 = vadd.f32 %v2469_v37, %v2415_v46 }
 0xc25   : > { %v2494_v40 = vpop.f32.mrf.mxu3 }
 0xc27   : > { %v2472_v36 = vpop.f32.mrf.mxu1 }
 0xc28   : > { %v2476_v2 = vadd.f32 %v2472_v36, %v2418_v57 }
 0xc2d   : > { %v2497_v31 = vpop.f32.mrf.mxu3 }
 0xc2e   : > { %2523 = vmatpush.msra.mxu2 %v2497_v31 }
 0xc2f   : > { %v2583_v55 = vpop.f32.mrf.mxu1 }
 0xc30   : > { %2524 = vmatpush.msra.mxu2 %v2494_v40 }
 0xc31   : > { %3067 = vmatmul.msk.f32.vlgmr.msra.gmra.mxu2 %vm1383_vm1, %v2501_v35 }
 0xc35   : > { %v2608_v1 = vpop.f32.mrf.mxu3 }
 0xc37   : > { %v2586_v19 = vpop.f32.mrf.mxu1 }
 0xc39   : > { %3068 = vmatmul.msk.f32.gmra.mxu2 %vm1383_vm1, %v2502_v30 }
 0xc3d   : > { %v2611_v52 = vpop.f32.mrf.mxu3 }
 0xc3e   : > { %2637 = vmatpush.msrb.mxu2 %v2611_v52 }
 0xc3f   : > { %v2697_v59 = vpop.f32.mrf.mxu1 }
 0xc40   : > { %2638 = vmatpush.msrb.mxu2 %v2608_v1 }
 0xc41   : > { %3075 = vmatmul.msk.f32.vlgmr.msrb.gmra.mxu2 %vm1383_vm1, %v2615_v12 }
 0xc45   : > { %v2722_v0 = vpop.f32.mrf.mxu3 }
 0xc47   : > { %v2700_v50 = vpop.f32.mrf.mxu1 }
 0xc49   : > { %3076 = vmatmul.msk.f32.gmra.mxu2 %vm1383_vm1, %v2616_v60 }
 0xc4d   : > { %v2725_v63 = vpop.f32.mrf.mxu3 }
 0xc4e   : > { %2751 = vmatpush.msra.mxu2 %v2725_v63 }
 0xc4f   : > { %v2811_v41 = vpop.f32.mrf.mxu0  ;;  %v2814_v49 = vpop.f32.mrf.mxu1 }
 0xc50   : > { %2752 = vmatpush.msra.mxu2 %v2722_v0 }
 0xc51   : > { %3083 = vmatmul.msk.f32.vlgmr.msra.gmra.mxu2 %vm1383_vm1, %v2729_v58 }
 0xc59   : > { %3084 = vmatmul.msk.f32.gmra.mxu2 %vm1383_vm1, %v2730_v62 }
 0xcb4   : > { %v2526_v42 = vpop.f32.mrf.mxu2 }
 0xcb5   : > { %v2532_v8 = vadd.f32 %v2526_v42, %v2475_v61 }
 0xcb7   : > { %v2589_v38 = vadd.f32 %v2583_v55, %v2532_v8 }
 0xcbc   : > { %v2529_v21 = vpop.f32.mrf.mxu2 }
 0xcbd   : > { %v2533_v18 = vadd.f32 %v2529_v21, %v2476_v2 }
 0xcbf   : > { %v2590_v11 = vadd.f32 %v2586_v19, %v2533_v18 }
 0xcc4   : > { %v2640_v34 = vpop.f32.mrf.mxu2 }
 0xcc5   : > { %v2646_v33 = vadd.f32 %v2640_v34, %v2589_v38 }
 0xcc7   : > { %v2703_v26 = vadd.f32 %v2697_v59, %v2646_v33 }
 0xccc   : > { %v2643_v39 = vpop.f32.mrf.mxu2 }
 0xccd   : > { %v2647_v27 = vadd.f32 %v2643_v39, %v2590_v11 }
 0xccf   : > { %v2704_v51 = vadd.f32 %v2700_v50, %v2647_v27 }
 0xcd4   : > { %v2754_v32 = vpop.f32.mrf.mxu2 }
 0xcd5   : > { %v2760_v15 = vadd.f32 %v2754_v32, %v2703_v26 }
 0xcd7   : > { %v2817_v28 = vadd.f32 %v2811_v41, %v2760_v15 }
 0xcd9   : > { %v2829_v16 = vadd.f32 %v2822_v29, %v2817_v28 }
 0xcdb   : > { %v2831_v7 = vadd.f32 %v2829_v16, %v4208_v54 }
 0xcdc   : > { %v2757_v44 = vpop.f32.mrf.mxu2 }
 0xcdd   : > { %2833 = vst.msk [vmem:[%s388_s12] sm:$0xff] %vm1413_vm2, %v2831_v7  ;;  %v2761_v56 = vadd.f32 %v2757_v44, %v2704_v51 }
 0xcdf   : > { %v2818_v47 = vadd.f32 %v2814_v49, %v2761_v56 }
 0xce1   : > { %v2830_v9 = vadd.f32 %v2827_v5, %v2818_v47 }
 0xce3   : > { %v2832_v45 = vadd.f32 %v2830_v9, %v4209_v6 }
 0xce5   : > { %2834 = vst.msk [vmem:[%s388_s12 + $0x8] sm:$0xff] %vm1413_vm2, %v2832_v45 }
 0xce6 PF: > { %s21_s27 = sadd.s32 1, %s3354_s27  }
 0xce7   : > { %p18_p7 = scmp.ge.s32.totalorder %s21_s27, 4  }
 0xce9   :  { %20 = sbr.rel (!%p18_p7) target bundleno = 3 (0x3), region = 149 }
 0xcee   :  { %2856 = vsyncpa [#allocation3], 1 }
 0xcef   :  { %2858 = vsyncpa [#allocation3 + $0x1], 1 }
 0xcf0   :  { %2859 = vsyncpa [#allocation5], 1 }
 0xcf1   :  { %2860 = vsyncpa [#allocation8], 1 }

</bundles_post_ra>
